<compile_context>
chip_gen: v7x
topology: tpu7x:2x2x1
jax: 0.10.0
libtpu: 0.0.40
codegen_flags: <defaults>
</compile_context>

<pallas_src>
import jax
import jax.numpy as jnp
import numpy as np
from jax.experimental import pallas as pl
from jax.experimental.pallas import tpu as pltpu

_EPS = 1e-5
_PADL = 128  # zero padding (in lanes) around the flattened activation slab


# ----------------------------------------------------------------------------
# Small host-side helpers (constant precompute / parameter folding).
# ----------------------------------------------------------------------------
def _bn_affine(gamma, beta, mean, var, eps=_EPS):
    """Fold eval-mode BatchNorm into per-channel scale/bias column vectors."""
    scale = gamma / jnp.sqrt(var + eps)
    bias = beta - mean * scale
    return scale.reshape(-1, 1), bias.reshape(-1, 1)


def _col_masks(K, H, W):
    """(K, H*W) 0/1 masks that kill conv taps crossing the W (row) boundary."""
    p = K // 2
    col = np.arange(H * W) % W
    m = np.zeros((K, H * W), np.float32)
    for j in range(K):
        dw = j - p
        m[j] = ((col + dw >= 0) & (col + dw < W)).astype(np.float32)
    return jnp.asarray(m)


def _pool_matrix(H, W, pool_size, pool_stride):
    """Pooling operator P: (H*W, H*W_out); AvgPool2d((1,ps),(1,stride)) == y @ P."""
    W_out = (W - pool_size) // pool_stride + 1
    P = np.zeros((H * W, H * W_out), np.float32)
    for h in range(H):
        for wo in range(W_out):
            for j in range(pool_size):
                P[h * W + wo * pool_stride + j, h * W_out + wo] = 1.0 / pool_size
    return jnp.asarray(P), W_out


# ----------------------------------------------------------------------------
# Kernel 1: one dense layer  ==  concat([x, Conv3x3(ReLU(BN(x)))], channels)
# ----------------------------------------------------------------------------
def _dense_layer_pallas(feat, scale, bias, col_mask, w_flat, *, cout, H, W, K):
    """feat: [N, cin, H*W] lane-dense; scale/bias: [cin,1]; col_mask: [K, H*W];
    w_flat: [K*K*cout*cin] conv weights in (i, j, cout, cin) order (SMEM)."""
    N, cin, HW = feat.shape
    p = K // 2
    ctot = cin + cout
    assert p * (W + 1) <= _PADL, "conv tap shift exceeds scratch padding"

    def kernel(x_ref, s_ref, b_ref, m_ref, w_ref, o_ref, apad_ref):
        x = x_ref[0]                                            # (cin, HW)
        a = jnp.maximum(x * s_ref[...] + b_ref[...], 0.0)       # BN (eval) + ReLU
        # Zero-padded, lane-contiguous activation slab: each conv tap becomes a
        # plain shifted lane window.  Reads spilling past the first/last image
        # row land in the zero pad; reads crossing the W boundary are masked.
        apad_ref[...] = jnp.zeros((cin, HW + 2 * _PADL), jnp.float32)
        apad_ref[:, _PADL:_PADL + HW] = a

        acc = [jnp.zeros((1, HW), jnp.float32) for _ in range(cout)]
        for t in range(K * K):
            dh, dw = t // K - p, t % K - p
            shift = dh * W + dw
            j = t % K
            mrow = None if dw == 0 else m_ref[j:j + 1, :]
            for ci in range(cin):
                row = apad_ref[ci:ci + 1, _PADL + shift:_PADL + shift + HW]
                if mrow is not None:
                    row = row * mrow
                for co in range(cout):
                    wv = w_ref[(t * cout + co) * cin + ci]      # scalar from SMEM
                    acc[co] = acc[co] + wv * row
        # Dense connectivity: passthrough input channels, append new features.
        o_ref[0, 0:cin, :] = x
        for co in range(cout):
            o_ref[0, cin + co:cin + co + 1, :] = acc[co]

    return pl.pallas_call(
        kernel,
        out_shape=jax.ShapeDtypeStruct((N, ctot, HW), jnp.float32),
        grid=(N,),
        in_specs=[
            pl.BlockSpec((1, cin, HW), lambda n: (n, 0, 0)),
            pl.BlockSpec((cin, 1), lambda n: (0, 0)),
            pl.BlockSpec((cin, 1), lambda n: (0, 0)),
            pl.BlockSpec((K, HW), lambda n: (0, 0)),
            pl.BlockSpec(memory_space=pltpu.MemorySpace.SMEM),
        ],
        out_specs=pl.BlockSpec((1, ctot, HW), lambda n: (n, 0, 0)),
        scratch_shapes=[pltpu.VMEM((cin, HW + 2 * _PADL), jnp.float32)],
        compiler_params=pltpu.CompilerParams(
            dimension_semantics=("parallel",)),
    )(feat, scale, bias, col_mask, w_flat)


# ----------------------------------------------------------------------------
# Kernel 2: final BatchNorm (eval) + AvgPool2d((1, ps), (1, stride))
# ----------------------------------------------------------------------------
def _bn_pool_pallas(feat, scale, bias, pool_mat):
    N, C, HW = feat.shape
    HWo = pool_mat.shape[1]
    cpad = (-C) % 8                # pad channels so the MXU matmul is tile-aligned
    if cpad:
        feat = jnp.pad(feat, ((0, 0), (0, cpad), (0, 0)))
        scale = jnp.pad(scale, ((0, cpad), (0, 0)))
        bias = jnp.pad(bias, ((0, cpad), (0, 0)))
    CP = C + cpad

    def kernel(x_ref, s_ref, b_ref, p_ref, o_ref):
        y = x_ref[0] * s_ref[...] + b_ref[...]                  # BN (eval) affine
        # Width pooling as one MXU matmul against the precomputed pooling
        # operator -> lane-dense (multiple-of-128) output slab.
        o_ref[0] = jnp.dot(y, p_ref[...], preferred_element_type=jnp.float32)

    out = pl.pallas_call(
        kernel,
        out_shape=jax.ShapeDtypeStruct((N, CP, HWo), jnp.float32),
        grid=(N,),
        in_specs=[
            pl.BlockSpec((1, CP, HW), lambda n: (n, 0, 0)),
            pl.BlockSpec((CP, 1), lambda n: (0, 0)),
            pl.BlockSpec((CP, 1), lambda n: (0, 0)),
            pl.BlockSpec((HW, HWo), lambda n: (0, 0)),
        ],
        out_specs=pl.BlockSpec((1, CP, HWo), lambda n: (n, 0, 0)),
        compiler_params=pltpu.CompilerParams(
            dimension_semantics=("parallel",)),
    )(feat, scale, bias, pool_mat)
    return out[:, :C, :]


# ----------------------------------------------------------------------------
# Full DenseBlock forward (Pallas) and pure-JAX reference.
# ----------------------------------------------------------------------------
def dense_block_forward(x, params, *, kernel_size, pool_size, pool_stride):
    N, C0, H, W = x.shape
    HW = H * W
    K = kernel_size

    feat = x.reshape(N, C0, HW)          # lane-dense [N, C, H*W] view
    col_mask = _col_masks(K, H, W)
    for layer in params["layers"]:
        cin = feat.shape[1]
        cout = layer["conv_w"].shape[0]
        scale, bias = _bn_affine(layer["gamma"], layer["beta"],
                                 layer["mean"], layer["var"])
        # flat (i, j, cout, cin) order -> plain scalar indexing from SMEM
        w_flat = jnp.transpose(layer["conv_w"], (2, 3, 0, 1)).reshape(-1)
        feat = _dense_layer_pallas(feat, scale, bias, col_mask, w_flat,
                                   cout=cout, H=H, W=W, K=K)

    bn = params["bn"]
    scale, bias = _bn_affine(bn["gamma"], bn["beta"], bn["mean"], bn["var"])
    pool_mat, W_out = _pool_matrix(H, W, pool_size, pool_stride)
    out = _bn_pool_pallas(feat, scale, bias, pool_mat)
    return out.reshape(N, out.shape[1], H, W_out)


def _conv2d_same_ref(a, w):
    """Reference Conv2d: stride 1, padding K//2, bias=False (cross-correlation)."""
    N, C, H, W = a.shape
    K = w.shape[-1]
    p = K // 2
    a_pad = jnp.pad(a, ((0, 0), (0, 0), (p, p), (p, p)))
    out = jnp.zeros((N, w.shape[0], H, W), jnp.float32)
    for i in range(K):
        for j in range(K):
            patch = a_pad[:, :, i:i + H, j:j + W]
            out = out + jnp.einsum("oc,nchw->nohw", w[:, :, i, j], patch,
                                   precision="highest")
    return out


def _bn_ref(x, g, b, m, v, eps=_EPS):
    return (x - m[None, :, None, None]) * (
        g / jnp.sqrt(v + eps))[None, :, None, None] + b[None, :, None, None]


def dense_block_reference(x, params, *, pool_size, pool_stride):
    feat = x
    for layer in params["layers"]:
        a = jnp.maximum(_bn_ref(feat, layer["gamma"], layer["beta"],
                                layer["mean"], layer["var"]), 0.0)
        new = _conv2d_same_ref(a, layer["conv_w"])
        feat = jnp.concatenate([feat, new], axis=1)
    bn = params["bn"]
    y = _bn_ref(feat, bn["gamma"], bn["beta"], bn["mean"], bn["var"])
    W = y.shape[-1]
    W_out = (W - pool_size) // pool_stride + 1
    cols = jnp.arange(W_out) * pool_stride
    return sum(y[..., cols + j] for j in range(pool_size)) / pool_size


def _make_params(key, in_planes, nb_layers, growth_rate, kernel_size):
    layers = []
    for i in range(nb_layers):
        cin = in_planes + i * growth_rate
        key, kg, kb, km, kv, kw = jax.random.split(key, 6)
        layers.append(dict(
            gamma=1.0 + 0.1 * jax.random.normal(kg, (cin,), jnp.float32),
            beta=0.1 * jax.random.normal(kb, (cin,), jnp.float32),
            mean=0.1 * jax.random.normal(km, (cin,), jnp.float32),
            var=jax.random.uniform(kv, (cin,), jnp.float32, 0.5, 1.5),
            conv_w=jax.random.normal(
                kw, (growth_rate, cin, kernel_size, kernel_size), jnp.float32)
            * (1.0 / float(np.sqrt(cin * kernel_size * kernel_size))),
        ))
    cfin = in_planes + nb_layers * growth_rate
    key, kg, kb, km, kv = jax.random.split(key, 5)
    bn = dict(
        gamma=1.0 + 0.1 * jax.random.normal(kg, (cfin,), jnp.float32),
        beta=0.1 * jax.random.normal(kb, (cfin,), jnp.float32),
        mean=0.1 * jax.random.normal(km, (cfin,), jnp.float32),
        var=jax.random.uniform(kv, (cfin,), jnp.float32, 0.5, 1.5),
    )
    return dict(layers=layers, bn=bn)


if __name__ == "__main__":
    # DenseBlock(block=BasicBlock, nb_layers=2, in_planes=4, growth_rate=4,
    #            kernel_size=3, pool_size=2, pool_stride=2, dropRate=0.5)
    N, in_planes, H, W = 2, 4, 16, 16
    nb_layers, growth_rate, kernel_size = 2, 4, 3
    pool_size, pool_stride = 2, 2

    key = jax.random.PRNGKey(0)
    key, kx = jax.random.split(key)
    x = jax.random.normal(kx, (N, in_planes, H, W), dtype=jnp.float32)
    params = _make_params(key, in_planes, nb_layers, growth_rate, kernel_size)

    y = dense_block_forward(x, params, kernel_size=kernel_size,
                            pool_size=pool_size, pool_stride=pool_stride)
    jax.block_until_ready(y)

    y_ref = dense_block_reference(x, params, pool_size=pool_size,
                                  pool_stride=pool_stride)

    c_final = in_planes + nb_layers * growth_rate
    w_out = (W - pool_size) // pool_stride + 1
    assert y.shape == (N, c_final, H, w_out), y.shape
    assert y.dtype == jnp.float32
    # Conv path is exact f32 VPU math; only possible divergence is the MXU
    # pooling matmul (f32 may run via bf16 passes), hence the 1e-2 tolerance.
    max_err = float(jnp.max(jnp.abs(y - y_ref)))
    assert jnp.allclose(y, y_ref, atol=1e-2, rtol=1e-2), f"max |err| = {max_err}"
    print("KERNEL_OK")
</pallas_src>

<mosaic_0001>
module attributes {stable_mosaic.version = 11 : i64} {
  func.func @kernel(%arg0: i32, %arg1: memref<1x4x256xf32, #tpu.memory_space<vmem>>, %arg2: memref<4x1xf32, #tpu.memory_space<vmem>>, %arg3: memref<4x1xf32, #tpu.memory_space<vmem>>, %arg4: memref<3x256xf32, #tpu.memory_space<vmem>>, %arg5: memref<144xf32, #tpu.memory_space<smem>>, %arg6: memref<1x8x256xf32, #tpu.memory_space<vmem>>, %arg7: memref<4x512xf32, #tpu.memory_space<vmem>>) attributes {dimension_semantics = [#tpu.dimension_semantics<parallel>], iteration_bounds = array<i64: 2>, scalar_prefetch = 0 : i64, scratch_operands = 1 : i64, tpu.core_type = #tpu.core_type<tc>, window_params = [{transform_indices = @transform_0, window_bounds = array<i64: 1, 4, 256>}, {pipeline_mode = #tpu.pipeline_mode<synchronous>, transform_indices = @transform_1, window_bounds = array<i64: 4, 1>}, {pipeline_mode = #tpu.pipeline_mode<synchronous>, transform_indices = @transform_2, window_bounds = array<i64: 4, 1>}, {pipeline_mode = #tpu.pipeline_mode<synchronous>, transform_indices = @transform_3, window_bounds = array<i64: 3, 256>}, {transform_indices = @transform_4, window_bounds = array<i64: 144>}, {transform_indices = @transform_5, window_bounds = array<i64: 1, 8, 256>}]} {
    %c0 = arith.constant 0 : index
    %c0_0 = arith.constant 0 : index
    %c0_1 = arith.constant 0 : index
    %0 = vector.load %arg1[%c0, %c0_0, %c0_1] : memref<1x4x256xf32, #tpu.memory_space<vmem>>, vector<1x4x256xf32>
    %1 = vector.shape_cast %0 : vector<1x4x256xf32> to vector<4x256xf32>
    %c0_2 = arith.constant 0 : index
    %c0_3 = arith.constant 0 : index
    %2 = vector.load %arg2[%c0_2, %c0_3] : memref<4x1xf32, #tpu.memory_space<vmem>>, vector<4x1xf32>
    %3 = vector.broadcast %2 : vector<4x1xf32> to vector<4x256xf32>
    %4 = arith.mulf %1, %3 : vector<4x256xf32>
    %c0_4 = arith.constant 0 : index
    %c0_5 = arith.constant 0 : index
    %5 = vector.load %arg3[%c0_4, %c0_5] : memref<4x1xf32, #tpu.memory_space<vmem>>, vector<4x1xf32>
    %6 = vector.broadcast %5 : vector<4x1xf32> to vector<4x256xf32>
    %7 = arith.addf %4, %6 : vector<4x256xf32>
    %cst = arith.constant 0.000000e+00 : f32
    %8 = vector.broadcast %cst : f32 to vector<4x256xf32>
    %9 = arith.maximumf %7, %8 : vector<4x256xf32>
    %cst_6 = arith.constant 0.000000e+00 : f32
    %10 = vector.broadcast %cst_6 : f32 to vector<4x512xf32>
    %c0_7 = arith.constant 0 : index
    %c0_8 = arith.constant 0 : index
    %11 = vector.load %arg7[%c0_7, %c0_8] : memref<4x512xf32, #tpu.memory_space<vmem>>, vector<4x512xf32>
    tpu.vector_store %arg7[%c0_7, %c0_8], %10 {strides = array<i32>} : memref<4x512xf32, #tpu.memory_space<vmem>>, vector<4x512xf32>,
    %c0_9 = arith.constant 0 : index
    %c128 = arith.constant 128 : index
    %12 = vector.load %arg7[%c0_9, %c128] : memref<4x512xf32, #tpu.memory_space<vmem>>, vector<4x256xf32>
    tpu.vector_store %arg7[%c0_9, %c128], %9 {strides = array<i32>} : memref<4x512xf32, #tpu.memory_space<vmem>>, vector<4x256xf32>,
    %cst_10 = arith.constant 0.000000e+00 : f32
    %13 = vector.broadcast %cst_10 : f32 to vector<1x256xf32>
    %cst_11 = arith.constant 0.000000e+00 : f32
    %14 = vector.broadcast %cst_11 : f32 to vector<1x256xf32>
    %cst_12 = arith.constant 0.000000e+00 : f32
    %15 = vector.broadcast %cst_12 : f32 to vector<1x256xf32>
    %cst_13 = arith.constant 0.000000e+00 : f32
    %16 = vector.broadcast %cst_13 : f32 to vector<1x256xf32>
    %c0_14 = arith.constant 0 : index
    %c0_15 = arith.constant 0 : index
    %17 = vector.load %arg4[%c0_14, %c0_15] : memref<3x256xf32, #tpu.memory_space<vmem>>, vector<1x256xf32>
    %c0_16 = arith.constant 0 : index
    %c111 = arith.constant 111 : index
    %18 = vector.load %arg7[%c0_16, %c111] : memref<4x512xf32, #tpu.memory_space<vmem>>, vector<1x256xf32>
    %19 = arith.mulf %18, %17 : vector<1x256xf32>
    %c0_17 = arith.constant 0 : index
    %20 = memref.load %arg5[%c0_17] : memref<144xf32, #tpu.memory_space<smem>>
    %21 = vector.broadcast %20 : f32 to vector<1x256xf32>
    %22 = arith.mulf %21, %19 : vector<1x256xf32>
    %23 = arith.addf %13, %22 : vector<1x256xf32>
    %c4 = arith.constant 4 : index
    %24 = memref.load %arg5[%c4] : memref<144xf32, #tpu.memory_space<smem>>
    %25 = vector.broadcast %24 : f32 to vector<1x256xf32>
    %26 = arith.mulf %25, %19 : vector<1x256xf32>
    %27 = arith.addf %14, %26 : vector<1x256xf32>
    %c8 = arith.constant 8 : index
    %28 = memref.load %arg5[%c8] : memref<144xf32, #tpu.memory_space<smem>>
    %29 = vector.broadcast %28 : f32 to vector<1x256xf32>
    %30 = arith.mulf %29, %19 : vector<1x256xf32>
    %31 = arith.addf %15, %30 : vector<1x256xf32>
    %c12 = arith.constant 12 : index
    %32 = memref.load %arg5[%c12] : memref<144xf32, #tpu.memory_space<smem>>
    %33 = vector.broadcast %32 : f32 to vector<1x256xf32>
    %34 = arith.mulf %33, %19 : vector<1x256xf32>
    %35 = arith.addf %16, %34 : vector<1x256xf32>
    %c1 = arith.constant 1 : index
    %c111_18 = arith.constant 111 : index
    %36 = vector.load %arg7[%c1, %c111_18] : memref<4x512xf32, #tpu.memory_space<vmem>>, vector<1x256xf32>
    %37 = arith.mulf %36, %17 : vector<1x256xf32>
    %c1_19 = arith.constant 1 : index
    %38 = memref.load %arg5[%c1_19] : memref<144xf32, #tpu.memory_space<smem>>
    %39 = vector.broadcast %38 : f32 to vector<1x256xf32>
    %40 = arith.mulf %39, %37 : vector<1x256xf32>
    %41 = arith.addf %23, %40 : vector<1x256xf32>
    %c5 = arith.constant 5 : index
    %42 = memref.load %arg5[%c5] : memref<144xf32, #tpu.memory_space<smem>>
    %43 = vector.broadcast %42 : f32 to vector<1x256xf32>
    %44 = arith.mulf %43, %37 : vector<1x256xf32>
    %45 = arith.addf %27, %44 : vector<1x256xf32>
    %c9 = arith.constant 9 : index
    %46 = memref.load %arg5[%c9] : memref<144xf32, #tpu.memory_space<smem>>
    %47 = vector.broadcast %46 : f32 to vector<1x256xf32>
    %48 = arith.mulf %47, %37 : vector<1x256xf32>
    %49 = arith.addf %31, %48 : vector<1x256xf32>
    %c13 = arith.constant 13 : index
    %50 = memref.load %arg5[%c13] : memref<144xf32, #tpu.memory_space<smem>>
    %51 = vector.broadcast %50 : f32 to vector<1x256xf32>
    %52 = arith.mulf %51, %37 : vector<1x256xf32>
    %53 = arith.addf %35, %52 : vector<1x256xf32>
    %c2 = arith.constant 2 : index
    %c111_20 = arith.constant 111 : index
    %54 = vector.load %arg7[%c2, %c111_20] : memref<4x512xf32, #tpu.memory_space<vmem>>, vector<1x256xf32>
    %55 = arith.mulf %54, %17 : vector<1x256xf32>
    %c2_21 = arith.constant 2 : index
    %56 = memref.load %arg5[%c2_21] : memref<144xf32, #tpu.memory_space<smem>>
    %57 = vector.broadcast %56 : f32 to vector<1x256xf32>
    %58 = arith.mulf %57, %55 : vector<1x256xf32>
    %59 = arith.addf %41, %58 : vector<1x256xf32>
    %c6 = arith.constant 6 : index
    %60 = memref.load %arg5[%c6] : memref<144xf32, #tpu.memory_space<smem>>
    %61 = vector.broadcast %60 : f32 to vector<1x256xf32>
    %62 = arith.mulf %61, %55 : vector<1x256xf32>
    %63 = arith.addf %45, %62 : vector<1x256xf32>
    %c10 = arith.constant 10 : index
    %64 = memref.load %arg5[%c10] : memref<144xf32, #tpu.memory_space<smem>>
    %65 = vector.broadcast %64 : f32 to vector<1x256xf32>
    %66 = arith.mulf %65, %55 : vector<1x256xf32>
    %67 = arith.addf %49, %66 : vector<1x256xf32>
    %c14 = arith.constant 14 : index
    %68 = memref.load %arg5[%c14] : memref<144xf32, #tpu.memory_space<smem>>
    %69 = vector.broadcast %68 : f32 to vector<1x256xf32>
    %70 = arith.mulf %69, %55 : vector<1x256xf32>
    %71 = arith.addf %53, %70 : vector<1x256xf32>
    %c3 = arith.constant 3 : index
    %c111_22 = arith.constant 111 : index
    %72 = vector.load %arg7[%c3, %c111_22] : memref<4x512xf32, #tpu.memory_space<vmem>>, vector<1x256xf32>
    %73 = arith.mulf %72, %17 : vector<1x256xf32>
    %c3_23 = arith.constant 3 : index
    %74 = memref.load %arg5[%c3_23] : memref<144xf32, #tpu.memory_space<smem>>
    %75 = vector.broadcast %74 : f32 to vector<1x256xf32>
    %76 = arith.mulf %75, %73 : vector<1x256xf32>
    %77 = arith.addf %59, %76 : vector<1x256xf32>
    %c7 = arith.constant 7 : index
    %78 = memref.load %arg5[%c7] : memref<144xf32, #tpu.memory_space<smem>>
    %79 = vector.broadcast %78 : f32 to vector<1x256xf32>
    %80 = arith.mulf %79, %73 : vector<1x256xf32>
    %81 = arith.addf %63, %80 : vector<1x256xf32>
    %c11 = arith.constant 11 : index
    %82 = memref.load %arg5[%c11] : memref<144xf32, #tpu.memory_space<smem>>
    %83 = vector.broadcast %82 : f32 to vector<1x256xf32>
    %84 = arith.mulf %83, %73 : vector<1x256xf32>
    %85 = arith.addf %67, %84 : vector<1x256xf32>
    %c15 = arith.constant 15 : index
    %86 = memref.load %arg5[%c15] : memref<144xf32, #tpu.memory_space<smem>>
    %87 = vector.broadcast %86 : f32 to vector<1x256xf32>
    %88 = arith.mulf %87, %73 : vector<1x256xf32>
    %89 = arith.addf %71, %88 : vector<1x256xf32>
    %c0_24 = arith.constant 0 : index
    %c112 = arith.constant 112 : index
    %90 = vector.load %arg7[%c0_24, %c112] : memref<4x512xf32, #tpu.memory_space<vmem>>, vector<1x256xf32>
    %c16 = arith.constant 16 : index
    %91 = memref.load %arg5[%c16] : memref<144xf32, #tpu.memory_space<smem>>
    %92 = vector.broadcast %91 : f32 to vector<1x256xf32>
    %93 = arith.mulf %92, %90 : vector<1x256xf32>
    %94 = arith.addf %77, %93 : vector<1x256xf32>
    %c20 = arith.constant 20 : index
    %95 = memref.load %arg5[%c20] : memref<144xf32, #tpu.memory_space<smem>>
    %96 = vector.broadcast %95 : f32 to vector<1x256xf32>
    %97 = arith.mulf %96, %90 : vector<1x256xf32>
    %98 = arith.addf %81, %97 : vector<1x256xf32>
    %c24 = arith.constant 24 : index
    %99 = memref.load %arg5[%c24] : memref<144xf32, #tpu.memory_space<smem>>
    %100 = vector.broadcast %99 : f32 to vector<1x256xf32>
    %101 = arith.mulf %100, %90 : vector<1x256xf32>
    %102 = arith.addf %85, %101 : vector<1x256xf32>
    %c28 = arith.constant 28 : index
    %103 = memref.load %arg5[%c28] : memref<144xf32, #tpu.memory_space<smem>>
    %104 = vector.broadcast %103 : f32 to vector<1x256xf32>
    %105 = arith.mulf %104, %90 : vector<1x256xf32>
    %106 = arith.addf %89, %105 : vector<1x256xf32>
    %c1_25 = arith.constant 1 : index
    %c112_26 = arith.constant 112 : index
    %107 = vector.load %arg7[%c1_25, %c112_26] : memref<4x512xf32, #tpu.memory_space<vmem>>, vector<1x256xf32>
    %c17 = arith.constant 17 : index
    %108 = memref.load %arg5[%c17] : memref<144xf32, #tpu.memory_space<smem>>
    %109 = vector.broadcast %108 : f32 to vector<1x256xf32>
    %110 = arith.mulf %109, %107 : vector<1x256xf32>
    %111 = arith.addf %94, %110 : vector<1x256xf32>
    %c21 = arith.constant 21 : index
    %112 = memref.load %arg5[%c21] : memref<144xf32, #tpu.memory_space<smem>>
    %113 = vector.broadcast %112 : f32 to vector<1x256xf32>
    %114 = arith.mulf %113, %107 : vector<1x256xf32>
    %115 = arith.addf %98, %114 : vector<1x256xf32>
    %c25 = arith.constant 25 : index
    %116 = memref.load %arg5[%c25] : memref<144xf32, #tpu.memory_space<smem>>
    %117 = vector.broadcast %116 : f32 to vector<1x256xf32>
    %118 = arith.mulf %117, %107 : vector<1x256xf32>
    %119 = arith.addf %102, %118 : vector<1x256xf32>
    %c29 = arith.constant 29 : index
    %120 = memref.load %arg5[%c29] : memref<144xf32, #tpu.memory_space<smem>>
    %121 = vector.broadcast %120 : f32 to vector<1x256xf32>
    %122 = arith.mulf %121, %107 : vector<1x256xf32>
    %123 = arith.addf %106, %122 : vector<1x256xf32>
    %c2_27 = arith.constant 2 : index
    %c112_28 = arith.constant 112 : index
    %124 = vector.load %arg7[%c2_27, %c112_28] : memref<4x512xf32, #tpu.memory_space<vmem>>, vector<1x256xf32>
    %c18 = arith.constant 18 : index
    %125 = memref.load %arg5[%c18] : memref<144xf32, #tpu.memory_space<smem>>
    %126 = vector.broadcast %125 : f32 to vector<1x256xf32>
    %127 = arith.mulf %126, %124 : vector<1x256xf32>
    %128 = arith.addf %111, %127 : vector<1x256xf32>
    %c22 = arith.constant 22 : index
    %129 = memref.load %arg5[%c22] : memref<144xf32, #tpu.memory_space<smem>>
    %130 = vector.broadcast %129 : f32 to vector<1x256xf32>
    %131 = arith.mulf %130, %124 : vector<1x256xf32>
    %132 = arith.addf %115, %131 : vector<1x256xf32>
    %c26 = arith.constant 26 : index
    %133 = memref.load %arg5[%c26] : memref<144xf32, #tpu.memory_space<smem>>
    %134 = vector.broadcast %133 : f32 to vector<1x256xf32>
    %135 = arith.mulf %134, %124 : vector<1x256xf32>
    %136 = arith.addf %119, %135 : vector<1x256xf32>
    %c30 = arith.constant 30 : index
    %137 = memref.load %arg5[%c30] : memref<144xf32, #tpu.memory_space<smem>>
    %138 = vector.broadcast %137 : f32 to vector<1x256xf32>
    %139 = arith.mulf %138, %124 : vector<1x256xf32>
    %140 = arith.addf %123, %139 : vector<1x256xf32>
    %c3_29 = arith.constant 3 : index
    %c112_30 = arith.constant 112 : index
    %141 = vector.load %arg7[%c3_29, %c112_30] : memref<4x512xf32, #tpu.memory_space<vmem>>, vector<1x256xf32>
    %c19 = arith.constant 19 : index
    %142 = memref.load %arg5[%c19] : memref<144xf32, #tpu.memory_space<smem>>
    %143 = vector.broadcast %142 : f32 to vector<1x256xf32>
    %144 = arith.mulf %143, %141 : vector<1x256xf32>
    %145 = arith.addf %128, %144 : vector<1x256xf32>
    %c23 = arith.constant 23 : index
    %146 = memref.load %arg5[%c23] : memref<144xf32, #tpu.memory_space<smem>>
    %147 = vector.broadcast %146 : f32 to vector<1x256xf32>
    %148 = arith.mulf %147, %141 : vector<1x256xf32>
    %149 = arith.addf %132, %148 : vector<1x256xf32>
    %c27 = arith.constant 27 : index
    %150 = memref.load %arg5[%c27] : memref<144xf32, #tpu.memory_space<smem>>
    %151 = vector.broadcast %150 : f32 to vector<1x256xf32>
    %152 = arith.mulf %151, %141 : vector<1x256xf32>
    %153 = arith.addf %136, %152 : vector<1x256xf32>
    %c31 = arith.constant 31 : index
    %154 = memref.load %arg5[%c31] : memref<144xf32, #tpu.memory_space<smem>>
    %155 = vector.broadcast %154 : f32 to vector<1x256xf32>
    %156 = arith.mulf %155, %141 : vector<1x256xf32>
    %157 = arith.addf %140, %156 : vector<1x256xf32>
    %c2_31 = arith.constant 2 : index
    %c0_32 = arith.constant 0 : index
    %158 = vector.load %arg4[%c2_31, %c0_32] : memref<3x256xf32, #tpu.memory_space<vmem>>, vector<1x256xf32>
    %c0_33 = arith.constant 0 : index
    %c113 = arith.constant 113 : index
    %159 = vector.load %arg7[%c0_33, %c113] : memref<4x512xf32, #tpu.memory_space<vmem>>, vector<1x256xf32>
    %160 = arith.mulf %159, %158 : vector<1x256xf32>
    %c32 = arith.constant 32 : index
    %161 = memref.load %arg5[%c32] : memref<144xf32, #tpu.memory_space<smem>>
    %162 = vector.broadcast %161 : f32 to vector<1x256xf32>
    %163 = arith.mulf %162, %160 : vector<1x256xf32>
    %164 = arith.addf %145, %163 : vector<1x256xf32>
    %c36 = arith.constant 36 : index
    %165 = memref.load %arg5[%c36] : memref<144xf32, #tpu.memory_space<smem>>
    %166 = vector.broadcast %165 : f32 to vector<1x256xf32>
    %167 = arith.mulf %166, %160 : vector<1x256xf32>
    %168 = arith.addf %149, %167 : vector<1x256xf32>
    %c40 = arith.constant 40 : index
    %169 = memref.load %arg5[%c40] : memref<144xf32, #tpu.memory_space<smem>>
    %170 = vector.broadcast %169 : f32 to vector<1x256xf32>
    %171 = arith.mulf %170, %160 : vector<1x256xf32>
    %172 = arith.addf %153, %171 : vector<1x256xf32>
    %c44 = arith.constant 44 : index
    %173 = memref.load %arg5[%c44] : memref<144xf32, #tpu.memory_space<smem>>
    %174 = vector.broadcast %173 : f32 to vector<1x256xf32>
    %175 = arith.mulf %174, %160 : vector<1x256xf32>
    %176 = arith.addf %157, %175 : vector<1x256xf32>
    %c1_34 = arith.constant 1 : index
    %c113_35 = arith.constant 113 : index
    %177 = vector.load %arg7[%c1_34, %c113_35] : memref<4x512xf32, #tpu.memory_space<vmem>>, vector<1x256xf32>
    %178 = arith.mulf %177, %158 : vector<1x256xf32>
    %c33 = arith.constant 33 : index
    %179 = memref.load %arg5[%c33] : memref<144xf32, #tpu.memory_space<smem>>
    %180 = vector.broadcast %179 : f32 to vector<1x256xf32>
    %181 = arith.mulf %180, %178 : vector<1x256xf32>
    %182 = arith.addf %164, %181 : vector<1x256xf32>
    %c37 = arith.constant 37 : index
    %183 = memref.load %arg5[%c37] : memref<144xf32, #tpu.memory_space<smem>>
    %184 = vector.broadcast %183 : f32 to vector<1x256xf32>
    %185 = arith.mulf %184, %178 : vector<1x256xf32>
    %186 = arith.addf %168, %185 : vector<1x256xf32>
    %c41 = arith.constant 41 : index
    %187 = memref.load %arg5[%c41] : memref<144xf32, #tpu.memory_space<smem>>
    %188 = vector.broadcast %187 : f32 to vector<1x256xf32>
    %189 = arith.mulf %188, %178 : vector<1x256xf32>
    %190 = arith.addf %172, %189 : vector<1x256xf32>
    %c45 = arith.constant 45 : index
    %191 = memref.load %arg5[%c45] : memref<144xf32, #tpu.memory_space<smem>>
    %192 = vector.broadcast %191 : f32 to vector<1x256xf32>
    %193 = arith.mulf %192, %178 : vector<1x256xf32>
    %194 = arith.addf %176, %193 : vector<1x256xf32>
    %c2_36 = arith.constant 2 : index
    %c113_37 = arith.constant 113 : index
    %195 = vector.load %arg7[%c2_36, %c113_37] : memref<4x512xf32, #tpu.memory_space<vmem>>, vector<1x256xf32>
    %196 = arith.mulf %195, %158 : vector<1x256xf32>
    %c34 = arith.constant 34 : index
    %197 = memref.load %arg5[%c34] : memref<144xf32, #tpu.memory_space<smem>>
    %198 = vector.broadcast %197 : f32 to vector<1x256xf32>
    %199 = arith.mulf %198, %196 : vector<1x256xf32>
    %200 = arith.addf %182, %199 : vector<1x256xf32>
    %c38 = arith.constant 38 : index
    %201 = memref.load %arg5[%c38] : memref<144xf32, #tpu.memory_space<smem>>
    %202 = vector.broadcast %201 : f32 to vector<1x256xf32>
    %203 = arith.mulf %202, %196 : vector<1x256xf32>
    %204 = arith.addf %186, %203 : vector<1x256xf32>
    %c42 = arith.constant 42 : index
    %205 = memref.load %arg5[%c42] : memref<144xf32, #tpu.memory_space<smem>>
    %206 = vector.broadcast %205 : f32 to vector<1x256xf32>
    %207 = arith.mulf %206, %196 : vector<1x256xf32>
    %208 = arith.addf %190, %207 : vector<1x256xf32>
    %c46 = arith.constant 46 : index
    %209 = memref.load %arg5[%c46] : memref<144xf32, #tpu.memory_space<smem>>
    %210 = vector.broadcast %209 : f32 to vector<1x256xf32>
    %211 = arith.mulf %210, %196 : vector<1x256xf32>
    %212 = arith.addf %194, %211 : vector<1x256xf32>
    %c3_38 = arith.constant 3 : index
    %c113_39 = arith.constant 113 : index
    %213 = vector.load %arg7[%c3_38, %c113_39] : memref<4x512xf32, #tpu.memory_space<vmem>>, vector<1x256xf32>
    %214 = arith.mulf %213, %158 : vector<1x256xf32>
    %c35 = arith.constant 35 : index
    %215 = memref.load %arg5[%c35] : memref<144xf32, #tpu.memory_space<smem>>
    %216 = vector.broadcast %215 : f32 to vector<1x256xf32>
    %217 = arith.mulf %216, %214 : vector<1x256xf32>
    %218 = arith.addf %200, %217 : vector<1x256xf32>
    %c39 = arith.constant 39 : index
    %219 = memref.load %arg5[%c39] : memref<144xf32, #tpu.memory_space<smem>>
    %220 = vector.broadcast %219 : f32 to vector<1x256xf32>
    %221 = arith.mulf %220, %214 : vector<1x256xf32>
    %222 = arith.addf %204, %221 : vector<1x256xf32>
    %c43 = arith.constant 43 : index
    %223 = memref.load %arg5[%c43] : memref<144xf32, #tpu.memory_space<smem>>
    %224 = vector.broadcast %223 : f32 to vector<1x256xf32>
    %225 = arith.mulf %224, %214 : vector<1x256xf32>
    %226 = arith.addf %208, %225 : vector<1x256xf32>
    %c47 = arith.constant 47 : index
    %227 = memref.load %arg5[%c47] : memref<144xf32, #tpu.memory_space<smem>>
    %228 = vector.broadcast %227 : f32 to vector<1x256xf32>
    %229 = arith.mulf %228, %214 : vector<1x256xf32>
    %230 = arith.addf %212, %229 : vector<1x256xf32>
    %c0_40 = arith.constant 0 : index
    %c0_41 = arith.constant 0 : index
    %231 = vector.load %arg4[%c0_40, %c0_41] : memref<3x256xf32, #tpu.memory_space<vmem>>, vector<1x256xf32>
    %c0_42 = arith.constant 0 : index
    %c127 = arith.constant 127 : index
    %232 = vector.load %arg7[%c0_42, %c127] : memref<4x512xf32, #tpu.memory_space<vmem>>, vector<1x256xf32>
    %233 = arith.mulf %232, %231 : vector<1x256xf32>
    %c48 = arith.constant 48 : index
    %234 = memref.load %arg5[%c48] : memref<144xf32, #tpu.memory_space<smem>>
    %235 = vector.broadcast %234 : f32 to vector<1x256xf32>
    %236 = arith.mulf %235, %233 : vector<1x256xf32>
    %237 = arith.addf %218, %236 : vector<1x256xf32>
    %c52 = arith.constant 52 : index
    %238 = memref.load %arg5[%c52] : memref<144xf32, #tpu.memory_space<smem>>
    %239 = vector.broadcast %238 : f32 to vector<1x256xf32>
    %240 = arith.mulf %239, %233 : vector<1x256xf32>
    %241 = arith.addf %222, %240 : vector<1x256xf32>
    %c56 = arith.constant 56 : index
    %242 = memref.load %arg5[%c56] : memref<144xf32, #tpu.memory_space<smem>>
    %243 = vector.broadcast %242 : f32 to vector<1x256xf32>
    %244 = arith.mulf %243, %233 : vector<1x256xf32>
    %245 = arith.addf %226, %244 : vector<1x256xf32>
    %c60 = arith.constant 60 : index
    %246 = memref.load %arg5[%c60] : memref<144xf32, #tpu.memory_space<smem>>
    %247 = vector.broadcast %246 : f32 to vector<1x256xf32>
    %248 = arith.mulf %247, %233 : vector<1x256xf32>
    %249 = arith.addf %230, %248 : vector<1x256xf32>
    %c1_43 = arith.constant 1 : index
    %c127_44 = arith.constant 127 : index
    %250 = vector.load %arg7[%c1_43, %c127_44] : memref<4x512xf32, #tpu.memory_space<vmem>>, vector<1x256xf32>
    %251 = arith.mulf %250, %231 : vector<1x256xf32>
    %c49 = arith.constant 49 : index
    %252 = memref.load %arg5[%c49] : memref<144xf32, #tpu.memory_space<smem>>
    %253 = vector.broadcast %252 : f32 to vector<1x256xf32>
    %254 = arith.mulf %253, %251 : vector<1x256xf32>
    %255 = arith.addf %237, %254 : vector<1x256xf32>
    %c53 = arith.constant 53 : index
    %256 = memref.load %arg5[%c53] : memref<144xf32, #tpu.memory_space<smem>>
    %257 = vector.broadcast %256 : f32 to vector<1x256xf32>
    %258 = arith.mulf %257, %251 : vector<1x256xf32>
    %259 = arith.addf %241, %258 : vector<1x256xf32>
    %c57 = arith.constant 57 : index
    %260 = memref.load %arg5[%c57] : memref<144xf32, #tpu.memory_space<smem>>
    %261 = vector.broadcast %260 : f32 to vector<1x256xf32>
    %262 = arith.mulf %261, %251 : vector<1x256xf32>
    %263 = arith.addf %245, %262 : vector<1x256xf32>
    %c61 = arith.constant 61 : index
    %264 = memref.load %arg5[%c61] : memref<144xf32, #tpu.memory_space<smem>>
    %265 = vector.broadcast %264 : f32 to vector<1x256xf32>
    %266 = arith.mulf %265, %251 : vector<1x256xf32>
    %267 = arith.addf %249, %266 : vector<1x256xf32>
    %c2_45 = arith.constant 2 : index
    %c127_46 = arith.constant 127 : index
    %268 = vector.load %arg7[%c2_45, %c127_46] : memref<4x512xf32, #tpu.memory_space<vmem>>, vector<1x256xf32>
    %269 = arith.mulf %268, %231 : vector<1x256xf32>
    %c50 = arith.constant 50 : index
    %270 = memref.load %arg5[%c50] : memref<144xf32, #tpu.memory_space<smem>>
    %271 = vector.broadcast %270 : f32 to vector<1x256xf32>
    %272 = arith.mulf %271, %269 : vector<1x256xf32>
    %273 = arith.addf %255, %272 : vector<1x256xf32>
    %c54 = arith.constant 54 : index
    %274 = memref.load %arg5[%c54] : memref<144xf32, #tpu.memory_space<smem>>
    %275 = vector.broadcast %274 : f32 to vector<1x256xf32>
    %276 = arith.mulf %275, %269 : vector<1x256xf32>
    %277 = arith.addf %259, %276 : vector<1x256xf32>
    %c58 = arith.constant 58 : index
    %278 = memref.load %arg5[%c58] : memref<144xf32, #tpu.memory_space<smem>>
    %279 = vector.broadcast %278 : f32 to vector<1x256xf32>
    %280 = arith.mulf %279, %269 : vector<1x256xf32>
    %281 = arith.addf %263, %280 : vector<1x256xf32>
    %c62 = arith.constant 62 : index
    %282 = memref.load %arg5[%c62] : memref<144xf32, #tpu.memory_space<smem>>
    %283 = vector.broadcast %282 : f32 to vector<1x256xf32>
    %284 = arith.mulf %283, %269 : vector<1x256xf32>
    %285 = arith.addf %267, %284 : vector<1x256xf32>
    %c3_47 = arith.constant 3 : index
    %c127_48 = arith.constant 127 : index
    %286 = vector.load %arg7[%c3_47, %c127_48] : memref<4x512xf32, #tpu.memory_space<vmem>>, vector<1x256xf32>
    %287 = arith.mulf %286, %231 : vector<1x256xf32>
    %c51 = arith.constant 51 : index
    %288 = memref.load %arg5[%c51] : memref<144xf32, #tpu.memory_space<smem>>
    %289 = vector.broadcast %288 : f32 to vector<1x256xf32>
    %290 = arith.mulf %289, %287 : vector<1x256xf32>
    %291 = arith.addf %273, %290 : vector<1x256xf32>
    %c55 = arith.constant 55 : index
    %292 = memref.load %arg5[%c55] : memref<144xf32, #tpu.memory_space<smem>>
    %293 = vector.broadcast %292 : f32 to vector<1x256xf32>
    %294 = arith.mulf %293, %287 : vector<1x256xf32>
    %295 = arith.addf %277, %294 : vector<1x256xf32>
    %c59 = arith.constant 59 : index
    %296 = memref.load %arg5[%c59] : memref<144xf32, #tpu.memory_space<smem>>
    %297 = vector.broadcast %296 : f32 to vector<1x256xf32>
    %298 = arith.mulf %297, %287 : vector<1x256xf32>
    %299 = arith.addf %281, %298 : vector<1x256xf32>
    %c63 = arith.constant 63 : index
    %300 = memref.load %arg5[%c63] : memref<144xf32, #tpu.memory_space<smem>>
    %301 = vector.broadcast %300 : f32 to vector<1x256xf32>
    %302 = arith.mulf %301, %287 : vector<1x256xf32>
    %303 = arith.addf %285, %302 : vector<1x256xf32>
    %c0_49 = arith.constant 0 : index
    %c128_50 = arith.constant 128 : index
    %304 = vector.load %arg7[%c0_49, %c128_50] : memref<4x512xf32, #tpu.memory_space<vmem>>, vector<1x256xf32>
    %c64 = arith.constant 64 : index
    %305 = memref.load %arg5[%c64] : memref<144xf32, #tpu.memory_space<smem>>
    %306 = vector.broadcast %305 : f32 to vector<1x256xf32>
    %307 = arith.mulf %306, %304 : vector<1x256xf32>
    %308 = arith.addf %291, %307 : vector<1x256xf32>
    %c68 = arith.constant 68 : index
    %309 = memref.load %arg5[%c68] : memref<144xf32, #tpu.memory_space<smem>>
    %310 = vector.broadcast %309 : f32 to vector<1x256xf32>
    %311 = arith.mulf %310, %304 : vector<1x256xf32>
    %312 = arith.addf %295, %311 : vector<1x256xf32>
    %c72 = arith.constant 72 : index
    %313 = memref.load %arg5[%c72] : memref<144xf32, #tpu.memory_space<smem>>
    %314 = vector.broadcast %313 : f32 to vector<1x256xf32>
    %315 = arith.mulf %314, %304 : vector<1x256xf32>
    %316 = arith.addf %299, %315 : vector<1x256xf32>
    %c76 = arith.constant 76 : index
    %317 = memref.load %arg5[%c76] : memref<144xf32, #tpu.memory_space<smem>>
    %318 = vector.broadcast %317 : f32 to vector<1x256xf32>
    %319 = arith.mulf %318, %304 : vector<1x256xf32>
    %320 = arith.addf %303, %319 : vector<1x256xf32>
    %c1_51 = arith.constant 1 : index
    %c128_52 = arith.constant 128 : index
    %321 = vector.load %arg7[%c1_51, %c128_52] : memref<4x512xf32, #tpu.memory_space<vmem>>, vector<1x256xf32>
    %c65 = arith.constant 65 : index
    %322 = memref.load %arg5[%c65] : memref<144xf32, #tpu.memory_space<smem>>
    %323 = vector.broadcast %322 : f32 to vector<1x256xf32>
    %324 = arith.mulf %323, %321 : vector<1x256xf32>
    %325 = arith.addf %308, %324 : vector<1x256xf32>
    %c69 = arith.constant 69 : index
    %326 = memref.load %arg5[%c69] : memref<144xf32, #tpu.memory_space<smem>>
    %327 = vector.broadcast %326 : f32 to vector<1x256xf32>
    %328 = arith.mulf %327, %321 : vector<1x256xf32>
    %329 = arith.addf %312, %328 : vector<1x256xf32>
    %c73 = arith.constant 73 : index
    %330 = memref.load %arg5[%c73] : memref<144xf32, #tpu.memory_space<smem>>
    %331 = vector.broadcast %330 : f32 to vector<1x256xf32>
    %332 = arith.mulf %331, %321 : vector<1x256xf32>
    %333 = arith.addf %316, %332 : vector<1x256xf32>
    %c77 = arith.constant 77 : index
    %334 = memref.load %arg5[%c77] : memref<144xf32, #tpu.memory_space<smem>>
    %335 = vector.broadcast %334 : f32 to vector<1x256xf32>
    %336 = arith.mulf %335, %321 : vector<1x256xf32>
    %337 = arith.addf %320, %336 : vector<1x256xf32>
    %c2_53 = arith.constant 2 : index
    %c128_54 = arith.constant 128 : index
    %338 = vector.load %arg7[%c2_53, %c128_54] : memref<4x512xf32, #tpu.memory_space<vmem>>, vector<1x256xf32>
    %c66 = arith.constant 66 : index
    %339 = memref.load %arg5[%c66] : memref<144xf32, #tpu.memory_space<smem>>
    %340 = vector.broadcast %339 : f32 to vector<1x256xf32>
    %341 = arith.mulf %340, %338 : vector<1x256xf32>
    %342 = arith.addf %325, %341 : vector<1x256xf32>
    %c70 = arith.constant 70 : index
    %343 = memref.load %arg5[%c70] : memref<144xf32, #tpu.memory_space<smem>>
    %344 = vector.broadcast %343 : f32 to vector<1x256xf32>
    %345 = arith.mulf %344, %338 : vector<1x256xf32>
    %346 = arith.addf %329, %345 : vector<1x256xf32>
    %c74 = arith.constant 74 : index
    %347 = memref.load %arg5[%c74] : memref<144xf32, #tpu.memory_space<smem>>
    %348 = vector.broadcast %347 : f32 to vector<1x256xf32>
    %349 = arith.mulf %348, %338 : vector<1x256xf32>
    %350 = arith.addf %333, %349 : vector<1x256xf32>
    %c78 = arith.constant 78 : index
    %351 = memref.load %arg5[%c78] : memref<144xf32, #tpu.memory_space<smem>>
    %352 = vector.broadcast %351 : f32 to vector<1x256xf32>
    %353 = arith.mulf %352, %338 : vector<1x256xf32>
    %354 = arith.addf %337, %353 : vector<1x256xf32>
    %c3_55 = arith.constant 3 : index
    %c128_56 = arith.constant 128 : index
    %355 = vector.load %arg7[%c3_55, %c128_56] : memref<4x512xf32, #tpu.memory_space<vmem>>, vector<1x256xf32>
    %c67 = arith.constant 67 : index
    %356 = memref.load %arg5[%c67] : memref<144xf32, #tpu.memory_space<smem>>
    %357 = vector.broadcast %356 : f32 to vector<1x256xf32>
    %358 = arith.mulf %357, %355 : vector<1x256xf32>
    %359 = arith.addf %342, %358 : vector<1x256xf32>
    %c71 = arith.constant 71 : index
    %360 = memref.load %arg5[%c71] : memref<144xf32, #tpu.memory_space<smem>>
    %361 = vector.broadcast %360 : f32 to vector<1x256xf32>
    %362 = arith.mulf %361, %355 : vector<1x256xf32>
    %363 = arith.addf %346, %362 : vector<1x256xf32>
    %c75 = arith.constant 75 : index
    %364 = memref.load %arg5[%c75] : memref<144xf32, #tpu.memory_space<smem>>
    %365 = vector.broadcast %364 : f32 to vector<1x256xf32>
    %366 = arith.mulf %365, %355 : vector<1x256xf32>
    %367 = arith.addf %350, %366 : vector<1x256xf32>
    %c79 = arith.constant 79 : index
    %368 = memref.load %arg5[%c79] : memref<144xf32, #tpu.memory_space<smem>>
    %369 = vector.broadcast %368 : f32 to vector<1x256xf32>
    %370 = arith.mulf %369, %355 : vector<1x256xf32>
    %371 = arith.addf %354, %370 : vector<1x256xf32>
    %c2_57 = arith.constant 2 : index
    %c0_58 = arith.constant 0 : index
    %372 = vector.load %arg4[%c2_57, %c0_58] : memref<3x256xf32, #tpu.memory_space<vmem>>, vector<1x256xf32>
    %c0_59 = arith.constant 0 : index
    %c129 = arith.constant 129 : index
    %373 = vector.load %arg7[%c0_59, %c129] : memref<4x512xf32, #tpu.memory_space<vmem>>, vector<1x256xf32>
    %374 = arith.mulf %373, %372 : vector<1x256xf32>
    %c80 = arith.constant 80 : index
    %375 = memref.load %arg5[%c80] : memref<144xf32, #tpu.memory_space<smem>>
    %376 = vector.broadcast %375 : f32 to vector<1x256xf32>
    %377 = arith.mulf %376, %374 : vector<1x256xf32>
    %378 = arith.addf %359, %377 : vector<1x256xf32>
    %c84 = arith.constant 84 : index
    %379 = memref.load %arg5[%c84] : memref<144xf32, #tpu.memory_space<smem>>
    %380 = vector.broadcast %379 : f32 to vector<1x256xf32>
    %381 = arith.mulf %380, %374 : vector<1x256xf32>
    %382 = arith.addf %363, %381 : vector<1x256xf32>
    %c88 = arith.constant 88 : index
    %383 = memref.load %arg5[%c88] : memref<144xf32, #tpu.memory_space<smem>>
    %384 = vector.broadcast %383 : f32 to vector<1x256xf32>
    %385 = arith.mulf %384, %374 : vector<1x256xf32>
    %386 = arith.addf %367, %385 : vector<1x256xf32>
    %c92 = arith.constant 92 : index
    %387 = memref.load %arg5[%c92] : memref<144xf32, #tpu.memory_space<smem>>
    %388 = vector.broadcast %387 : f32 to vector<1x256xf32>
    %389 = arith.mulf %388, %374 : vector<1x256xf32>
    %390 = arith.addf %371, %389 : vector<1x256xf32>
    %c1_60 = arith.constant 1 : index
    %c129_61 = arith.constant 129 : index
    %391 = vector.load %arg7[%c1_60, %c129_61] : memref<4x512xf32, #tpu.memory_space<vmem>>, vector<1x256xf32>
    %392 = arith.mulf %391, %372 : vector<1x256xf32>
    %c81 = arith.constant 81 : index
    %393 = memref.load %arg5[%c81] : memref<144xf32, #tpu.memory_space<smem>>
    %394 = vector.broadcast %393 : f32 to vector<1x256xf32>
    %395 = arith.mulf %394, %392 : vector<1x256xf32>
    %396 = arith.addf %378, %395 : vector<1x256xf32>
    %c85 = arith.constant 85 : index
    %397 = memref.load %arg5[%c85] : memref<144xf32, #tpu.memory_space<smem>>
    %398 = vector.broadcast %397 : f32 to vector<1x256xf32>
    %399 = arith.mulf %398, %392 : vector<1x256xf32>
    %400 = arith.addf %382, %399 : vector<1x256xf32>
    %c89 = arith.constant 89 : index
    %401 = memref.load %arg5[%c89] : memref<144xf32, #tpu.memory_space<smem>>
    %402 = vector.broadcast %401 : f32 to vector<1x256xf32>
    %403 = arith.mulf %402, %392 : vector<1x256xf32>
    %404 = arith.addf %386, %403 : vector<1x256xf32>
    %c93 = arith.constant 93 : index
    %405 = memref.load %arg5[%c93] : memref<144xf32, #tpu.memory_space<smem>>
    %406 = vector.broadcast %405 : f32 to vector<1x256xf32>
    %407 = arith.mulf %406, %392 : vector<1x256xf32>
    %408 = arith.addf %390, %407 : vector<1x256xf32>
    %c2_62 = arith.constant 2 : index
    %c129_63 = arith.constant 129 : index
    %409 = vector.load %arg7[%c2_62, %c129_63] : memref<4x512xf32, #tpu.memory_space<vmem>>, vector<1x256xf32>
    %410 = arith.mulf %409, %372 : vector<1x256xf32>
    %c82 = arith.constant 82 : index
    %411 = memref.load %arg5[%c82] : memref<144xf32, #tpu.memory_space<smem>>
    %412 = vector.broadcast %411 : f32 to vector<1x256xf32>
    %413 = arith.mulf %412, %410 : vector<1x256xf32>
    %414 = arith.addf %396, %413 : vector<1x256xf32>
    %c86 = arith.constant 86 : index
    %415 = memref.load %arg5[%c86] : memref<144xf32, #tpu.memory_space<smem>>
    %416 = vector.broadcast %415 : f32 to vector<1x256xf32>
    %417 = arith.mulf %416, %410 : vector<1x256xf32>
    %418 = arith.addf %400, %417 : vector<1x256xf32>
    %c90 = arith.constant 90 : index
    %419 = memref.load %arg5[%c90] : memref<144xf32, #tpu.memory_space<smem>>
    %420 = vector.broadcast %419 : f32 to vector<1x256xf32>
    %421 = arith.mulf %420, %410 : vector<1x256xf32>
    %422 = arith.addf %404, %421 : vector<1x256xf32>
    %c94 = arith.constant 94 : index
    %423 = memref.load %arg5[%c94] : memref<144xf32, #tpu.memory_space<smem>>
    %424 = vector.broadcast %423 : f32 to vector<1x256xf32>
    %425 = arith.mulf %424, %410 : vector<1x256xf32>
    %426 = arith.addf %408, %425 : vector<1x256xf32>
    %c3_64 = arith.constant 3 : index
    %c129_65 = arith.constant 129 : index
    %427 = vector.load %arg7[%c3_64, %c129_65] : memref<4x512xf32, #tpu.memory_space<vmem>>, vector<1x256xf32>
    %428 = arith.mulf %427, %372 : vector<1x256xf32>
    %c83 = arith.constant 83 : index
    %429 = memref.load %arg5[%c83] : memref<144xf32, #tpu.memory_space<smem>>
    %430 = vector.broadcast %429 : f32 to vector<1x256xf32>
    %431 = arith.mulf %430, %428 : vector<1x256xf32>
    %432 = arith.addf %414, %431 : vector<1x256xf32>
    %c87 = arith.constant 87 : index
    %433 = memref.load %arg5[%c87] : memref<144xf32, #tpu.memory_space<smem>>
    %434 = vector.broadcast %433 : f32 to vector<1x256xf32>
    %435 = arith.mulf %434, %428 : vector<1x256xf32>
    %436 = arith.addf %418, %435 : vector<1x256xf32>
    %c91 = arith.constant 91 : index
    %437 = memref.load %arg5[%c91] : memref<144xf32, #tpu.memory_space<smem>>
    %438 = vector.broadcast %437 : f32 to vector<1x256xf32>
    %439 = arith.mulf %438, %428 : vector<1x256xf32>
    %440 = arith.addf %422, %439 : vector<1x256xf32>
    %c95 = arith.constant 95 : index
    %441 = memref.load %arg5[%c95] : memref<144xf32, #tpu.memory_space<smem>>
    %442 = vector.broadcast %441 : f32 to vector<1x256xf32>
    %443 = arith.mulf %442, %428 : vector<1x256xf32>
    %444 = arith.addf %426, %443 : vector<1x256xf32>
    %c0_66 = arith.constant 0 : index
    %c0_67 = arith.constant 0 : index
    %445 = vector.load %arg4[%c0_66, %c0_67] : memref<3x256xf32, #tpu.memory_space<vmem>>, vector<1x256xf32>
    %c0_68 = arith.constant 0 : index
    %c143 = arith.constant 143 : index
    %446 = vector.load %arg7[%c0_68, %c143] : memref<4x512xf32, #tpu.memory_space<vmem>>, vector<1x256xf32>
    %447 = arith.mulf %446, %445 : vector<1x256xf32>
    %c96 = arith.constant 96 : index
    %448 = memref.load %arg5[%c96] : memref<144xf32, #tpu.memory_space<smem>>
    %449 = vector.broadcast %448 : f32 to vector<1x256xf32>
    %450 = arith.mulf %449, %447 : vector<1x256xf32>
    %451 = arith.addf %432, %450 : vector<1x256xf32>
    %c100 = arith.constant 100 : index
    %452 = memref.load %arg5[%c100] : memref<144xf32, #tpu.memory_space<smem>>
    %453 = vector.broadcast %452 : f32 to vector<1x256xf32>
    %454 = arith.mulf %453, %447 : vector<1x256xf32>
    %455 = arith.addf %436, %454 : vector<1x256xf32>
    %c104 = arith.constant 104 : index
    %456 = memref.load %arg5[%c104] : memref<144xf32, #tpu.memory_space<smem>>
    %457 = vector.broadcast %456 : f32 to vector<1x256xf32>
    %458 = arith.mulf %457, %447 : vector<1x256xf32>
    %459 = arith.addf %440, %458 : vector<1x256xf32>
    %c108 = arith.constant 108 : index
    %460 = memref.load %arg5[%c108] : memref<144xf32, #tpu.memory_space<smem>>
    %461 = vector.broadcast %460 : f32 to vector<1x256xf32>
    %462 = arith.mulf %461, %447 : vector<1x256xf32>
    %463 = arith.addf %444, %462 : vector<1x256xf32>
    %c1_69 = arith.constant 1 : index
    %c143_70 = arith.constant 143 : index
    %464 = vector.load %arg7[%c1_69, %c143_70] : memref<4x512xf32, #tpu.memory_space<vmem>>, vector<1x256xf32>
    %465 = arith.mulf %464, %445 : vector<1x256xf32>
    %c97 = arith.constant 97 : index
    %466 = memref.load %arg5[%c97] : memref<144xf32, #tpu.memory_space<smem>>
    %467 = vector.broadcast %466 : f32 to vector<1x256xf32>
    %468 = arith.mulf %467, %465 : vector<1x256xf32>
    %469 = arith.addf %451, %468 : vector<1x256xf32>
    %c101 = arith.constant 101 : index
    %470 = memref.load %arg5[%c101] : memref<144xf32, #tpu.memory_space<smem>>
    %471 = vector.broadcast %470 : f32 to vector<1x256xf32>
    %472 = arith.mulf %471, %465 : vector<1x256xf32>
    %473 = arith.addf %455, %472 : vector<1x256xf32>
    %c105 = arith.constant 105 : index
    %474 = memref.load %arg5[%c105] : memref<144xf32, #tpu.memory_space<smem>>
    %475 = vector.broadcast %474 : f32 to vector<1x256xf32>
    %476 = arith.mulf %475, %465 : vector<1x256xf32>
    %477 = arith.addf %459, %476 : vector<1x256xf32>
    %c109 = arith.constant 109 : index
    %478 = memref.load %arg5[%c109] : memref<144xf32, #tpu.memory_space<smem>>
    %479 = vector.broadcast %478 : f32 to vector<1x256xf32>
    %480 = arith.mulf %479, %465 : vector<1x256xf32>
    %481 = arith.addf %463, %480 : vector<1x256xf32>
    %c2_71 = arith.constant 2 : index
    %c143_72 = arith.constant 143 : index
    %482 = vector.load %arg7[%c2_71, %c143_72] : memref<4x512xf32, #tpu.memory_space<vmem>>, vector<1x256xf32>
    %483 = arith.mulf %482, %445 : vector<1x256xf32>
    %c98 = arith.constant 98 : index
    %484 = memref.load %arg5[%c98] : memref<144xf32, #tpu.memory_space<smem>>
    %485 = vector.broadcast %484 : f32 to vector<1x256xf32>
    %486 = arith.mulf %485, %483 : vector<1x256xf32>
    %487 = arith.addf %469, %486 : vector<1x256xf32>
    %c102 = arith.constant 102 : index
    %488 = memref.load %arg5[%c102] : memref<144xf32, #tpu.memory_space<smem>>
    %489 = vector.broadcast %488 : f32 to vector<1x256xf32>
    %490 = arith.mulf %489, %483 : vector<1x256xf32>
    %491 = arith.addf %473, %490 : vector<1x256xf32>
    %c106 = arith.constant 106 : index
    %492 = memref.load %arg5[%c106] : memref<144xf32, #tpu.memory_space<smem>>
    %493 = vector.broadcast %492 : f32 to vector<1x256xf32>
    %494 = arith.mulf %493, %483 : vector<1x256xf32>
    %495 = arith.addf %477, %494 : vector<1x256xf32>
    %c110 = arith.constant 110 : index
    %496 = memref.load %arg5[%c110] : memref<144xf32, #tpu.memory_space<smem>>
    %497 = vector.broadcast %496 : f32 to vector<1x256xf32>
    %498 = arith.mulf %497, %483 : vector<1x256xf32>
    %499 = arith.addf %481, %498 : vector<1x256xf32>
    %c3_73 = arith.constant 3 : index
    %c143_74 = arith.constant 143 : index
    %500 = vector.load %arg7[%c3_73, %c143_74] : memref<4x512xf32, #tpu.memory_space<vmem>>, vector<1x256xf32>
    %501 = arith.mulf %500, %445 : vector<1x256xf32>
    %c99 = arith.constant 99 : index
    %502 = memref.load %arg5[%c99] : memref<144xf32, #tpu.memory_space<smem>>
    %503 = vector.broadcast %502 : f32 to vector<1x256xf32>
    %504 = arith.mulf %503, %501 : vector<1x256xf32>
    %505 = arith.addf %487, %504 : vector<1x256xf32>
    %c103 = arith.constant 103 : index
    %506 = memref.load %arg5[%c103] : memref<144xf32, #tpu.memory_space<smem>>
    %507 = vector.broadcast %506 : f32 to vector<1x256xf32>
    %508 = arith.mulf %507, %501 : vector<1x256xf32>
    %509 = arith.addf %491, %508 : vector<1x256xf32>
    %c107 = arith.constant 107 : index
    %510 = memref.load %arg5[%c107] : memref<144xf32, #tpu.memory_space<smem>>
    %511 = vector.broadcast %510 : f32 to vector<1x256xf32>
    %512 = arith.mulf %511, %501 : vector<1x256xf32>
    %513 = arith.addf %495, %512 : vector<1x256xf32>
    %c111_75 = arith.constant 111 : index
    %514 = memref.load %arg5[%c111_75] : memref<144xf32, #tpu.memory_space<smem>>
    %515 = vector.broadcast %514 : f32 to vector<1x256xf32>
    %516 = arith.mulf %515, %501 : vector<1x256xf32>
    %517 = arith.addf %499, %516 : vector<1x256xf32>
    %c0_76 = arith.constant 0 : index
    %c144 = arith.constant 144 : index
    %518 = vector.load %arg7[%c0_76, %c144] : memref<4x512xf32, #tpu.memory_space<vmem>>, vector<1x256xf32>
    %c112_77 = arith.constant 112 : index
    %519 = memref.load %arg5[%c112_77] : memref<144xf32, #tpu.memory_space<smem>>
    %520 = vector.broadcast %519 : f32 to vector<1x256xf32>
    %521 = arith.mulf %520, %518 : vector<1x256xf32>
    %522 = arith.addf %505, %521 : vector<1x256xf32>
    %c116 = arith.constant 116 : index
    %523 = memref.load %arg5[%c116] : memref<144xf32, #tpu.memory_space<smem>>
    %524 = vector.broadcast %523 : f32 to vector<1x256xf32>
    %525 = arith.mulf %524, %518 : vector<1x256xf32>
    %526 = arith.addf %509, %525 : vector<1x256xf32>
    %c120 = arith.constant 120 : index
    %527 = memref.load %arg5[%c120] : memref<144xf32, #tpu.memory_space<smem>>
    %528 = vector.broadcast %527 : f32 to vector<1x256xf32>
    %529 = arith.mulf %528, %518 : vector<1x256xf32>
    %530 = arith.addf %513, %529 : vector<1x256xf32>
    %c124 = arith.constant 124 : index
    %531 = memref.load %arg5[%c124] : memref<144xf32, #tpu.memory_space<smem>>
    %532 = vector.broadcast %531 : f32 to vector<1x256xf32>
    %533 = arith.mulf %532, %518 : vector<1x256xf32>
    %534 = arith.addf %517, %533 : vector<1x256xf32>
    %c1_78 = arith.constant 1 : index
    %c144_79 = arith.constant 144 : index
    %535 = vector.load %arg7[%c1_78, %c144_79] : memref<4x512xf32, #tpu.memory_space<vmem>>, vector<1x256xf32>
    %c113_80 = arith.constant 113 : index
    %536 = memref.load %arg5[%c113_80] : memref<144xf32, #tpu.memory_space<smem>>
    %537 = vector.broadcast %536 : f32 to vector<1x256xf32>
    %538 = arith.mulf %537, %535 : vector<1x256xf32>
    %539 = arith.addf %522, %538 : vector<1x256xf32>
    %c117 = arith.constant 117 : index
    %540 = memref.load %arg5[%c117] : memref<144xf32, #tpu.memory_space<smem>>
    %541 = vector.broadcast %540 : f32 to vector<1x256xf32>
    %542 = arith.mulf %541, %535 : vector<1x256xf32>
    %543 = arith.addf %526, %542 : vector<1x256xf32>
    %c121 = arith.constant 121 : index
    %544 = memref.load %arg5[%c121] : memref<144xf32, #tpu.memory_space<smem>>
    %545 = vector.broadcast %544 : f32 to vector<1x256xf32>
    %546 = arith.mulf %545, %535 : vector<1x256xf32>
    %547 = arith.addf %530, %546 : vector<1x256xf32>
    %c125 = arith.constant 125 : index
    %548 = memref.load %arg5[%c125] : memref<144xf32, #tpu.memory_space<smem>>
    %549 = vector.broadcast %548 : f32 to vector<1x256xf32>
    %550 = arith.mulf %549, %535 : vector<1x256xf32>
    %551 = arith.addf %534, %550 : vector<1x256xf32>
    %c2_81 = arith.constant 2 : index
    %c144_82 = arith.constant 144 : index
    %552 = vector.load %arg7[%c2_81, %c144_82] : memref<4x512xf32, #tpu.memory_space<vmem>>, vector<1x256xf32>
    %c114 = arith.constant 114 : index
    %553 = memref.load %arg5[%c114] : memref<144xf32, #tpu.memory_space<smem>>
    %554 = vector.broadcast %553 : f32 to vector<1x256xf32>
    %555 = arith.mulf %554, %552 : vector<1x256xf32>
    %556 = arith.addf %539, %555 : vector<1x256xf32>
    %c118 = arith.constant 118 : index
    %557 = memref.load %arg5[%c118] : memref<144xf32, #tpu.memory_space<smem>>
    %558 = vector.broadcast %557 : f32 to vector<1x256xf32>
    %559 = arith.mulf %558, %552 : vector<1x256xf32>
    %560 = arith.addf %543, %559 : vector<1x256xf32>
    %c122 = arith.constant 122 : index
    %561 = memref.load %arg5[%c122] : memref<144xf32, #tpu.memory_space<smem>>
    %562 = vector.broadcast %561 : f32 to vector<1x256xf32>
    %563 = arith.mulf %562, %552 : vector<1x256xf32>
    %564 = arith.addf %547, %563 : vector<1x256xf32>
    %c126 = arith.constant 126 : index
    %565 = memref.load %arg5[%c126] : memref<144xf32, #tpu.memory_space<smem>>
    %566 = vector.broadcast %565 : f32 to vector<1x256xf32>
    %567 = arith.mulf %566, %552 : vector<1x256xf32>
    %568 = arith.addf %551, %567 : vector<1x256xf32>
    %c3_83 = arith.constant 3 : index
    %c144_84 = arith.constant 144 : index
    %569 = vector.load %arg7[%c3_83, %c144_84] : memref<4x512xf32, #tpu.memory_space<vmem>>, vector<1x256xf32>
    %c115 = arith.constant 115 : index
    %570 = memref.load %arg5[%c115] : memref<144xf32, #tpu.memory_space<smem>>
    %571 = vector.broadcast %570 : f32 to vector<1x256xf32>
    %572 = arith.mulf %571, %569 : vector<1x256xf32>
    %573 = arith.addf %556, %572 : vector<1x256xf32>
    %c119 = arith.constant 119 : index
    %574 = memref.load %arg5[%c119] : memref<144xf32, #tpu.memory_space<smem>>
    %575 = vector.broadcast %574 : f32 to vector<1x256xf32>
    %576 = arith.mulf %575, %569 : vector<1x256xf32>
    %577 = arith.addf %560, %576 : vector<1x256xf32>
    %c123 = arith.constant 123 : index
    %578 = memref.load %arg5[%c123] : memref<144xf32, #tpu.memory_space<smem>>
    %579 = vector.broadcast %578 : f32 to vector<1x256xf32>
    %580 = arith.mulf %579, %569 : vector<1x256xf32>
    %581 = arith.addf %564, %580 : vector<1x256xf32>
    %c127_85 = arith.constant 127 : index
    %582 = memref.load %arg5[%c127_85] : memref<144xf32, #tpu.memory_space<smem>>
    %583 = vector.broadcast %582 : f32 to vector<1x256xf32>
    %584 = arith.mulf %583, %569 : vector<1x256xf32>
    %585 = arith.addf %568, %584 : vector<1x256xf32>
    %c2_86 = arith.constant 2 : index
    %c0_87 = arith.constant 0 : index
    %586 = vector.load %arg4[%c2_86, %c0_87] : memref<3x256xf32, #tpu.memory_space<vmem>>, vector<1x256xf32>
    %c0_88 = arith.constant 0 : index
    %c145 = arith.constant 145 : index
    %587 = vector.load %arg7[%c0_88, %c145] : memref<4x512xf32, #tpu.memory_space<vmem>>, vector<1x256xf32>
    %588 = arith.mulf %587, %586 : vector<1x256xf32>
    %c128_89 = arith.constant 128 : index
    %589 = memref.load %arg5[%c128_89] : memref<144xf32, #tpu.memory_space<smem>>
    %590 = vector.broadcast %589 : f32 to vector<1x256xf32>
    %591 = arith.mulf %590, %588 : vector<1x256xf32>
    %592 = arith.addf %573, %591 : vector<1x256xf32>
    %c132 = arith.constant 132 : index
    %593 = memref.load %arg5[%c132] : memref<144xf32, #tpu.memory_space<smem>>
    %594 = vector.broadcast %593 : f32 to vector<1x256xf32>
    %595 = arith.mulf %594, %588 : vector<1x256xf32>
    %596 = arith.addf %577, %595 : vector<1x256xf32>
    %c136 = arith.constant 136 : index
    %597 = memref.load %arg5[%c136] : memref<144xf32, #tpu.memory_space<smem>>
    %598 = vector.broadcast %597 : f32 to vector<1x256xf32>
    %599 = arith.mulf %598, %588 : vector<1x256xf32>
    %600 = arith.addf %581, %599 : vector<1x256xf32>
    %c140 = arith.constant 140 : index
    %601 = memref.load %arg5[%c140] : memref<144xf32, #tpu.memory_space<smem>>
    %602 = vector.broadcast %601 : f32 to vector<1x256xf32>
    %603 = arith.mulf %602, %588 : vector<1x256xf32>
    %604 = arith.addf %585, %603 : vector<1x256xf32>
    %c1_90 = arith.constant 1 : index
    %c145_91 = arith.constant 145 : index
    %605 = vector.load %arg7[%c1_90, %c145_91] : memref<4x512xf32, #tpu.memory_space<vmem>>, vector<1x256xf32>
    %606 = arith.mulf %605, %586 : vector<1x256xf32>
    %c129_92 = arith.constant 129 : index
    %607 = memref.load %arg5[%c129_92] : memref<144xf32, #tpu.memory_space<smem>>
    %608 = vector.broadcast %607 : f32 to vector<1x256xf32>
    %609 = arith.mulf %608, %606 : vector<1x256xf32>
    %610 = arith.addf %592, %609 : vector<1x256xf32>
    %c133 = arith.constant 133 : index
    %611 = memref.load %arg5[%c133] : memref<144xf32, #tpu.memory_space<smem>>
    %612 = vector.broadcast %611 : f32 to vector<1x256xf32>
    %613 = arith.mulf %612, %606 : vector<1x256xf32>
    %614 = arith.addf %596, %613 : vector<1x256xf32>
    %c137 = arith.constant 137 : index
    %615 = memref.load %arg5[%c137] : memref<144xf32, #tpu.memory_space<smem>>
    %616 = vector.broadcast %615 : f32 to vector<1x256xf32>
    %617 = arith.mulf %616, %606 : vector<1x256xf32>
    %618 = arith.addf %600, %617 : vector<1x256xf32>
    %c141 = arith.constant 141 : index
    %619 = memref.load %arg5[%c141] : memref<144xf32, #tpu.memory_space<smem>>
    %620 = vector.broadcast %619 : f32 to vector<1x256xf32>
    %621 = arith.mulf %620, %606 : vector<1x256xf32>
    %622 = arith.addf %604, %621 : vector<1x256xf32>
    %c2_93 = arith.constant 2 : index
    %c145_94 = arith.constant 145 : index
    %623 = vector.load %arg7[%c2_93, %c145_94] : memref<4x512xf32, #tpu.memory_space<vmem>>, vector<1x256xf32>
    %624 = arith.mulf %623, %586 : vector<1x256xf32>
    %c130 = arith.constant 130 : index
    %625 = memref.load %arg5[%c130] : memref<144xf32, #tpu.memory_space<smem>>
    %626 = vector.broadcast %625 : f32 to vector<1x256xf32>
    %627 = arith.mulf %626, %624 : vector<1x256xf32>
    %628 = arith.addf %610, %627 : vector<1x256xf32>
    %c134 = arith.constant 134 : index
    %629 = memref.load %arg5[%c134] : memref<144xf32, #tpu.memory_space<smem>>
    %630 = vector.broadcast %629 : f32 to vector<1x256xf32>
    %631 = arith.mulf %630, %624 : vector<1x256xf32>
    %632 = arith.addf %614, %631 : vector<1x256xf32>
    %c138 = arith.constant 138 : index
    %633 = memref.load %arg5[%c138] : memref<144xf32, #tpu.memory_space<smem>>
    %634 = vector.broadcast %633 : f32 to vector<1x256xf32>
    %635 = arith.mulf %634, %624 : vector<1x256xf32>
    %636 = arith.addf %618, %635 : vector<1x256xf32>
    %c142 = arith.constant 142 : index
    %637 = memref.load %arg5[%c142] : memref<144xf32, #tpu.memory_space<smem>>
    %638 = vector.broadcast %637 : f32 to vector<1x256xf32>
    %639 = arith.mulf %638, %624 : vector<1x256xf32>
    %640 = arith.addf %622, %639 : vector<1x256xf32>
    %c3_95 = arith.constant 3 : index
    %c145_96 = arith.constant 145 : index
    %641 = vector.load %arg7[%c3_95, %c145_96] : memref<4x512xf32, #tpu.memory_space<vmem>>, vector<1x256xf32>
    %642 = arith.mulf %641, %586 : vector<1x256xf32>
    %c131 = arith.constant 131 : index
    %643 = memref.load %arg5[%c131] : memref<144xf32, #tpu.memory_space<smem>>
    %644 = vector.broadcast %643 : f32 to vector<1x256xf32>
    %645 = arith.mulf %644, %642 : vector<1x256xf32>
    %646 = arith.addf %628, %645 : vector<1x256xf32>
    %c135 = arith.constant 135 : index
    %647 = memref.load %arg5[%c135] : memref<144xf32, #tpu.memory_space<smem>>
    %648 = vector.broadcast %647 : f32 to vector<1x256xf32>
    %649 = arith.mulf %648, %642 : vector<1x256xf32>
    %650 = arith.addf %632, %649 : vector<1x256xf32>
    %c139 = arith.constant 139 : index
    %651 = memref.load %arg5[%c139] : memref<144xf32, #tpu.memory_space<smem>>
    %652 = vector.broadcast %651 : f32 to vector<1x256xf32>
    %653 = arith.mulf %652, %642 : vector<1x256xf32>
    %654 = arith.addf %636, %653 : vector<1x256xf32>
    %c143_97 = arith.constant 143 : index
    %655 = memref.load %arg5[%c143_97] : memref<144xf32, #tpu.memory_space<smem>>
    %656 = vector.broadcast %655 : f32 to vector<1x256xf32>
    %657 = arith.mulf %656, %642 : vector<1x256xf32>
    %658 = arith.addf %640, %657 : vector<1x256xf32>
    %c0_98 = arith.constant 0 : index
    %c0_99 = arith.constant 0 : index
    %c0_100 = arith.constant 0 : index
    %659 = vector.load %arg6[%c0_98, %c0_99, %c0_100] : memref<1x8x256xf32, #tpu.memory_space<vmem>>, vector<1x4x256xf32>
    %660 = vector.shape_cast %659 : vector<1x4x256xf32> to vector<4x256xf32>
    %661 = vector.shape_cast %1 : vector<4x256xf32> to vector<1x4x256xf32>
    tpu.vector_store %arg6[%c0_98, %c0_99, %c0_100], %661 {strides = array<i32>} : memref<1x8x256xf32, #tpu.memory_space<vmem>>, vector<1x4x256xf32>,
    %c0_101 = arith.constant 0 : index
    %c4_102 = arith.constant 4 : index
    %c0_103 = arith.constant 0 : index
    %662 = vector.load %arg6[%c0_101, %c4_102, %c0_103] : memref<1x8x256xf32, #tpu.memory_space<vmem>>, vector<1x1x256xf32>
    %663 = vector.shape_cast %662 : vector<1x1x256xf32> to vector<1x256xf32>
    %664 = vector.shape_cast %646 : vector<1x256xf32> to vector<1x1x256xf32>
    tpu.vector_store %arg6[%c0_101, %c4_102, %c0_103], %664 {strides = array<i32>} : memref<1x8x256xf32, #tpu.memory_space<vmem>>, vector<1x1x256xf32>,
    %c0_104 = arith.constant 0 : index
    %c5_105 = arith.constant 5 : index
    %c0_106 = arith.constant 0 : index
    %665 = vector.load %arg6[%c0_104, %c5_105, %c0_106] : memref<1x8x256xf32, #tpu.memory_space<vmem>>, vector<1x1x256xf32>
    %666 = vector.shape_cast %665 : vector<1x1x256xf32> to vector<1x256xf32>
    %667 = vector.shape_cast %650 : vector<1x256xf32> to vector<1x1x256xf32>
    tpu.vector_store %arg6[%c0_104, %c5_105, %c0_106], %667 {strides = array<i32>} : memref<1x8x256xf32, #tpu.memory_space<vmem>>, vector<1x1x256xf32>,
    %c0_107 = arith.constant 0 : index
    %c6_108 = arith.constant 6 : index
    %c0_109 = arith.constant 0 : index
    %668 = vector.load %arg6[%c0_107, %c6_108, %c0_109] : memref<1x8x256xf32, #tpu.memory_space<vmem>>, vector<1x1x256xf32>
    %669 = vector.shape_cast %668 : vector<1x1x256xf32> to vector<1x256xf32>
    %670 = vector.shape_cast %654 : vector<1x256xf32> to vector<1x1x256xf32>
    tpu.vector_store %arg6[%c0_107, %c6_108, %c0_109], %670 {strides = array<i32>} : memref<1x8x256xf32, #tpu.memory_space<vmem>>, vector<1x1x256xf32>,
    %c0_110 = arith.constant 0 : index
    %c7_111 = arith.constant 7 : index
    %c0_112 = arith.constant 0 : index
    %671 = vector.load %arg6[%c0_110, %c7_111, %c0_112] : memref<1x8x256xf32, #tpu.memory_space<vmem>>, vector<1x1x256xf32>
    %672 = vector.shape_cast %671 : vector<1x1x256xf32> to vector<1x256xf32>
    %673 = vector.shape_cast %658 : vector<1x256xf32> to vector<1x1x256xf32>
    tpu.vector_store %arg6[%c0_110, %c7_111, %c0_112], %673 {strides = array<i32>} : memref<1x8x256xf32, #tpu.memory_space<vmem>>, vector<1x1x256xf32>,
    return
  }
  func.func @transform_0(%arg0: i32) -> (i32, i32, i32) {
    %c0_i32 = arith.constant 0 : i32
    %c0_i32_0 = arith.constant 0 : i32
    %c0_i32_1 = arith.constant 0 : i32
    return %arg0, %c0_i32, %c0_i32_0 : i32, i32, i32
  }
  func.func @transform_1(%arg0: i32) -> (i32, i32) {
    %c0_i32 = arith.constant 0 : i32
    %c0_i32_0 = arith.constant 0 : i32
    %c0_i32_1 = arith.constant 0 : i32
    return %c0_i32, %c0_i32_0 : i32, i32
  }
  func.func @transform_2(%arg0: i32) -> (i32, i32) {
    %c0_i32 = arith.constant 0 : i32
    %c0_i32_0 = arith.constant 0 : i32
    %c0_i32_1 = arith.constant 0 : i32
    return %c0_i32, %c0_i32_0 : i32, i32
  }
  func.func @transform_3(%arg0: i32) -> (i32, i32) {
    %c0_i32 = arith.constant 0 : i32
    %c0_i32_0 = arith.constant 0 : i32
    %c0_i32_1 = arith.constant 0 : i32
    return %c0_i32, %c0_i32_0 : i32, i32
  }
  func.func @transform_4(%arg0: i32) -> i32 {
    %c0_i32 = arith.constant 0 : i32
    %c0_i32_0 = arith.constant 0 : i32
    return %c0_i32 : i32
  }
  func.func @transform_5(%arg0: i32) -> (i32, i32, i32) {
    %c0_i32 = arith.constant 0 : i32
    %c0_i32_0 = arith.constant 0 : i32
    %c0_i32_1 = arith.constant 0 : i32
    return %arg0, %c0_i32, %c0_i32_0 : i32, i32, i32
  }
}

</mosaic_0001>

<bundles_post_ra>
// kernel: tpu_custom_call.1
= control target key start
LH: loop header
LB: loop body
LE: loop exit
PB: predicated region body
PF: predicated region fallthrough
CT: control target
= control target key end

     0   :  { %s3443_s0 = inlined_call_operand.hbm [shape: f32[2,4,256], index: 0, kind: input, shape index: {}]   ;;  %s3444_s1 = inlined_call_operand.vmem [shape: f32[4,1], index: 1, kind: input, shape index: {}]   ;;  %s3445_s2 = inlined_call_operand.vmem [shape: f32[4,1], index: 2, kind: input, shape index: {}]   ;;  %s3446_s3 = inlined_call_operand.vmem [shape: f32[3,256], index: 3, kind: input, shape index: {}]   ;;  %s3447_s4 = inlined_call_operand.vmem [shape: f32[144], index: 4, kind: input, shape index: {}]   ;;  %s3448_s5 = inlined_call_operand.hbm [shape: f32[2,8,256], index: 5, kind: output, shape index: {}]  }
   0x1   :  { %3460 = sst [smem:[#allocation15_spill]] %s3443_s0 }
   0x2   :  { %3461 = sst [smem:[#allocation16_spill]] %s3444_s1 }
   0x3   :  { %3462 = sst [smem:[#allocation17_spill]] %s3445_s2 }
   0x4   :  { %3463 = sst [smem:[#allocation18_spill]] %s3446_s3 }
   0x5   :  { %3464 = sst [smem:[#allocation19_spill]] %s3447_s4 }
   0x6   :  { %10 = vsyncpa [#allocation4], 0 }
   0x7   :  { %12 = vsyncpa [#allocation4 + $0x1], 0 }
   0x8   :  { %13 = vsyncpa [#allocation6], 0 }
   0x9   :  { %14 = vsyncpa [#allocation5], 0 }
   0xa   :  { %16 = vsyncpa [#allocation5 + $0x1], 0  ;;  %s2273_s18 = smov 0   ;;  %s2275_s19 = smov 0  }
   0xb   :  { %s2277_s20 = smov 0   ;;  %s2279_s21 = smov 0  }
   0xc LB: > { %3465 = sst [smem:[#allocation12_spill]] %s2215_s19  ;;  %s2294_s22 = sadd.s32 4294967295, %s2223_s21   ;;  %s2223_s21 = sphi %s2279_s21, %s3495_s21   ;;  %s2219_s20 = sphi %s2277_s20, %s3494_s20   ;;  %s2215_s19 = sphi %s2275_s19, %s3493_s19   ;;  %s2211_s18 = sphi %s2273_s18, %s3492_s18  }
   0xd   : > { %3466 = sst [smem:[#allocation13_spill]] %s2219_s20  ;;  %s1868_s23 = sadd.s32 4294967294, %s2223_s21  }
   0xe   : > { %p42_p0 = scmp.ne.s32.totalorder %s2215_s19, %s2211_s18  ;;  %p3449_p1 = scmp.eq.s32.totalorder %s2294_s22, 0 }
   0xf   : > { %p156_p3 = scmp.eq.s32.totalorder %s1868_s23, 1  ;;  %p1869_p5 = scmp.ge.s32.totalorder %s2223_s21, 1 }
  0x10   : > { %p2303_p4 = por %p3449_p1, %p42_p0  ;;  %p163_p7 = scmp.lt.s32.totalorder %s2223_s21, 3 }
  0x11   : > { %p2308_p6 = por %p156_p3, %p42_p0  ;;  %s3469_s4 = sld [smem:[#allocation19_spill]] }
  0x12   : > { %s3467_s24 = scalar_select %p2303_p4, 1, 0 }
  0x13   : > { %s3468_s25 = scalar_select %p2308_p6, 1, 0 }
  0x14   : > { %p2316_p8 = pnand %p1869_p5, %p163_p7  ;;  %s2324_s30 = sadd.s32 1, %s2223_s21  }
  0x15   : > { %s26_s7 = ssub.s32 %s2223_s21, %s2324_s30  ;;  %s29_s9 = sadd.s32 1, %s2219_s20 }
  0x16   : > { %p2042_p10 = pneg %p2316_p8  ;;  %p2334_p12 = scmp.eq.s32.totalorder %s26_s7, 0 }
  0x17   : > { %s185_s28 = sshll.u32 %s3469_s4, 4  ;;  %p36_p13 = scmp.ne.s32.totalorder %s2219_s20, %s2215_s19  ;;  %s186_s28 = int_to_ptr.vmem [resolvable:$true] %s185_s28 }
  0x18   : > { %p2328_p11 = pnand %p2042_p10, %p3449_p1  ;;  %s2108_s10 = scalar_lea.vmem %s186_s28, 32 }
  0x19   : > { %p2109_p0 = scmp.ne.s32.totalorder %s186_s28, %s2108_s10  ;;  %p2116_p9 = scmp.lt.s32.totalorder %s186_s28, %s186_s28 }
  0x1a   : > { %p2110_p3 = pneg %p2328_p11  ;;  %p2117_p2 = scmp.lt.s32.totalorder %s2108_s10, %s2108_s10 }
  0x1c   : > { %p2111_p5 = pnand %p2110_p3, %p2109_p0  ;;  %p2118_p10 = por %p2117_p2, %p2116_p9 }
  0x1e   : > { %p2112_p7 = pneg %p2111_p5 }
  0x20   : > { %p2119_p1 = pnand %p2118_p10, %p2112_p7 }
  0x22   : > { %2122 = shalt.err (!%p2119_p1)
}
  0x23   : > { %s2225_s11 = smov [#allocation7]   ;;  %p37_p2 = scmp.eq.s32.totalorder %s2223_s21, 0 }
  0x24   : > { %2045 = dma.vmem_to_smem (!%p2328_p11), %s186_s28, 32, %s2225_s11, [#allocation6]  }
  0x25   : > { %s2348_s12 = scalar_select %p2334_p12, %s2219_s20, %s29_s9  }
  0x26   : > { %p3474_p1 = scmp.eq.s32.totalorder %s2294_s22, 1  ;;  %p2055_p0 = scmp.lt.s32.totalorder %s2223_s21, 2 }
  0x27   : > { %3473 = sst [smem:[#allocation14_spill]] %s2348_s12  ;;  %s196_s14 = sand.u32 1, %s2219_s20  }
  0x28   : > { %p2356_p9 = por %p3474_p1, %p36_p13  ;;  %p38_p3 = por %p37_p2, %p36_p13 }
  0x29   : > { %s1872_s15 = sshll.u32 %s196_s14, 3  ;;  %s2032_s16 = sshll.u32 %s2223_s21, 7 }
  0x2a   : > { %s3475_s13 = scalar_select %p2356_p9, 1, 0 }
  0x2b   : > { %s3476_s0 = sld [smem:[#allocation15_spill]]  ;;  %s200_s27 = scalar_lea.vmem [#allocation3], %s1872_s15 }
  0x2c   : > { %s208_s28 = sshll.u32 %s200_s27, 4  ;;  %p2371_p11 = pnand %p2055_p0, %p38_p3  ;;  %s2375_s28 = int_to_ptr.vmem [resolvable:$true] %s208_s28 }
  0x2d   : > { %s197_s7 = scalar_lea.sflag [#allocation4], %s196_s14 }
  0x2e   : > { %p2125_p13 = pneg %p2371_p11 }
  0x31   : > { %s2369_s26 = scalar_lea.hbm %s3476_s0, %s2032_s16  ;;  %s2128_s11 = scalar_lea.hbm %s3476_s0, 256 }
  0x32   : > { %s2123_s8 = scalar_lea.hbm %s2369_s26, 128  ;;  %p2129_p10 = scmp.lt.u32.totalorder %s2369_s26, %s3476_s0 }
  0x33   : > { %p2124_p12 = scmp.ne.s32.totalorder %s2369_s26, %s2123_s8  ;;  %p2130_p2 = scmp.lt.u32.totalorder %s2128_s11, %s2123_s8 }
  0x34   : > { %p2132_p0 = scmp.lt.u32.totalorder %s2123_s8, %s2369_s26 }
  0x35   : > { %p2126_p5 = pnand %p2125_p13, %p2124_p12  ;;  %p2131_p1 = por %p2130_p2, %p2129_p10 }
  0x37   : > { %p2127_p7 = pneg %p2126_p5  ;;  %p2133_p3 = por %p2132_p0, %p2131_p1 }
  0x39   : > { %p2134_p6 = pnand %p2133_p3, %p2127_p7 }
  0x3b   : > { %2137 = shalt.err (!%p2134_p6)
}
  0x3c   : > { %s2138_s14 = scalar_lea.vmem %s2375_s28, 128  ;;  %s2226_s17 = smov [#allocation3]  }
  0x3d   : > { %p2139_p12 = scmp.ne.s32.totalorder %s2375_s28, %s2138_s14  ;;  %s2143_s23 = sshll.u32 %s2226_s17, 4  ;;  %s2144_s23 = int_to_ptr.vmem [resolvable:$false] %s2143_s23 }
  0x3e   : > { %s2145_s27 = scalar_lea.vmem %s2144_s23, 256  ;;  %p2146_p4 = scmp.lt.s32.totalorder %s2375_s28, %s2144_s23 }
  0x3f   : > { %p2141_p5 = pnand %p2139_p12, %p2125_p13  ;;  %p2147_p10 = scmp.lt.s32.totalorder %s2145_s27, %s2138_s14 }
  0x41   : > { %p2142_p9 = pneg %p2141_p5  ;;  %p2148_p2 = por %p2147_p10, %p2146_p4 }
  0x43   : > { %p2149_p1 = pnand %p2148_p2, %p2142_p9 }
  0x45   : > { %2152 = shalt.err (!%p2149_p1)
}
  0x46   : > { %2049 = dma.hbm_to_vmem [thread:$0]  (!%p2371_p11), %s2369_s26, 128, %s2375_s28, %s197_s7  }
  0x47   : > { %217 = sbr.rel (%p2316_p8) target bundleno = 756 (0x2f4), region = 40  ;;  %s2405_s8 = sand.u32 (!%p2316_p8), 1, %s2215_s19  }
  0x48   : > { %s1876_s9 = sshll.u32 (!%p2316_p8), %s2405_s8, 3  ;;  %s220_s10 = scalar_lea.sflag (!%p2316_p8), [#allocation4], %s2405_s8 }
  0x49   : > { %s223_s11 = scalar_lea.vmem (!%p2316_p8), [#allocation3], %s1876_s9  ;;  %p3478_p4 = scmp.ne.s32.totalorder (!%p2316_p8), %s3467_s24, 0 }
  0x4e   : > { %2198 = dma.done.wait (%p3478_p4), %s220_s10, 128  }
  0x4f   : > { %2200 = vsyncadd (%p3478_p4), %s220_s10, 4294967168  ;;  %p3479_p6 = scmp.eq.s32.totalorder %s2294_s22, 0 }
  0x51   : > { %2202 = dma.done.wait (%p3479_p6), [#allocation6], 32   ;;  %p3480_p9 = pmov %p3479_p6 }
  0x53   : > { %2204 = vsyncadd (%p3480_p9), [#allocation6], 4294967264 }
  0x54   : > { %232 = sfence }
  0x55   : > { %s3481_s1 = sld [smem:[#allocation16_spill]]  ;;  %v2227_v1 = vmov 0   ;;  %s3482_s3 = sld [smem:[#allocation18_spill]]  ;;  %v255_v4 = vld [vmem:[%s223_s11] sm:$0xff]  ;;  %v2229_v6 = vmov 0.0   ;;  %v264_v10 = vlaneseq  ;;  %vm294_vm0 = vcmask 908288  }
  0x56   : > { %2106 = vset.pattern.permute.xlu0 %v2227_v1  ;;  %s3483_s2 = sld [smem:[#allocation17_spill]]  ;;  %s3454_s15 = smov 111   ;;  %v1727_v5 = vcombine.high %v255_v4, %v255_v4  ;;  %285 = vst [vmem:[#allocation2] sm:$0xff] %v2229_v6  ;;  %286 = vst [vmem:[#allocation2 + $0x8] sm:$0xff] %v2229_v6  ;;  %v2235_v8 = vmov 839922192  }
  0x57   : > { %s1878_s16 = sshll.u32 %s2405_s8, 4  ;;  %s2230_s27 = smov 113   ;;  %v262_v9 = vunpack.c.l.s4 %v2235_v8  ;;  %v265_v12 = vshrl.u32 %v264_v10, 7  ;;  %vm538_vm1 = vcmask 924672   ;;  %vm378_vm2 = vcmask 1039360  }
  0x58   : > { %s2428_s14 = scalar_lea.vmem [#allocation8], %s1878_s16  ;;  %s3456_s9 = smov 127   ;;  %vm1049_vm3 = vcmask 7168   ;;  %vm1226_vm4 = vcmask 121856   ;;  %vm549_vm5 = vcmask 1031168   ;;  %vm1558_vm6 = vcmask 138240  }
  0x59   : > { %1729 = vst [vmem:[%s2428_s14] sm:$0xf] %v255_v4  ;;  %1730 = vst [vmem:[%s2428_s14 + $0x8] sm:$0xf] %v1727_v5  ;;  %s2232_s10 = smov 1   ;;  %s2233_s11 = smov 15   ;;  %v263_v11 = vunpack.c.0.s8 %v262_v9  ;;  %vm719_vm7 = vcmask 916480  }
  0x5a   : > { %s3452_s29 = smov 17   ;;  %s1895_s26 = sld [smem:[#allocation7 + $0x14]]  ;;  %vm1060_vm8 = vcmask 900096   ;;  %vm1237_vm9 = vcmask 785408   ;;  %vm1401_vm10 = vcmask 777216   ;;  %vm1569_vm11 = vcmask 769024  }
  0x5b   : > { %v256_v0 = vld [vmem:[%s3481_s1] sm:$0xf]  ;;  %v266_v13 = vsub.s32 %v263_v11, %v265_v12  ;;  %s1894_s28 = sld [smem:[#allocation7 + $0x10]]  ;;  %s1897_s6 = sld [smem:[#allocation7 + $0x1c]]  ;;  %vm3374_vm12 = vcmp.lt.s32.totalorder %v264_v10, 256 }
  0x5c   : > { %259 = vperm.xlu0 %2106, %v256_v0   ;;  %v288_v2 = vld [vmem:[%s3482_s3] ss:$4 sm:$0x3]  ;;  %v1910_v7 = vld [vmem:[%s3482_s3 + $0x2] ss:$4 sm:$0x3] }
  0x5d   : > { %v270_v3 = vld [vmem:[%s3483_s2] sm:$0xf]  ;;  %291 = vrot.lane.b32.xlu1 %v288_v2, %s3454_s15  ;;  %s1896_s24 = sld [smem:[#allocation7 + $0x18]]  ;;  %s2438_s7 = sld [smem:[#allocation7 + $0x15]] }
  0x5e   : > { %s1898_s16 = sld [smem:[#allocation7 + $0x11]]  ;;  %s2444_s17 = sld [smem:[#allocation7 + $0x1d]] }
  0x5f   : > { %s2446_s23 = sld [smem:[#allocation7 + $0x19]]  ;;  %s2473_s15 = sld [smem:[#allocation7 + $0x4]] }
  0x60   : > { %273 = vperm.xlu0 %2106, %v270_v3   ;;  %v383_v22 = vstv %s1895_s26  ;;  %s2456_s26 = sld [smem:[#allocation7 + $0x1a]]  ;;  %s2475_s0 = sld [smem:[#allocation7 + $0x5]] }
  0x61   : > { %v372_v23 = vstv %s1894_s28  ;;  %v403_v26 = vstv %s1897_s6  ;;  %s2460_s28 = sld [smem:[#allocation7 + $0x17]]  ;;  %s2462_s6 = sld [smem:[#allocation7 + $0x13]] }
  0x62   : > { %s2477_s1 = sld [smem:[#allocation7 + $0x6]]  ;;  %s2489_s2 = sld [smem:[#allocation7 + $0x2]] }
  0x63   : > { %v393_v27 = vstv %s1896_s24  ;;  %v423_v31 = vstv %s2438_s7  ;;  %s2467_s24 = sld [smem:[#allocation7 + $0x40]]  ;;  %s2481_s7 = sld [smem:[#allocation7 + $0x7]] }
  0x64   : > { %535 = vrot.lane.b32.xlu0 %v1910_v7, %s2230_s27  ;;  %s2450_s27 = sld [smem:[#allocation7 + $0x16]]  ;;  %v413_v32 = vstv %s1898_s16  ;;  %s2483_s16 = sld [smem:[#allocation7]]  ;;  %v443_v37 = vstv %s2444_s17 }
  0x65   : > { %v433_v38 = vstv %s2446_s23  ;;  %s3484_s3 = smov 127   ;;  %s2493_s4 = sld [smem:[#allocation7 + $0x3]]  ;;  %v303_v51 = vstv %s2473_s15 }
  0x66   : > { %s2495_s12 = sld [smem:[#allocation7 + $0xc]]  ;;  %s2497_s17 = sld [smem:[#allocation7 + $0xd]]  ;;  %v473_v46 = vstv %s2456_s26  ;;  %v322_v52 = vstv %s2475_s0 }
  0x67   : > { %s2499_s23 = sld [smem:[#allocation7 + $0xe]]  ;;  %s2504_s20 = sld [smem:[#allocation7 + $0x8]]  ;;  %v503_v47 = vstv %s2460_s28  ;;  %v493_v48 = vstv %s2462_s6 }
  0x68   : > { %706 = vrot.lane.b32.xlu0 %v288_v2, %s3456_s9  ;;  %s2512_s19 = sld [smem:[#allocation7 + $0x9]]  ;;  %v341_v58 = vstv %s2477_s1  ;;  %s2534_s15 = sld [smem:[#allocation7 + $0xf]]  ;;  %v337_v63 = vstv %s2489_s2 }
  0x69   : > { %v879_v49 = vstv %s2467_s24  ;;  %v360_v59 = vstv %s2481_s7  ;;  %s2541_s0 = sld [smem:[#allocation7 + $0xb]]  ;;  %s2549_s1 = sld [smem:[#allocation7 + $0x48]] }
  0x6a   : > { %v463_v41 = vstv %s2450_s27  ;;  %s2518_s27 = sld [smem:[#allocation7 + $0xa]]  ;;  %v299_v60 = vstv %s2483_s16  ;;  %s2560_s2 = sld [smem:[#allocation7 + $0x41]] }
  0x6b   : > { %v356_v0 = vstv %s2493_s4  ;;  %s2562_s4 = sld [smem:[#allocation7 + $0x44]]  ;;  %s1950_s26 = sld [smem:[#allocation7 + $0x4d]] }
  0x6c   : > { %1046 = vrot.lane.b32.xlu0 %v1910_v7, %s2232_s10  ;;  %s2452_s10 = sld [smem:[#allocation7 + $0x12]]  ;;  %v330_v3 = vstv %s2497_s17  ;;  %s1955_s28 = sld [smem:[#allocation7 + $0x43]] }
  0x6d   : > { %v307_v12 = vstv %s2504_s20  ;;  %s1946_s20 = sld [smem:[#allocation7 + $0x4c]]  ;;  %s1952_s6 = sld [smem:[#allocation7 + $0x46]] }
  0x6e   : > { %s1954_s24 = sld [smem:[#allocation7 + $0x4e]]  ;;  %s1911_s7 = sld [smem:[#allocation7 + $0x20]] }
  0x6f   : > { %s1956_s16 = sld [smem:[#allocation7 + $0x47]]  ;;  %s1914_s17 = sld [smem:[#allocation7 + $0x2c]] }
  0x70   : > { %1223 = vrot.lane.b32.xlu0 %v288_v2, %s2233_s11  ;;  %s2454_s11 = sld [smem:[#allocation7 + $0x1e]]  ;;  %v311_v2 = vstv %s2495_s12  ;;  %s3485_s12 = smov 111  }
  0x71   : > { %p3489_p11 = scmp.ne.s32.totalorder %s3475_s13, 0 }
  0x72   : > { %v453_v44 = vstv %s2452_s10  ;;  %s1948_s10 = sld [smem:[#allocation7 + $0x45]] }
  0x74   : > { %1555 = vrot.lane.b32.xlu0 %v1910_v7, %s3452_s29  ;;  %s2471_s29 = sld [smem:[#allocation7 + $0x1b]] }
  0x76   : > { %v483_v45 = vstv %s2454_s11  ;;  %s1953_s11 = sld [smem:[#allocation7 + $0x4a]] }
  0x7a   : > { %v513_v50 = vstv %s2471_s29  ;;  %s1951_s29 = sld [smem:[#allocation7 + $0x42]] }
  0xcf   : > { %v292_v33 = vpop.permute.xlu1 %291 }
  0xd0   : > { %v293_v36 = vrot.slane %v292_v33, 7 }
  0xd2   : > { %v295_v43 = vsel %vm294_vm0, %v293_v36, %v292_v33  ;;  %v364_v36 = vstv %s2541_s0  ;;  %s1918_s0 = sld [smem:[#allocation7 + $0x2d]] }
  0xdb   : > { %v260_v14 = vpop.permute.xlu0 %259 }
  0xdc   : > { %v267_v15 = vrot.slane %v260_v14, %v266_v13 }
  0xde   : > { %v269_v17 = vmul.f32 %v267_v15, %v255_v4  ;;  %v349_v4 = vstv %s2499_s23  ;;  %s1958_s23 = sld [smem:[#allocation7 + $0x4f]] }
  0xdf   : > { %v274_v16 = vpop.permute.xlu0 %273 }
  0xe0   : > { %v281_v18 = vrot.slane %v274_v16, %v266_v13  ;;  %v326_v13 = vstv %s2512_s19  ;;  %s1949_s19 = sld [smem:[#allocation7 + $0x49]] }
  0xe2   : > { %v283_v19 = vadd.f32 %v281_v18, %v269_v17  ;;  %v345_v17 = vstv %s2518_s27  ;;  %s1916_s27 = sld [smem:[#allocation7 + $0x25]] }
  0xe4   : > { %v284_v20 = vmax.f32 %v283_v19, 0.0 }
  0xe6   : > { %287 = vst [vmem:[#allocation2 + $0x4] sm:$0xff] %v284_v20 }
  0xed   : > { %v2440_v21 = vld [vmem:[#allocation2] ss:$4 sm:$0x7]  ;;  %v2464_v30 = vld [vmem:[#allocation2 + $0x1] ss:$4 sm:$0x7] }
  0xee   : > { %v384_v24 = vmul.f32 %v383_v22, %v2440_v21  ;;  %v373_v25 = vmul.f32 %v372_v23, %v2440_v21  ;;  %v404_v28 = vmul.f32 %v403_v26, %v2440_v21  ;;  %v394_v29 = vmul.f32 %v393_v27, %v2440_v21  ;;  %v2506_v42 = vld [vmem:[#allocation2 + $0x2] ss:$4 sm:$0x7]  ;;  %v2524_v53 = vld [vmem:[#allocation2 + $0x3] ss:$4 sm:$0x7] }
  0xef   : > { %v424_v34 = vmul.f32 %v423_v31, %v2464_v30  ;;  %v414_v35 = vmul.f32 %v413_v32, %v2464_v30  ;;  %v444_v39 = vmul.f32 %v443_v37, %v2464_v30  ;;  %v434_v40 = vmul.f32 %v433_v38, %v2464_v30  ;;  %v877_v27 = vld [vmem:[#allocation2 + $0x4] ss:$4 sm:$0x3] }
  0xf0   : > { %386 = vrot.lane.b32.xlu0 %v384_v24, %s3456_s9  ;;  %375 = vrot.lane.b32.xlu1 %v373_v25, %s3456_s9  ;;  %v297_v54 = vmul.f32 %v295_v43, %v2440_v21  ;;  %v316_v55 = vmul.f32 %v2464_v30, %v295_v43  ;;  %v464_v56 = vmul.f32 %v463_v41, %v2506_v42  ;;  %v368_v31 = vstv %s2534_s15  ;;  %s1912_s15 = sld [smem:[#allocation7 + $0x24]] }
  0xf1   : > { %v454_v57 = vmul.f32 %v453_v44, %v2506_v42  ;;  %v335_v62 = vmul.f32 %v2506_v42, %v295_v43  ;;  %v354_v1 = vmul.f32 %v2524_v53, %v295_v43  ;;  %v484_v5 = vmul.f32 %v483_v45, %v2506_v42 }
  0xf2   : > { %v474_v6 = vmul.f32 %v473_v46, %v2506_v42  ;;  %v323_v7 = vmul.f32 %v322_v52, %v316_v55  ;;  %v304_v8 = vmul.f32 %v303_v51, %v297_v54  ;;  %v300_v11 = vmul.f32 %v299_v60, %v297_v54 }
  0xf3   : > { %v504_v14 = vmul.f32 %v503_v47, %v2524_v53  ;;  %v342_v15 = vmul.f32 %v341_v58, %v335_v62  ;;  %v494_v18 = vmul.f32 %v493_v48, %v2524_v53  ;;  %v338_v19 = vmul.f32 %v337_v63, %v335_v62  ;;  %v961_v63 = vld [vmem:[#allocation2 + $0x6] ss:$4 sm:$0x3] }
  0xf4   : > { %406 = vrot.lane.b32.xlu0 %v404_v28, %s3456_s9  ;;  %396 = vrot.lane.b32.xlu1 %v394_v29, %s3456_s9  ;;  %s2487_s9 = sld [smem:[#allocation7 + $0x1]]  ;;  %v324_v16 = vadd.f32 %v323_v7, %v304_v8  ;;  %v331_v22 = vmul.f32 %v330_v3, %v316_v55  ;;  %v361_v23 = vmul.f32 %v360_v59, %v354_v1  ;;  %v899_v45 = vstv %s2549_s1  ;;  %s1913_s1 = sld [smem:[#allocation7 + $0x28]] }
  0xf5   : > { %v312_v25 = vmul.f32 %v311_v2, %v297_v54  ;;  %v327_v26 = vmul.f32 %v326_v13, %v316_v55  ;;  %v357_v28 = vmul.f32 %v356_v0, %v354_v1  ;;  %v308_v32 = vmul.f32 %v307_v12, %v297_v54  ;;  %v919_v54 = vld [vmem:[#allocation2 + $0x5] ss:$4 sm:$0x3] }
  0xf6   : > { %v343_v24 = vadd.f32 %v342_v15, %v324_v16  ;;  %v346_v38 = vmul.f32 %v345_v17, %v335_v62  ;;  %v514_v41 = vmul.f32 %v513_v50, %v2524_v53  ;;  %v369_v43 = vmul.f32 %v368_v31, %v354_v1 }
  0xf7   : > { %v365_v47 = vmul.f32 %v364_v36, %v354_v1  ;;  %v900_v52 = vmul.f32 %v899_v45, %v877_v27  ;;  %v941_v59 = vstv %s1949_s19  ;;  %v909_v60 = vstv %s1946_s20  ;;  %s1924_s19 = sld [smem:[#allocation7 + $0x27]]  ;;  %s1917_s20 = sld [smem:[#allocation7 + $0x29]] }
  0xf8   : > { %426 = vrot.lane.b32.xlu0 %v424_v34, %s3484_s3  ;;  %416 = vrot.lane.b32.xlu1 %v414_v35, %s3484_s3  ;;  %v2567_v33 = vadd.f32 %v361_v23, %v343_v24  ;;  %v350_v34 = vmul.f32 %v349_v4, %v335_v62  ;;  %v332_v35 = vadd.f32 %v331_v22, %v312_v25  ;;  %v963_v0 = vstv %s1951_s29  ;;  %s1926_s29 = sld [smem:[#allocation7 + $0x2f]] }
  0xf9   : > { %v910_v62 = vmul.f32 %v909_v60, %v877_v27  ;;  %v931_v1 = vstv %s1948_s10  ;;  %v964_v2 = vmul.f32 %v963_v0, %v961_v63  ;;  %v983_v4 = vstv %s1953_s11  ;;  %s1919_s10 = sld [smem:[#allocation7 + $0x22]]  ;;  %s1920_s11 = sld [smem:[#allocation7 + $0x26]] }
  0xfa   : > { %v318_v61 = vstv %s2487_s9  ;;  %s2551_s9 = sld [smem:[#allocation7 + $0x1f]]  ;;  %v351_v44 = vadd.f32 %v350_v34, %v332_v35  ;;  %v932_v3 = vmul.f32 %v931_v1, %v919_v54  ;;  %v984_v7 = vmul.f32 %v983_v4, %v961_v63 }
  0xfb   : > { %v319_v9 = vmul.f32 %v318_v61, %v316_v55  ;;  %v921_v55 = vstv %s2560_s2  ;;  %v942_v61 = vmul.f32 %v941_v59, %v919_v54  ;;  %v1005_v12 = vstv %s1955_s28  ;;  %s1921_s2 = sld [smem:[#allocation7 + $0x2a]]  ;;  %s1922_s28 = sld [smem:[#allocation7 + $0x2e]] }
  0xfc   : > { %446 = vrot.lane.b32.xlu0 %v444_v39, %s3484_s3  ;;  %436 = vrot.lane.b32.xlu1 %v434_v40, %s3484_s3  ;;  %v328_v39 = vadd.f32 %v327_v26, %v308_v32  ;;  %v880_v40 = vmul.f32 %v879_v49, %v877_v27  ;;  %v2581_v51 = vadd.f32 %v369_v43, %v351_v44  ;;  %v973_v13 = vstv %s1952_s6  ;;  %s1933_s6 = sld [smem:[#allocation7 + $0x39]] }
  0xfd   : > { %v320_v20 = vadd.f32 %v319_v9, %v300_v11  ;;  %v1003_v11 = vld [vmem:[#allocation2 + $0x7] ss:$4 sm:$0x3]  ;;  %v974_v15 = vmul.f32 %v973_v13, %v961_v63  ;;  %v543_v23 = vstv %s1911_s7  ;;  %v1015_v24 = vstv %s1956_s16  ;;  %s1925_s7 = sld [smem:[#allocation7 + $0x2b]]  ;;  %s2237_s16 = smov 112  }
  0xfe   : > { %v347_v48 = vadd.f32 %v346_v38, %v328_v39  ;;  %v1016_v26 = vmul.f32 %v1015_v24, %v1003_v11  ;;  %v595_v34 = vstv %s1916_s27  ;;  %v554_v35 = vstv %s1912_s15  ;;  %s1939_s27 = sld [smem:[#allocation7 + $0x33]]  ;;  %s1929_s15 = sld [smem:[#allocation7 + $0x38]] }
  0xff   : > { %v339_v29 = vadd.f32 %v338_v19, %v320_v20  ;;  %v615_v39 = vstv %s1918_s0  ;;  %v697_v60 = vstv %s1926_s29  ;;  %s1941_s0 = sld [smem:[#allocation7 + $0x3b]]  ;;  %s1936_s29 = sld [smem:[#allocation7 + $0x36]] }
 0x100   : > { %466 = vrot.lane.b32.xlu0 %v464_v56, %s3484_s3  ;;  %456 = vrot.lane.b32.xlu1 %v454_v57, %s3484_s3  ;;  %v523_v46 = vstv %s2551_s9  ;;  %v2583_v49 = vadd.f32 %v365_v47, %v347_v48  ;;  %v889_v56 = vstv %s2562_s4  ;;  %v922_v57 = vmul.f32 %v921_v55, %v919_v54  ;;  %s2236_s9 = smov 126   ;;  %s1915_s4 = sld [smem:[#allocation7 + $0x21]] }
 0x101   : > { %v2570_v37 = vadd.f32 %v357_v28, %v339_v29  ;;  %v524_v50 = vmul.f32 %v523_v46, %v2524_v53  ;;  %v890_v58 = vmul.f32 %v889_v56, %v877_v27  ;;  %v574_v27 = vstv %s1914_s17  ;;  %s1937_s17 = sld [smem:[#allocation7 + $0x3a]] }
 0x102   : > { %v1035_v28 = vstv %s1958_s23  ;;  %v646_v45 = vstv %s1921_s2  ;;  %v677_v55 = vstv %s1924_s19  ;;  %v605_v56 = vstv %s1917_s20  ;;  %s1927_s23 = sld [smem:[#allocation7 + $0x30]]  ;;  %s1934_s19 = sld [smem:[#allocation7 + $0x3d]] }
 0x103   : > { %v1036_v32 = vmul.f32 %v1035_v28, %v1003_v11  ;;  %s1959_s2 = sld [smem:[#allocation7 + $0x50]]  ;;  %s1963_s20 = sld [smem:[#allocation7 + $0x51]] }
 0x104   : > { %486 = vrot.lane.b32.xlu0 %v484_v5, %s3484_s3  ;;  %476 = vrot.lane.b32.xlu1 %v474_v6, %s3484_s3  ;;  %v951_v5 = vstv %s1950_s26  ;;  %v536_v6 = vpop.permute.xlu0 %535  ;;  %s1931_s26 = sld [smem:[#allocation7 + $0x31]] }
 0x105   : > { %v952_v8 = vmul.f32 %v951_v5, %v919_v54  ;;  %v537_v9 = vrot.slane %v536_v6, 7 }
 0x106   : > { %v585_v46 = vstv %s1915_s4  ;;  %s1932_s4 = sld [smem:[#allocation7 + $0x35]] }
 0x107   : > { %v539_v16 = vsel %vm538_vm1, %v537_v9, %v536_v6  ;;  %v775_v9 = vstv %s1933_s6  ;;  %s2702_s6 = sld [smem:[#allocation7 + $0x5a]] }
 0x108   : > { %506 = vrot.lane.b32.xlu0 %v504_v14, %s3484_s3  ;;  %496 = vrot.lane.b32.xlu1 %v494_v18, %s3484_s3  ;;  %v1006_v14 = vmul.f32 %v1005_v12, %v1003_v11  ;;  %v993_v18 = vstv %s1954_s24  ;;  %v541_v19 = vmul.f32 %v539_v16, %v2440_v21  ;;  %v583_v29 = vmul.f32 %v539_v16, %v2464_v30  ;;  %v707_v48 = vpop.permute.xlu0 %706  ;;  %s1935_s24 = sld [smem:[#allocation7 + $0x32]] }
 0x109   : > { %v994_v22 = vmul.f32 %v993_v18, %v961_v63  ;;  %v665_v47 = vmul.f32 %v539_v16, %v2524_v53  ;;  %v708_v54 = vrot.slane %v707_v48, 7 }
 0x10a   : > { %v544_v25 = vmul.f32 %v543_v23, %v541_v19  ;;  %v575_v31 = vmul.f32 %v574_v27, %v541_v19  ;;  %v596_v36 = vmul.f32 %v595_v34, %v583_v29  ;;  %v555_v38 = vmul.f32 %v554_v35, %v541_v19 }
 0x10b   : > { %v616_v43 = vmul.f32 %v615_v39, %v583_v29  ;;  %v709_v59 = vsel %vm378_vm2, %v708_v54, %v707_v48  ;;  %v698_v63 = vmul.f32 %v697_v60, %v665_v47  ;;  %v755_v6 = vstv %s1931_s26  ;;  %s1967_s26 = sld [smem:[#allocation7 + $0x52]] }
 0x10c   : > { %882 = vrot.lane.b32.xlu0 %v880_v40, %s3485_s12  ;;  %516 = vrot.lane.b32.xlu1 %v514_v41, %s3484_s3  ;;  %v564_v40 = vstv %s1913_s1  ;;  %v624_v41 = vmul.f32 %v539_v16, %v2506_v42  ;;  %v1047_v16 = vpop.permute.xlu0 %1046  ;;  %s1930_s1 = sld [smem:[#allocation7 + $0x3c]] }
 0x10d   : > { %v565_v44 = vmul.f32 %v564_v40, %v541_v19  ;;  %v816_v19 = vstv %s1937_s17  ;;  %v1048_v24 = vrot.slane %v1047_v16, 7  ;;  %v1054_v40 = vstv %s1959_s2  ;;  %s2727_s17 = sld [smem:[#allocation7 + $0x5b]]  ;;  %s1968_s2 = sld [smem:[#allocation7 + $0x56]] }
 0x110   : > { %902 = vrot.lane.b32.xlu0 %v900_v52, %s3485_s12  ;;  %526 = vrot.lane.b32.xlu1 %v524_v50, %s3484_s3  ;;  %s1957_s3 = sld [smem:[#allocation7 + $0x4b]]  ;;  %v647_v52 = vmul.f32 %v646_v45, %v624_v41  ;;  %v586_v50 = vmul.f32 %v585_v46, %v583_v29  ;;  %v2647_v27 = vpop.permute.xlu0 %1223 }
 0x112   : > { %v744_v34 = vstv %s1930_s1  ;;  %s1966_s1 = sld [smem:[#allocation7 + $0x5d]] }
 0x114   : > { %924 = vrot.lane.b32.xlu0 %v922_v57, %s3485_s12  ;;  %892 = vrot.lane.b32.xlu1 %v890_v58, %s3485_s12  ;;  %v678_v57 = vmul.f32 %v677_v55, %v665_v47  ;;  %v606_v58 = vmul.f32 %v605_v56, %v583_v29  ;;  %v2655_v29 = vld [vmem:[#allocation2 + $0x4] ss:$4 sm:$0x7] }
 0x116   : > { %v1025_v17 = vstv %s1957_s3  ;;  %s1923_s3 = sld [smem:[#allocation7 + $0x23]] }
 0x117   : > { %v1026_v20 = vmul.f32 %v1025_v17, %v1003_v11 }
 0x118   : > { %944 = vrot.lane.b32.xlu0 %v942_v61, %s3485_s12  ;;  %912 = vrot.lane.b32.xlu1 %v910_v62, %s3485_s12  ;;  %v626_v61 = vstv %s1919_s10  ;;  %v2620_v62 = vmul.f32 %v709_v59, %v2440_v21  ;;  %s2677_s10 = sld [smem:[#allocation7 + $0x59]] }
 0x119   : > { %v627_v0 = vmul.f32 %v626_v61, %v624_v41 }
 0x11a   : > { %v745_v39 = vmul.f32 %v744_v34, %v2620_v62 }
 0x11c   : > { %966 = vrot.lane.b32.xlu0 %v964_v2, %s3485_s12  ;;  %934 = vrot.lane.b32.xlu1 %v932_v3, %s3485_s12  ;;  %v636_v2 = vstv %s1920_s11  ;;  %v2625_v3 = vmul.f32 %v709_v59, %v2464_v30  ;;  %v667_v11 = vstv %s1923_s3  ;;  %v2634_v30 = vmul.f32 %v709_v59, %v2506_v42  ;;  %s2238_s11 = smov 110   ;;  %s1942_s3 = sld [smem:[#allocation7 + $0x3f]] }
 0x11d   : > { %v637_v5 = vmul.f32 %v636_v2, %v624_v41  ;;  %v668_v13 = vmul.f32 %v667_v11, %v665_v47  ;;  %v2643_v42 = vmul.f32 %v709_v59, %v2524_v53  ;;  %v806_v59 = vstv %s1936_s29  ;;  %s1972_s29 = sld [smem:[#allocation7 + $0x57]] }
 0x11e   : > { %v756_v21 = vmul.f32 %v755_v6, %v2625_v3  ;;  %v776_v12 = vmul.f32 %v775_v9, %v2625_v3 }
 0x120   : > { %986 = vrot.lane.b32.xlu0 %v984_v7, %s3485_s12  ;;  %954 = vrot.lane.b32.xlu1 %v952_v8, %s3485_s12  ;;  %v656_v7 = vstv %s1922_s28  ;;  %s1940_s28 = sld [smem:[#allocation7 + $0x37]] }
 0x121   : > { %v657_v8 = vmul.f32 %v656_v7, %v624_v41  ;;  %v765_v41 = vstv %s1932_s4  ;;  %s1981_s4 = sld [smem:[#allocation7 + $0x69]] }
 0x122   : > { %v766_v46 = vmul.f32 %v765_v41, %v2625_v3 }
 0x124   : > { %1008 = vrot.lane.b32.xlu0 %v1006_v14, %s3485_s12  ;;  %976 = vrot.lane.b32.xlu1 %v974_v15, %s3485_s12  ;;  %v796_v14 = vstv %s1935_s24  ;;  %v687_v15 = vstv %s1925_s7  ;;  %s1971_s24 = sld [smem:[#allocation7 + $0x53]]  ;;  %s1960_s7 = sld [smem:[#allocation7 + $0x54]] }
 0x125   : > { %v797_v17 = vmul.f32 %v796_v14, %v2634_v30  ;;  %v688_v18 = vmul.f32 %v687_v15, %v665_v47  ;;  %v2679_v47 = vld [vmem:[#allocation2 + $0x5] ss:$4 sm:$0x7]  ;;  %v2729_v14 = vld [vmem:[#allocation2 + $0x7] ss:$4 sm:$0x7]  ;;  %v867_v15 = vstv %s1942_s3 }
 0x126   : > { %s2830_s3 = sld [smem:[#allocation7 + $0x6c]] }
 0x128   : > { %1028 = vrot.lane.b32.xlu0 %v1026_v20, %s3485_s12  ;;  %996 = vrot.lane.b32.xlu1 %v994_v22, %s3485_s12  ;;  %v713_v20 = vstv %s1927_s23  ;;  %v817_v22 = vmul.f32 %v816_v19, %v2634_v30  ;;  %s2732_s23 = sld [smem:[#allocation7 + $0x5c]] }
 0x129   : > { %v714_v23 = vmul.f32 %v713_v20, %v2620_v62  ;;  %v868_v20 = vmul.f32 %v867_v15, %v2643_v42 }
 0x12c   : > { %546 = vrot.lane.b32.xlu0 %v544_v25, %s2236_s9  ;;  %1018 = vrot.lane.b32.xlu1 %v1016_v26, %s3485_s12  ;;  %v837_v25 = vstv %s1939_s27  ;;  %v734_v26 = vstv %s1929_s15  ;;  %s1975_s27 = sld [smem:[#allocation7 + $0x60]]  ;;  %s1964_s15 = sld [smem:[#allocation7 + $0x55]] }
 0x12d   : > { %v838_v28 = vmul.f32 %v837_v25, %v2643_v42  ;;  %v735_v53 = vmul.f32 %v734_v26, %v2620_v62 }
 0x130   : > { %577 = vrot.lane.b32.xlu0 %v575_v31, %s2236_s9  ;;  %1038 = vrot.lane.b32.xlu1 %v1036_v32, %s3485_s12  ;;  %s1928_s12 = sld [smem:[#allocation7 + $0x34]]  ;;  %v2657_v31 = vsel %vm1049_vm3, %v1048_v24, %v1047_v16  ;;  %v857_v32 = vstv %s1941_s0  ;;  %v1065_v24 = vstv %s1960_s7  ;;  %s1977_s0 = sld [smem:[#allocation7 + $0x68]] }
 0x131   : > { %v2663_v35 = vmul.f32 %v2657_v31, %v2655_v29  ;;  %v2738_v16 = vmul.f32 %v2729_v14, %v2657_v31  ;;  %s2839_s7 = sld [smem:[#allocation7 + $0x65]] }
 0x132   : > { %v1231_v41 = vstv %s1975_s27  ;;  %s2905_s27 = sld [smem:[#allocation7 + $0x66]] }
 0x133   : > { %v1055_v45 = vmul.f32 %v1054_v40, %v2663_v35 }
 0x134   : > { %598 = vrot.lane.b32.xlu0 %v596_v36, %s2236_s9  ;;  %557 = vrot.lane.b32.xlu1 %v555_v38, %s2236_s9  ;;  %v2665_v36 = vpop.permute.xlu0 %1555  ;;  %v858_v38 = vmul.f32 %v857_v32, %v2643_v42  ;;  %v1085_v32 = vstv %s2732_s23  ;;  %s2894_s23 = sld [smem:[#allocation7 + $0x71]] }
 0x136   : > { %v724_v1 = vstv %s1928_s12  ;;  %s1938_s12 = sld [smem:[#allocation7 + $0x3e]] }
 0x137   : > { %v725_v4 = vmul.f32 %v724_v1, %v2620_v62  ;;  %v1118_v1 = vstv %s2677_s10  ;;  %s2800_s10 = sld [smem:[#allocation7 + $0x6a]] }
 0x138   : > { %618 = vrot.lane.b32.xlu0 %v616_v43, %s2236_s9  ;;  %567 = vrot.lane.b32.xlu1 %v565_v44, %s2236_s9 }
 0x13c   : > { %649 = vrot.lane.b32.xlu0 %v647_v52, %s2236_s9  ;;  %588 = vrot.lane.b32.xlu1 %v586_v50, %s2236_s9  ;;  %v785_v52 = vstv %s1934_s19  ;;  %v2686_v50 = vmul.f32 %v2679_v47, %v2657_v31  ;;  %v826_v2 = vstv %s1938_s12  ;;  %s2239_s19 = smov 96   ;;  %s2802_s12 = sld [smem:[#allocation7 + $0x5f]] }
 0x13d   : > { %v827_v7 = vmul.f32 %v826_v2, %v2634_v30 }
 0x13e   : > { %v1119_v6 = vmul.f32 %v1118_v1, %v2686_v50 }
 0x140   : > { %680 = vrot.lane.b32.xlu0 %v678_v57, %s2236_s9  ;;  %608 = vrot.lane.b32.xlu1 %v606_v58, %s2236_s9  ;;  %v786_v57 = vmul.f32 %v785_v52, %v2625_v3  ;;  %v1098_v58 = vstv %s1963_s20  ;;  %s1983_s20 = sld [smem:[#allocation7 + $0x62]] }
 0x141   : > { %v1099_v62 = vmul.f32 %v1098_v58, %v2686_v50  ;;  %v1128_v58 = vstv %s1966_s1  ;;  %s2240_s1 = smov 95  }
 0x142   : > { %v1129_v1 = vmul.f32 %v1128_v58, %v2686_v50 }
 0x144   : > { %700 = vrot.lane.b32.xlu0 %v698_v63, %s2236_s9  ;;  %629 = vrot.lane.b32.xlu1 %v627_v0, %s2236_s9  ;;  %v807_v63 = vmul.f32 %v806_v59, %v2634_v30  ;;  %v2704_v0 = vld [vmem:[#allocation2 + $0x6] ss:$4 sm:$0x7]  ;;  %v1161_v30 = vstv %s2702_s6  ;;  %s2822_s6 = sld [smem:[#allocation7 + $0x6b]] }
 0x145   : > { %v2711_v3 = vmul.f32 %v2704_v0, %v2657_v31  ;;  %v1204_v31 = vstv %s2727_s17  ;;  %s2881_s17 = sld [smem:[#allocation7 + $0x6d]] }
 0x146   : > { %v1205_v40 = vmul.f32 %v1204_v31, %v2738_v16 }
 0x147   : > { %v1162_v19 = vmul.f32 %v1161_v30, %v2711_v3 }
 0x148   : > { %727 = vrot.lane.b32.xlu0 %v725_v4, %s2237_s16  ;;  %639 = vrot.lane.b32.xlu1 %v637_v5, %s2236_s9 }
 0x14c   : > { %758 = vrot.lane.b32.xlu0 %v756_v21, %s2237_s16  ;;  %659 = vrot.lane.b32.xlu1 %v657_v8, %s2236_s9  ;;  %v1141_v21 = vstv %s1967_s26  ;;  %v847_v8 = vstv %s1940_s28  ;;  %s2816_s26 = sld [smem:[#allocation7 + $0x63]]  ;;  %s2818_s28 = sld [smem:[#allocation7 + $0x64]] }
 0x150   : > { %778 = vrot.lane.b32.xlu0 %v776_v12, %s2237_s16  ;;  %670 = vrot.lane.b32.xlu1 %v668_v13, %s2236_s9  ;;  %v1142_v12 = vmul.f32 %v1141_v21, %v2711_v3  ;;  %v848_v13 = vmul.f32 %v847_v8, %v2643_v42 }
 0x154   : > { %799 = vrot.lane.b32.xlu0 %v797_v17, %s2237_s16  ;;  %690 = vrot.lane.b32.xlu1 %v688_v18, %s2236_s9  ;;  %s2653_s9 = sld [smem:[#allocation7 + $0x58]] }
 0x158   : > { %819 = vrot.lane.b32.xlu0 %v817_v22, %s2237_s16  ;;  %716 = vrot.lane.b32.xlu1 %v714_v23, %s2237_s16  ;;  %v1225_v22 = vrot.slane %v2647_v27, 7  ;;  %v1184_v23 = vstv %s1971_s24  ;;  %s2837_s24 = sld [smem:[#allocation7 + $0x70]] }
 0x15a   : > { %v1075_v48 = vstv %s2653_s9  ;;  %v2756_v42 = vsel %vm1226_vm4, %v1225_v22, %v2647_v27  ;;  %v1086_v27 = vmul.f32 %v1085_v32, %v2663_v35  ;;  %s1970_s9 = sld [smem:[#allocation7 + $0x5e]] }
 0x15b   : > { %v1076_v56 = vmul.f32 %v1075_v48, %v2663_v35  ;;  %v2764_v34 = vmul.f32 %v2756_v42, %v2655_v29 }
 0x15c   : > { %840 = vrot.lane.b32.xlu0 %v838_v28, %s2237_s16  ;;  %737 = vrot.lane.b32.xlu1 %v735_v53, %s2237_s16  ;;  %v1185_v28 = vmul.f32 %v1184_v23, %v2738_v16  ;;  %v1066_v53 = vmul.f32 %v1065_v24, %v2663_v35  ;;  %v2784_v35 = vmul.f32 %v2756_v42, %v2679_v47  ;;  %v1314_v23 = vstv %s1983_s20  ;;  %s2979_s20 = sld [smem:[#allocation7 + $0x73]] }
 0x15d   : > { %v1232_v52 = vmul.f32 %v1231_v41, %v2764_v34  ;;  %v1194_v24 = vstv %s1972_s29  ;;  %s2981_s29 = sld [smem:[#allocation7 + $0x74]] }
 0x160   : > { %860 = vrot.lane.b32.xlu0 %v858_v38, %s2237_s16  ;;  %747 = vrot.lane.b32.xlu1 %v745_v39, %s2237_s16  ;;  %v1171_v30 = vstv %s1970_s9  ;;  %s2961_s9 = sld [smem:[#allocation7 + $0x6f]] }
 0x161   : > { %v1172_v22 = vmul.f32 %v1171_v30, %v2711_v3 }
 0x162   : > { %v2671_v43 = vpop.permute.xlu0 %386  ;;  %v2673_v44 = vpop.permute.xlu1 %375 }
 0x163   : > { %v377_v32 = vrot.slane %v2673_v44, 1 }
 0x164   : > { %1057 = vrot.lane.b32.xlu0 %v1055_v45, %s2238_s11  ;;  %768 = vrot.lane.b32.xlu1 %v766_v46, %s2237_s16  ;;  %v1108_v45 = vstv %s1964_s15  ;;  %s2916_s15 = sld [smem:[#allocation7 + $0x79]] }
 0x166   : > { %v2688_v54 = vpop.permute.xlu0 %406  ;;  %v2690_v55 = vpop.permute.xlu1 %396 }
 0x168   : > { %1078 = vrot.lane.b32.xlu0 %v1076_v56, %s2238_s11  ;;  %788 = vrot.lane.b32.xlu1 %v786_v57, %s2237_s16  ;;  %v1109_v56 = vmul.f32 %v1108_v45, %v2686_v50  ;;  %v1252_v57 = vstv %s1977_s0  ;;  %v2808_v50 = vmul.f32 %v2756_v42, %v2704_v0  ;;  %v2844_v45 = vmul.f32 %v2756_v42, %v2729_v14  ;;  %s2924_s0 = sld [smem:[#allocation7 + $0x6e]] }
 0x16a   : > { %v2696_v60 = vpop.permute.xlu0 %426  ;;  %v2698_v61 = vpop.permute.xlu1 %416  ;;  %v1315_v31 = vmul.f32 %v1314_v23, %v2808_v50 }
 0x16b   : > { %v418_v41 = vrot.slane %v2698_v61, 1 }
 0x16c   : > { %1101 = vrot.lane.b32.xlu0 %v1099_v62, %s2238_s11  ;;  %809 = vrot.lane.b32.xlu1 %v807_v63, %s2237_s16  ;;  %v1253_v63 = vmul.f32 %v1252_v57, %v2764_v34 }
 0x16d   : > { %v419_v42 = vsel %vm378_vm2, %v2698_v61, %v418_v41  ;;  %v388_v61 = vrot.slane %v2671_v43, 1  ;;  %v1283_v41 = vstv %s2839_s7  ;;  %s3045_s7 = sld [smem:[#allocation7 + $0x89]] }
 0x16e   : > { %v2713_v4 = vpop.permute.xlu0 %446  ;;  %v2715_v5 = vpop.permute.xlu1 %436 }
 0x170   : > { %1121 = vrot.lane.b32.xlu0 %v1119_v6, %s2238_s11  ;;  %829 = vrot.lane.b32.xlu1 %v827_v7, %s2237_s16  ;;  %v1151_v6 = vstv %s1968_s2  ;;  %s2943_s2 = sld [smem:[#allocation7 + $0x67]] }
 0x172   : > { %v2721_v9 = vpop.permute.xlu0 %466  ;;  %v2723_v11 = vpop.permute.xlu1 %456 }
 0x174   : > { %1144 = vrot.lane.b32.xlu0 %v1142_v12, %s2238_s11  ;;  %850 = vrot.lane.b32.xlu1 %v848_v13, %s2237_s16  ;;  %v1152_v12 = vmul.f32 %v1151_v6, %v2711_v3  ;;  %v1293_v13 = vstv %s1981_s4  ;;  %v1195_v3 = vmul.f32 %v1194_v24, %v2738_v16  ;;  %v458_v6 = vrot.slane %v2723_v11, 1  ;;  %s2959_s4 = sld [smem:[#allocation7 + $0x7a]] }
 0x175   : > { %v1262_v24 = vstv %s2830_s3  ;;  %s3039_s3 = sld [smem:[#allocation7 + $0x81]] }
 0x176   : > { %v2740_v17 = vpop.permute.xlu0 %486  ;;  %v2742_v18 = vpop.permute.xlu1 %476 }
 0x178   : > { %1164 = vrot.lane.b32.xlu0 %v1162_v19, %s2238_s11  ;;  %870 = vrot.lane.b32.xlu1 %v868_v20, %s2237_s16  ;;  %s1979_s16 = sld [smem:[#allocation7 + $0x61]]  ;;  %v1294_v20 = vmul.f32 %v1293_v13, %v2784_v35  ;;  %v1375_v13 = vstv %s2822_s6  ;;  %s3024_s6 = sld [smem:[#allocation7 + $0x7d]] }
 0x17a   : > { %v2749_v25 = vpop.permute.xlu0 %506  ;;  %v2751_v26 = vpop.permute.xlu1 %496 }
 0x17c   : > { %1187 = vrot.lane.b32.xlu0 %v1185_v28, %s2238_s11  ;;  %1068 = vrot.lane.b32.xlu1 %v1066_v53, %s2238_s11 }
 0x17e   : > { %v2766_v38 = vpop.permute.xlu0 %882  ;;  %v2768_v39 = vpop.permute.xlu1 %516  ;;  %v1273_v2 = vstv %s1979_s16  ;;  %s2939_s16 = sld [smem:[#allocation7 + $0x72]] }
 0x17f   : > { %v1274_v8 = vmul.f32 %v1273_v2, %v2784_v35  ;;  %v408_v2 = vrot.slane %v2688_v54, 1 }
 0x180   : > { %1207 = vrot.lane.b32.xlu0 %v1205_v40, %s2238_s11  ;;  %1088 = vrot.lane.b32.xlu1 %v1086_v27, %s2238_s11  ;;  %v1334_v40 = vstv %s2800_s10  ;;  %v1214_v27 = vstv %s2802_s12  ;;  %s2990_s10 = sld [smem:[#allocation7 + $0x7b]]  ;;  %s2992_s12 = sld [smem:[#allocation7 + $0x7c]] }
 0x181   : > { %v1335_v57 = vmul.f32 %v1334_v40, %v2808_v50  ;;  %v1215_v58 = vmul.f32 %v1214_v27, %v2738_v16  ;;  %v498_v16 = vrot.slane %v2751_v26, 1  ;;  %v1376_v40 = vmul.f32 %v1375_v13, %v2844_v45 }
 0x182   : > { %v2774_v46 = vpop.permute.xlu0 %902  ;;  %v2776_v48 = vpop.permute.xlu1 %526  ;;  %v1395_v27 = vstv %s2837_s24  ;;  %v508_v13 = vrot.slane %v2749_v25, 1  ;;  %s3043_s24 = sld [smem:[#allocation7 + $0x76]] }
 0x184   : > { %1234 = vrot.lane.b32.xlu0 %v1232_v52, %s2239_s19  ;;  %1111 = vrot.lane.b32.xlu1 %v1109_v56, %s2238_s11 }
 0x186   : > { %v2786_v59 = vpop.permute.xlu0 %924  ;;  %v2788_v62 = vpop.permute.xlu1 %892 }
 0x188   : > { %1255 = vrot.lane.b32.xlu0 %v1253_v63, %s2239_s19  ;;  %1131 = vrot.lane.b32.xlu1 %v1129_v1, %s2238_s11  ;;  %v1355_v63 = vstv %s2816_s26  ;;  %v379_v1 = vsel %vm378_vm2, %v2673_v44, %v377_v32  ;;  %s2998_s26 = sld [smem:[#allocation7 + $0x80]] }
 0x189   : > { %v381_v30 = vadd.f32 %v379_v1, %v2570_v37  ;;  %v488_v37 = vrot.slane %v2740_v17, 1 }
 0x18a   : > { %v2794_v7 = vpop.permute.xlu0 %944  ;;  %v2796_v21 = vpop.permute.xlu1 %912 }
 0x18b   : > { %v421_v32 = vadd.f32 %v419_v42, %v381_v30  ;;  %v389_v42 = vsel %vm378_vm2, %v2671_v43, %v388_v61 }
 0x18c   : > { %1276 = vrot.lane.b32.xlu0 %v1274_v8, %s2239_s19  ;;  %1154 = vrot.lane.b32.xlu1 %v1152_v12, %s2238_s11  ;;  %v1242_v8 = vstv %s2818_s28  ;;  %v448_v12 = vrot.slane %v2713_v4, 1  ;;  %s3006_s28 = sld [smem:[#allocation7 + $0x75]] }
 0x18d   : > { %v1243_v23 = vmul.f32 %v1242_v8, %v2764_v34  ;;  %v1263_v8 = vmul.f32 %v1262_v24, %v2764_v34  ;;  %v1396_v34 = vmul.f32 %v1395_v27, %v2655_v29 }
 0x18e   : > { %v2810_v15 = vpop.permute.xlu0 %966  ;;  %v2812_v19 = vpop.permute.xlu1 %934 }
 0x190   : > { %1296 = vrot.lane.b32.xlu0 %v1294_v20, %s2239_s19  ;;  %1174 = vrot.lane.b32.xlu1 %v1172_v22, %s2238_s11  ;;  %v1356_v22 = vmul.f32 %v1355_v63, %v2844_v45 }
 0x192   : > { %v2824_v28 = vpop.permute.xlu0 %986  ;;  %v2826_v53 = vpop.permute.xlu1 %954 }
 0x194   : > { %1317 = vrot.lane.b32.xlu0 %v1315_v31, %s2239_s19  ;;  %1197 = vrot.lane.b32.xlu1 %v1195_v3, %s2238_s11  ;;  %v409_v31 = vsel %vm378_vm2, %v2688_v54, %v408_v2  ;;  %v459_v3 = vsel %vm378_vm2, %v2723_v11, %v458_v6  ;;  %v428_v54 = vrot.slane %v2696_v60, 1  ;;  %v449_v11 = vsel %vm378_vm2, %v2713_v4, %v448_v12 }
 0x195   : > { %v411_v63 = vadd.f32 %v409_v31, %v2581_v51  ;;  %v461_v1 = vadd.f32 %v459_v3, %v421_v32  ;;  %v468_v4 = vrot.slane %v2721_v9, 1  ;;  %v1303_v32 = vstv %s2881_s17  ;;  %s3051_s17 = sld [smem:[#allocation7 + $0x82]] }
 0x196   : > { %v2846_v52 = vpop.permute.xlu0 %1008  ;;  %v2848_v56 = vpop.permute.xlu1 %976  ;;  %v429_v43 = vsel %vm378_vm2, %v2696_v60, %v428_v54  ;;  %v1284_v60 = vmul.f32 %v1283_v41, %v2784_v35  ;;  %v509_v41 = vsel %vm378_vm2, %v2749_v25, %v508_v13  ;;  %v1324_v25 = vstv %s2905_s27  ;;  %s3067_s27 = sld [smem:[#allocation7 + $0x8a]] }
 0x198   : > { %1337 = vrot.lane.b32.xlu0 %v1335_v57, %s2239_s19  ;;  %1217 = vrot.lane.b32.xlu1 %v1215_v58, %s2238_s11  ;;  %s2879_s11 = sld [smem:[#allocation7 + $0x78]]  ;;  %v499_v57 = vsel %vm378_vm2, %v2751_v26, %v498_v16  ;;  %v528_v58 = vrot.slane %v2776_v48, 1  ;;  %v489_v26 = vsel %vm378_vm2, %v2740_v17, %v488_v37  ;;  %v451_v16 = vadd.f32 %v449_v11, %v411_v63 }
 0x199   : > { %v501_v51 = vadd.f32 %v499_v57, %v461_v1  ;;  %v1436_v11 = vstv %s2894_s23  ;;  %s3055_s23 = sld [smem:[#allocation7 + $0x77]] }
 0x19a   : > { %v2866_v44 = vpop.permute.xlu0 %1028  ;;  %v2868_v20 = vpop.permute.xlu1 %996  ;;  %v529_v17 = vsel %vm378_vm2, %v2776_v48, %v528_v58  ;;  %v469_v48 = vsel %vm378_vm2, %v2721_v9, %v468_v4 }
 0x19c   : > { %1358 = vrot.lane.b32.xlu0 %v1356_v22, %s2239_s19  ;;  %1245 = vrot.lane.b32.xlu1 %v1243_v23, %s2239_s19  ;;  %v391_v22 = vadd.f32 %v389_v42, %v2567_v33  ;;  %v491_v23 = vadd.f32 %v489_v26, %v451_v16  ;;  %v398_v33 = vrot.slane %v2690_v55, 1 }
 0x19e   : > { %v547_v2 = vpop.permute.xlu0 %546  ;;  %v2897_v6 = vpop.permute.xlu1 %1018  ;;  %v1416_v37 = vstv %s2879_s11  ;;  %v531_v27 = vadd.f32 %v529_v17, %v491_v23  ;;  %v1437_v17 = vmul.f32 %v1436_v11, %v2679_v47  ;;  %s3049_s11 = sld [smem:[#allocation7 + $0x7e]] }
 0x19f   : > { %v548_v12 = vrot.slane %v547_v2, 1  ;;  %v1417_v1 = vmul.f32 %v1416_v37, %v2655_v29 }
 0x1a0   : > { %1378 = vrot.lane.b32.xlu0 %v1376_v40, %s2239_s19  ;;  %1265 = vrot.lane.b32.xlu1 %v1263_v8, %s2239_s19  ;;  %v431_v40 = vadd.f32 %v429_v43, %v391_v22  ;;  %v438_v8 = vrot.slane %v2715_v5, 1  ;;  %v1344_v22 = vstv %s2924_s0  ;;  %s2241_s0 = smov 94  }
 0x1a1   : > { %v550_v30 = vsel %vm549_vm5, %v547_v2, %v548_v12  ;;  %v1304_v2 = vmul.f32 %v1303_v32, %v2784_v35  ;;  %v399_v12 = vsel %vm378_vm2, %v2690_v55, %v398_v33  ;;  %v478_v35 = vrot.slane %v2742_v18, 1 }
 0x1a2   : > { %v2919_v24 = vadd.f32 %v550_v30, %v501_v51  ;;  %v578_v61 = vpop.permute.xlu0 %577  ;;  %v2921_v31 = vpop.permute.xlu1 %1038  ;;  %v471_v9 = vadd.f32 %v469_v48, %v431_v40  ;;  %v1456_v51 = vstv %s2916_s15  ;;  %v1325_v30 = vmul.f32 %v1324_v25, %v2808_v50  ;;  %s3069_s15 = sld [smem:[#allocation7 + $0x7f]] }
 0x1a3   : > { %v579_v3 = vrot.slane %v578_v61, 1  ;;  %v439_v23 = vsel %vm378_vm2, %v2715_v5, %v438_v8  ;;  %v401_v48 = vadd.f32 %v399_v12, %v2583_v49  ;;  %v479_v5 = vsel %vm378_vm2, %v2742_v18, %v478_v35 }
 0x1a4   : > { %1398 = vrot.lane.b32.xlu0 %v1396_v34, %s2240_s1  ;;  %1286 = vrot.lane.b32.xlu1 %v1284_v60, %s2239_s19  ;;  %v511_v26 = vadd.f32 %v509_v41, %v471_v9  ;;  %v1345_v49 = vmul.f32 %v1344_v22, %v2808_v50  ;;  %v1476_v9 = vstv %s2939_s16  ;;  %v1496_v25 = vstv %s2959_s4  ;;  %s3075_s16 = sld [smem:[#allocation7 + $0x83]] }
 0x1a5   : > { %v580_v54 = vsel %vm549_vm5, %v578_v61, %v579_v3  ;;  %v518_v61 = vrot.slane %v2768_v39, 1  ;;  %v441_v40 = vadd.f32 %v439_v23, %v401_v48  ;;  %s3091_s4 = sld [smem:[#allocation7 + $0x8b]] }
 0x1a6   : > { %v582_v57 = vadd.f32 %v580_v54, %v531_v27  ;;  %v599_v58 = vpop.permute.xlu0 %598  ;;  %v558_v63 = vpop.permute.xlu1 %557  ;;  %v1457_v54 = vmul.f32 %v1456_v51, %v2679_v47  ;;  %v1557_v51 = vrot.slane %v2665_v36, 7 }
 0x1a7   : > { %v600_v42 = vrot.slane %v599_v58, 1  ;;  %v559_v4 = vrot.slane %v558_v63, 1  ;;  %v519_v11 = vsel %vm378_vm2, %v2768_v39, %v518_v61  ;;  %v481_v18 = vadd.f32 %v479_v5, %v441_v40 }
 0x1a8   : > { %1419 = vrot.lane.b32.xlu0 %v1417_v1, %s2240_s1  ;;  %1306 = vrot.lane.b32.xlu1 %v1304_v2, %s2239_s19  ;;  %v1477_v39 = vmul.f32 %v1476_v9, %v2704_v0  ;;  %v1516_v61 = vstv %s2979_s20  ;;  %s3153_s20 = sld [smem:[#allocation7 + $0x85]] }
 0x1a9   : > { %v560_v16 = vsel %vm549_vm5, %v558_v63, %v559_v4  ;;  %v601_v55 = vsel %vm549_vm5, %v599_v58, %v600_v42  ;;  %v1365_v58 = vstv %s2943_s2  ;;  %v521_v50 = vadd.f32 %v519_v11, %v481_v18  ;;  %s3077_s2 = sld [smem:[#allocation7 + $0x84]] }
 0x1aa   : > { %v562_v34 = vadd.f32 %v560_v16, %v511_v26  ;;  %v619_v43 = vpop.permute.xlu0 %618  ;;  %v568_v13 = vpop.permute.xlu1 %567  ;;  %v1366_v8 = vmul.f32 %v1365_v58, %v2844_v45  ;;  %v1385_v26 = vstv %s2961_s9  ;;  %v1426_v11 = vstv %s2992_s12  ;;  %s3128_s9 = sld [smem:[#allocation7 + $0x8c]]  ;;  %s3195_s12 = sld [smem:[#allocation7 + $0x87]] }
 0x1ab   : > { %v620_v60 = vrot.slane %v619_v43, 1  ;;  %v569_v32 = vrot.slane %v568_v13, 1  ;;  %v1563_v18 = vstv %s2998_s26  ;;  %s3204_s26 = sld [smem:[#allocation7 + $0x8f]] }
 0x1ac   : > { %1439 = vrot.lane.b32.xlu0 %v1437_v17, %s2240_s1  ;;  %1327 = vrot.lane.b32.xlu1 %v1325_v30, %s2239_s19  ;;  %v2966_v3 = vadd.f32 %v601_v55, %v562_v34  ;;  %v1497_v17 = vmul.f32 %v1496_v25, %v2704_v0  ;;  %v1386_v30 = vmul.f32 %v1385_v26, %v2844_v45  ;;  %v1406_v55 = vstv %s2981_s29  ;;  %s3183_s29 = sld [smem:[#allocation7 + $0x86]] }
 0x1ad   : > { %v621_v37 = vsel %vm549_vm5, %v619_v43, %v620_v60  ;;  %v3016_v45 = vsel %vm1558_vm6, %v1557_v51, %v2665_v36  ;;  %v1446_v25 = vstv %s3006_s28  ;;  %s3486_s28 = smov 17  }
 0x1ae   : > { %v2971_v27 = vadd.f32 %v621_v37, %v582_v57  ;;  %v650_v33 = vpop.permute.xlu0 %649  ;;  %v589_v41 = vpop.permute.xlu1 %588  ;;  %v570_v57 = vsel %vm549_vm5, %v568_v13, %v569_v32  ;;  %v3030_v36 = vmul.f32 %v3016_v45, %v2655_v29  ;;  %v1447_v51 = vmul.f32 %v1446_v25, %v2679_v47 }
 0x1af   : > { %v590_v63 = vrot.slane %v589_v41, 1  ;;  %v651_v42 = vrot.slane %v650_v33, 1  ;;  %v572_v12 = vadd.f32 %v570_v57, %v521_v50  ;;  %v1574_v25 = vstv %s3077_s2 }
 0x1b0   : > { %1459 = vrot.lane.b32.xlu0 %v1457_v54, %s2240_s1  ;;  %1347 = vrot.lane.b32.xlu1 %v1345_v49, %s2239_s19  ;;  %v1536_v49 = vstv %s2990_s10  ;;  %s3190_s10 = sld [smem:[#allocation7 + $0x8e]] }
 0x1b1   : > { %v591_v35 = vsel %vm549_vm5, %v589_v41, %v590_v63  ;;  %v652_v22 = vsel %vm549_vm5, %v650_v33, %v651_v42  ;;  %v1517_v33 = vmul.f32 %v1516_v61, %v2729_v14 }
 0x1b2   : > { %v681_v1 = vpop.permute.xlu0 %680  ;;  %v609_v2 = vpop.permute.xlu1 %608  ;;  %v593_v60 = vadd.f32 %v591_v35, %v2919_v24  ;;  %v1407_v24 = vmul.f32 %v1406_v55, %v2655_v29 }
 0x1b3   : > { %v610_v4 = vrot.slane %v609_v2, 1  ;;  %v682_v41 = vrot.slane %v681_v1, 1 }
 0x1b4   : > { %1479 = vrot.lane.b32.xlu0 %v1477_v39, %s2240_s1  ;;  %1368 = vrot.lane.b32.xlu1 %v1366_v8, %s2239_s19  ;;  %v1427_v39 = vmul.f32 %v1426_v11, %v2655_v29  ;;  %v1526_v11 = vstv %s3055_s23 }
 0x1b5   : > { %v611_v16 = vsel %vm549_vm5, %v609_v2, %v610_v4  ;;  %v1537_v2 = vmul.f32 %v1536_v49, %v2729_v14  ;;  %v683_v8 = vsel %vm549_vm5, %v681_v1, %v682_v41  ;;  %v1625_v41 = vstv %s3045_s7 }
 0x1b6   : > { %v613_v34 = vadd.f32 %v611_v16, %v572_v12  ;;  %v701_v43 = vpop.permute.xlu0 %700  ;;  %v630_v13 = vpop.permute.xlu1 %629  ;;  %v1564_v16 = vmul.f32 %v1563_v18, %v3030_v36  ;;  %v1646_v49 = vstv %s3051_s17  ;;  %s2242_s17 = smov [#allocation8]  }
 0x1b7   : > { %v631_v23 = vrot.slane %v630_v13, 1  ;;  %v702_v42 = vrot.slane %v701_v43, 1  ;;  %s2157_s23 = sshll.u32 %s2242_s17, 4  ;;  %s2158_s23 = int_to_ptr.vmem [resolvable:$false] %s2157_s23 }
 0x1b8   : > { %1499 = vrot.lane.b32.xlu0 %v1497_v17, %s2240_s1  ;;  %1388 = vrot.lane.b32.xlu1 %v1386_v30, %s2239_s19  ;;  %v3011_v48 = vadd.f32 %v652_v22, %v613_v34  ;;  %s3022_s19 = sld [smem:[#allocation7 + $0x88]]  ;;  %v1466_v22 = vstv %s3024_s6  ;;  %s1786_s6 = sshll.u32 %s2428_s14, 4  ;;  %s3397_s6 = int_to_ptr.vmem [resolvable:$true] %s1786_s6 }
 0x1b9   : > { %v632_v5 = vsel %vm549_vm5, %v630_v13, %v631_v23  ;;  %v703_v13 = vsel %vm549_vm5, %v701_v43, %v702_v42  ;;  %v3082_v23 = vmul.f32 %v3016_v45, %v2679_v47  ;;  %v1546_v42 = vstv %s3069_s15  ;;  %p2160_p0 = scmp.lt.s32.totalorder %s3397_s6, %s2158_s23 }
 0x1ba   : > { %v634_v37 = vadd.f32 %v632_v5, %v593_v60  ;;  %v728_v32 = vpop.permute.xlu0 %727  ;;  %v640_v40 = vpop.permute.xlu1 %639 }
 0x1bb   : > { %v641_v54 = vrot.slane %v640_v40, 1  ;;  %v729_v9 = vrot.slane %v728_v32, 1 }
 0x1bc   : > { %1519 = vrot.lane.b32.xlu0 %v1517_v33, %s2240_s1  ;;  %1409 = vrot.lane.b32.xlu1 %v1407_v24, %s2240_s1  ;;  %v1605_v33 = vstv %s3039_s3  ;;  %v1486_v24 = vstv %s3043_s24 }
 0x1bd   : > { %v642_v58 = vsel %vm549_vm5, %v640_v40, %v641_v54  ;;  %v730_v29 = vsel %vm719_vm7, %v728_v32, %v729_v9  ;;  %v1467_v32 = vmul.f32 %v1466_v22, %v2679_v47  ;;  %v1506_v54 = vstv %s3049_s11  ;;  %s2153_s11 = scalar_lea.vmem %s3397_s6, 256 }
 0x1be   : > { %v644_v57 = vadd.f32 %v642_v58, %v2966_v3  ;;  %v3035_v63 = vpop.permute.xlu0 %758  ;;  %v660_v50 = vpop.permute.xlu1 %659  ;;  %v1584_v30 = vstv %s3022_s19  ;;  %v3099_v47 = vmul.f32 %v3016_v45, %v2704_v0  ;;  %s2033_s19 = sshll.u32 %s2294_s22, 8  ;;  %s1772_s22 = scalar_lea.sflag [#allocation5], %s2405_s8 }
 0x1bf   : > { %v661_v4 = vrot.slane %v660_v50, 1  ;;  %v1585_v5 = vmul.f32 %v1584_v30, %v3030_v36  ;;  %s3395_s7 = scalar_lea.hbm %s3448_s5, %s2033_s19  ;;  %p2154_p8 = scmp.ne.s32.totalorder %s3397_s6, %s2153_s11 }
 0x1c0   : > { %v685_v26 = vadd.f32 %v683_v8, %v644_v57  ;;  %1539 = vrot.lane.b32.xlu0 %v1537_v2, %s2240_s1  ;;  %1429 = vrot.lane.b32.xlu1 %v1427_v39, %s2240_s1  ;;  %v1606_v57 = vmul.f32 %v1605_v33, %v3082_v23  ;;  %v760_v2 = vrot.slane %v3035_v63, 1  ;;  %v1666_v8 = vstv %s3067_s27  ;;  %s2159_s27 = scalar_lea.vmem %s2158_s23, 512 }
 0x1c1   : > { %v662_v3 = vsel %vm549_vm5, %v660_v50, %v661_v4  ;;  %v1487_v50 = vmul.f32 %v1486_v24, %v2704_v0  ;;  %v1687_v4 = vstv %s3075_s16  ;;  %v926_v24 = vrot.slane %v2786_v59, 7  ;;  %p2155_p13 = pnand %p2154_p8, %p3489_p11  ;;  %p2161_p3 = scmp.lt.s32.totalorder %s2159_s27, %s2153_s11 }
 0x1c2   : > { %v664_v1 = vadd.f32 %v662_v3, %v2971_v27  ;;  %v3058_v12 = vpop.permute.xlu0 %778  ;;  %v671_v35 = vpop.permute.xlu1 %670  ;;  %v3062_v34 = vadd.f32 %v730_v29, %v685_v26  ;;  %v1626_v3 = vmul.f32 %v1625_v41, %v3082_v23  ;;  %v761_v30 = vsel %vm719_vm7, %v3035_v63, %v760_v2 }
 0x1c3   : > { %v672_v17 = vrot.slane %v671_v35, 1  ;;  %p2156_p7 = pneg %p2155_p13  ;;  %p2162_p12 = por %p2161_p3, %p2160_p0 }
 0x1c4   : > { %1566 = vrot.lane.b32.xlu0 %v1564_v16, %s2241_s0  ;;  %1449 = vrot.lane.b32.xlu1 %v1447_v51, %s2240_s1  ;;  %v3073_v27 = vadd.f32 %v703_v13, %v664_v1  ;;  %v1507_v51 = vmul.f32 %v1506_v54, %v2704_v0  ;;  %v1647_v13 = vmul.f32 %v1646_v49, %v3099_v47 }
 0x1c5   : > { %v673_v43 = vsel %vm549_vm5, %v671_v35, %v672_v17  ;;  %v1527_v17 = vmul.f32 %v1526_v11, %v2729_v14  ;;  %v1547_v0 = vmul.f32 %v1546_v42, %v2729_v14  ;;  %v968_v42 = vrot.slane %v2810_v15, 7  ;;  %p2163_p5 = pnand %p2162_p12, %p2156_p7 }
 0x1c6   : > { %v675_v61 = vadd.f32 %v673_v43, %v634_v37  ;;  %v800_v55 = vpop.permute.xlu0 %799  ;;  %v691_v60 = vpop.permute.xlu1 %690 }
 0x1c7   : > { %v692_v40 = vrot.slane %v691_v60, 1  ;;  %v801_v26 = vrot.slane %v800_v55, 1 }
 0x1c8   : > { %1587 = vrot.lane.b32.xlu0 %v1585_v5, %s2241_s0  ;;  %1469 = vrot.lane.b32.xlu1 %v1467_v32, %s2240_s1  ;;  %v1707_v5 = vstv %s3091_s4  ;;  %v884_v32 = vrot.slane %v2766_v38, 7 }
 0x1c9   : > { %v693_v37 = vsel %vm549_vm5, %v691_v60, %v692_v40  ;;  %v802_v63 = vsel %vm719_vm7, %v800_v55, %v801_v26  ;;  %v904_v55 = vrot.slane %v2774_v46, 7  ;;  %v927_v26 = vsel %vm294_vm0, %v926_v24, %v2786_v59 }
 0x1ca   : > { %v695_v9 = vadd.f32 %v693_v37, %v3011_v48  ;;  %v820_v58 = vpop.permute.xlu0 %819  ;;  %v717_v18 = vpop.permute.xlu1 %716  ;;  %v3113_v48 = vmul.f32 %v3016_v45, %v2729_v14  ;;  %v780_v45 = vrot.slane %v3058_v12, 1 }
 0x1cb   : > { %v718_v39 = vrot.slane %v717_v18, 1  ;;  %v821_v40 = vrot.slane %v820_v58, 1 }
 0x1cc   : > { %1608 = vrot.lane.b32.xlu0 %v1606_v57, %s2241_s0  ;;  %1489 = vrot.lane.b32.xlu1 %v1487_v50, %s2240_s1  ;;  %v1688_v11 = vmul.f32 %v1687_v4, %v3113_v48  ;;  %v781_v14 = vsel %vm719_vm7, %v3058_v12, %v780_v45  ;;  %v988_v45 = vrot.slane %v2824_v28, 7 }
 0x1cd   : > { %v720_v29 = vsel %vm719_vm7, %v717_v18, %v718_v39  ;;  %v822_v12 = vsel %vm719_vm7, %v820_v58, %v821_v40  ;;  %v905_v58 = vsel %vm294_vm0, %v904_v55, %v2774_v46 }
 0x1ce   : > { %v722_v1 = vadd.f32 %v720_v29, %v675_v61  ;;  %v841_v35 = vpop.permute.xlu0 %840  ;;  %v738_v16 = vpop.permute.xlu1 %737  ;;  %v1667_v61 = vmul.f32 %v1666_v8, %v3099_v47  ;;  %v885_v8 = vsel %vm294_vm0, %v884_v32, %v2766_v38  ;;  %v1010_v38 = vrot.slane %v2846_v52, 7 }
 0x1cf   : > { %v842_v22 = vrot.slane %v841_v35, 1  ;;  %v739_v43 = vrot.slane %v738_v16, 1 }
 0x1d0   : > { %v763_v60 = vadd.f32 %v761_v30, %v722_v1  ;;  %1628 = vrot.lane.b32.xlu0 %v1626_v3, %s2241_s0  ;;  %1509 = vrot.lane.b32.xlu1 %v1507_v51, %s2240_s1  ;;  %v969_v30 = vsel %vm294_vm0, %v968_v42, %v2810_v15  ;;  %v1030_v15 = vrot.slane %v2866_v44, 7 }
 0x1d1   : > { %v740_v33 = vsel %vm719_vm7, %v738_v16, %v739_v43  ;;  %v843_v18 = vsel %vm719_vm7, %v841_v35, %v842_v22 }
 0x1d2   : > { %v804_v41 = vadd.f32 %v802_v63, %v763_v60  ;;  %v742_v37 = vadd.f32 %v740_v33, %v695_v9  ;;  %v861_v54 = vpop.permute.xlu0 %860  ;;  %v748_v49 = vpop.permute.xlu1 %747  ;;  %v1575_v9 = vmul.f32 %v1574_v25, %v3030_v36  ;;  %v946_v25 = vrot.slane %v2794_v7, 7 }
 0x1d3   : > { %v862_v57 = vrot.slane %v861_v54, 1  ;;  %v749_v50 = vrot.slane %v748_v49, 1  ;;  %v1031_v55 = vsel %vm294_vm0, %v1030_v15, %v2866_v44 }
 0x1d4   : > { %v845_v2 = vadd.f32 %v843_v18, %v804_v41  ;;  %v783_v39 = vadd.f32 %v781_v14, %v742_v37  ;;  %1649 = vrot.lane.b32.xlu0 %v1647_v13, %s2241_s0  ;;  %1529 = vrot.lane.b32.xlu1 %v1527_v17, %s2240_s1 }
 0x1d5   : > { %v750_v4 = vsel %vm719_vm7, %v748_v49, %v749_v50  ;;  %v863_v51 = vsel %vm719_vm7, %v861_v54, %v862_v57 }
 0x1d6   : > { %v887_v29 = vadd.f32 %v885_v8, %v845_v2  ;;  %v824_v3 = vadd.f32 %v822_v12, %v783_v39  ;;  %v752_v1 = vadd.f32 %v750_v4, %v3073_v27  ;;  %v1058_v35 = vpop.permute.xlu0 %1057  ;;  %v769_v16 = vpop.permute.xlu1 %768  ;;  %v1594_v27 = vstv %s3128_s9 }
 0x1d7   : > { %v770_v13 = vrot.slane %v769_v16, 1  ;;  %v1059_v22 = vrot.slane %v1058_v35, 7  ;;  %v1615_v39 = vstv %s3153_s20 }
 0x1d8   : > { %v929_v59 = vadd.f32 %v927_v26, %v887_v29  ;;  %v865_v17 = vadd.f32 %v863_v51, %v824_v3  ;;  %1669 = vrot.lane.b32.xlu0 %v1667_v61, %s2241_s0  ;;  %1549 = vrot.lane.b32.xlu1 %v1547_v0, %s2240_s1  ;;  %v947_v61 = vsel %vm294_vm0, %v946_v25, %v2794_v7  ;;  %s3170_s1 = sld [smem:[#allocation7 + $0x8d]] }
 0x1d9   : > { %v771_v43 = vsel %vm719_vm7, %v769_v16, %v770_v13  ;;  %v1011_v0 = vsel %vm294_vm0, %v1010_v38, %v2846_v52  ;;  %v989_v7 = vsel %vm294_vm0, %v988_v45, %v2824_v28  ;;  %v1061_v37 = vsel %vm1060_vm8, %v1059_v22, %v1058_v35 }
 0x1da   : > { %v907_v60 = vadd.f32 %v905_v58, %v865_v17  ;;  %v971_v32 = vadd.f32 %v969_v30, %v929_v59  ;;  %v773_v46 = vadd.f32 %v771_v43, %v3062_v34  ;;  %v1079_v63 = vpop.permute.xlu0 %1078  ;;  %v789_v40 = vpop.permute.xlu1 %788  ;;  %v1708_v34 = vmul.f32 %v1707_v5, %v3113_v48 }
 0x1db   : > { %v790_v33 = vrot.slane %v789_v40, 1  ;;  %v1080_v52 = vrot.slane %v1079_v63, 7  ;;  %v1616_v29 = vmul.f32 %v1615_v39, %v3082_v23  ;;  %v894_v17 = vrot.slane %v2788_v62, 7 }
 0x1dc   : > { %v949_v24 = vadd.f32 %v947_v61, %v907_v60  ;;  %v1013_v41 = vadd.f32 %v1011_v0, %v971_v32  ;;  %1690 = vrot.lane.b32.xlu0 %v1688_v11, %s2241_s0  ;;  %1577 = vrot.lane.b32.xlu1 %v1575_v9, %s2241_s0  ;;  %v1595_v11 = vmul.f32 %v1594_v27, %v3030_v36  ;;  %v1656_v45 = vstv %s3183_s29 }
 0x1dd   : > { %v791_v54 = vsel %vm719_vm7, %v789_v40, %v790_v33  ;;  %v1081_v9 = vsel %vm1060_vm8, %v1080_v52, %v1079_v63  ;;  %v936_v22 = vrot.slane %v2812_v19, 7  ;;  %v1676_v32 = vstv %s3190_s10 }
 0x1de   : > { %v1063_v49 = vadd.f32 %v1061_v37, %v1013_v41  ;;  %v991_v14 = vadd.f32 %v989_v7, %v949_v24  ;;  %v793_v18 = vadd.f32 %v791_v54, %v752_v1  ;;  %v1102_v57 = vpop.permute.xlu0 %1101  ;;  %v810_v50 = vpop.permute.xlu1 %809  ;;  %v1635_v35 = vstv %s3170_s1 }
 0x1df   : > { %v1103_v2 = vrot.slane %v1102_v57, 7  ;;  %v811_v5 = vrot.slane %v810_v50, 1  ;;  %v1636_v59 = vmul.f32 %v1635_v35, %v3082_v23  ;;  %v1657_v0 = vmul.f32 %v1656_v45, %v3099_v47 }
 0x1e0   : > { %v1033_v28 = vadd.f32 %v1031_v55, %v991_v14  ;;  %1710 = vrot.lane.b32.xlu0 %v1708_v34, %s2241_s0  ;;  %1597 = vrot.lane.b32.xlu1 %v1595_v11, %s2241_s0  ;;  %v895_v15 = vsel %vm294_vm0, %v894_v17, %v2788_v62  ;;  %v978_v33 = vrot.slane %v2848_v56, 7  ;;  %v937_v34 = vsel %vm294_vm0, %v936_v22, %v2812_v19 }
 0x1e1   : > { %v1104_v8 = vsel %vm1060_vm8, %v1103_v2, %v1102_v57  ;;  %v812_v36 = vsel %vm719_vm7, %v810_v50, %v811_v5  ;;  %v1677_v37 = vmul.f32 %v1676_v32, %v3099_v47  ;;  %v1697_v52 = vstv %s3195_s12 }
 0x1e2   : > { %v1083_v44 = vadd.f32 %v1081_v9, %v1033_v28  ;;  %v1106_v42 = vadd.f32 %v1104_v8, %v1063_v49  ;;  %v814_v12 = vadd.f32 %v812_v36, %v773_v46  ;;  %v1122_v4 = vpop.permute.xlu0 %1121  ;;  %v830_v26 = vpop.permute.xlu1 %829  ;;  %v914_v46 = vrot.slane %v2796_v21, 7 }
 0x1e3   : > { %v1123_v3 = vrot.slane %v1122_v4, 7  ;;  %v831_v1 = vrot.slane %v830_v26, 1  ;;  %v956_v54 = vrot.slane %v2826_v53, 7  ;;  %v1020_v49 = vrot.slane %v2897_v6, 7 }
 0x1e4   : > { %1618 = vrot.lane.b32.xlu1 %v1616_v29, %s2241_s0  ;;  %v979_v47 = vsel %vm294_vm0, %v978_v33, %v2848_v56  ;;  %v998_v2 = vrot.slane %v2868_v20, 7  ;;  %v1717_v8 = vstv %s3204_s26 }
 0x1e5   : > { %v1124_v16 = vsel %vm1060_vm8, %v1123_v3, %v1122_v4  ;;  %v832_v25 = vsel %vm719_vm7, %v830_v26, %v831_v1  ;;  %v1021_v36 = vsel %vm294_vm0, %v1020_v49, %v2897_v6  ;;  %v1698_v3 = vmul.f32 %v1697_v52, %v3113_v48 }
 0x1e6   : > { %v1126_v38 = vadd.f32 %v1124_v16, %v1083_v44  ;;  %v834_v51 = vadd.f32 %v832_v25, %v793_v18  ;;  %v1145_v13 = vpop.permute.xlu0 %1144  ;;  %v851_v58 = vpop.permute.xlu1 %850  ;;  %v915_v18 = vsel %vm294_vm0, %v914_v46, %v2796_v21  ;;  %v957_v21 = vsel %vm294_vm0, %v956_v54, %v2826_v53 }
 0x1e7   : > { %v1146_v27 = vrot.slane %v1145_v13, 7  ;;  %v852_v30 = vrot.slane %v851_v58, 1  ;;  %v1040_v44 = vrot.slane %v2921_v31, 7  ;;  %v999_v1 = vsel %vm294_vm0, %v998_v2, %v2868_v20 }
 0x1e8   : > { %1638 = vrot.lane.b32.xlu1 %v1636_v59, %s2241_s0  ;;  %v1718_v20 = vmul.f32 %v1717_v8, %v3113_v48 }
 0x1e9   : > { %v1147_v43 = vsel %vm1060_vm8, %v1146_v27, %v1145_v13  ;;  %v853_v60 = vsel %vm719_vm7, %v851_v58, %v852_v30 }
 0x1ea   : > { %v1149_v23 = vadd.f32 %v1147_v43, %v1106_v42  ;;  %v855_v63 = vadd.f32 %v853_v60, %v814_v12  ;;  %v1165_v40 = vpop.permute.xlu0 %1164  ;;  %v871_v61 = vpop.permute.xlu1 %870 }
 0x1eb   : > { %v1166_v24 = vrot.slane %v1165_v40, 7  ;;  %v872_v41 = vrot.slane %v871_v61, 1 }
 0x1ec   : > { %v897_v7 = vadd.f32 %v895_v15, %v855_v63  ;;  %1659 = vrot.lane.b32.xlu1 %v1657_v0, %s2241_s0 }
 0x1ed   : > { %v1167_v62 = vsel %vm1060_vm8, %v1166_v24, %v1165_v40  ;;  %v873_v14 = vsel %vm719_vm7, %v871_v61, %v872_v41 }
 0x1ee   : > { %v939_v57 = vadd.f32 %v937_v34, %v897_v7  ;;  %v1169_v19 = vadd.f32 %v1167_v62, %v1126_v38  ;;  %v875_v50 = vadd.f32 %v873_v14, %v834_v51  ;;  %v1188_v11 = vpop.permute.xlu0 %1187  ;;  %v1069_v55 = vpop.permute.xlu1 %1068  ;;  %v1041_v38 = vsel %vm294_vm0, %v1040_v44, %v2921_v31 }
 0x1ef   : > { %v1189_v5 = vrot.slane %v1188_v11, 7  ;;  %v1070_v39 = vrot.slane %v1069_v55, 7 }
 0x1f0   : > { %v917_v28 = vadd.f32 %v915_v18, %v875_v50  ;;  %v981_v9 = vadd.f32 %v979_v47, %v939_v57  ;;  %1679 = vrot.lane.b32.xlu1 %v1677_v37, %s2241_s0 }
 0x1f1   : > { %v1190_v42 = vsel %vm1060_vm8, %v1189_v5, %v1188_v11  ;;  %v1071_v35 = vsel %vm1060_vm8, %v1070_v39, %v1069_v55 }
 0x1f2   : > { %v959_v56 = vadd.f32 %v957_v21, %v917_v28  ;;  %v1192_v12 = vadd.f32 %v1190_v42, %v1149_v23  ;;  %v1023_v4 = vadd.f32 %v1021_v36, %v981_v9  ;;  %v1208_v26 = vpop.permute.xlu0 %1207  ;;  %v1089_v29 = vpop.permute.xlu1 %1088 }
 0x1f3   : > { %v1209_v53 = vrot.slane %v1208_v26, 7  ;;  %v1090_v16 = vrot.slane %v1089_v29, 7 }
 0x1f4   : > { %v1073_v25 = vadd.f32 %v1071_v35, %v1023_v4  ;;  %v1001_v6 = vadd.f32 %v999_v1, %v959_v56  ;;  %1700 = vrot.lane.b32.xlu1 %v1698_v3, %s2241_s0 }
 0x1f5   : > { %v1210_v51 = vsel %vm1060_vm8, %v1209_v53, %v1208_v26  ;;  %v1091_v27 = vsel %vm1060_vm8, %v1090_v16, %v1089_v29 }
 0x1f6   : > { %v1212_v13 = vadd.f32 %v1210_v51, %v1169_v19  ;;  %v1043_v58 = vadd.f32 %v1041_v38, %v1001_v6  ;;  %v1235_v59 = vpop.permute.xlu0 %1234  ;;  %v1112_v17 = vpop.permute.xlu1 %1111 }
 0x1f7   : > { %v1236_v30 = vrot.slane %v1235_v59, 7  ;;  %v1113_v45 = vrot.slane %v1112_v17, 7 }
 0x1f8   : > { %v1093_v22 = vadd.f32 %v1091_v27, %v1043_v58  ;;  %1720 = vrot.lane.b32.xlu1 %v1718_v20, %s2241_s0 }
 0x1f9   : > { %v1238_v43 = vsel %vm1237_vm9, %v1236_v30, %v1235_v59  ;;  %v1114_v31 = vsel %vm1060_vm8, %v1113_v45, %v1112_v17 }
 0x1fa   : > { %v3249_v60 = vadd.f32 %v1238_v43, %v1192_v12  ;;  %v1116_v32 = vadd.f32 %v1114_v31, %v1073_v25  ;;  %v1256_v46 = vpop.permute.xlu0 %1255  ;;  %v1132_v23 = vpop.permute.xlu1 %1131 }
 0x1fb   : > { %v1257_v63 = vrot.slane %v1256_v46, 7  ;;  %v1133_v40 = vrot.slane %v1132_v23, 7 }
 0x1fd   : > { %v1258_v48 = vsel %vm1237_vm9, %v1257_v63, %v1256_v46  ;;  %v1134_v61 = vsel %vm1060_vm8, %v1133_v40, %v1132_v23 }
 0x1fe   : > { %v3253_v0 = vadd.f32 %v1258_v48, %v1212_v13  ;;  %v1136_v15 = vadd.f32 %v1134_v61, %v1093_v22  ;;  %v1277_v33 = vpop.permute.xlu0 %1276  ;;  %v1155_v24 = vpop.permute.xlu1 %1154 }
 0x1ff   : > { %v1156_v41 = vrot.slane %v1155_v24, 7  ;;  %v1278_v30 = vrot.slane %v1277_v33, 7 }
 0x201   : > { %v1157_v34 = vsel %vm1060_vm8, %v1156_v41, %v1155_v24  ;;  %v1279_v31 = vsel %vm1237_vm9, %v1278_v30, %v1277_v33 }
 0x202   : > { %v1159_v7 = vadd.f32 %v1157_v34, %v1116_v32  ;;  %v1297_v37 = vpop.permute.xlu0 %1296  ;;  %v1175_v52 = vpop.permute.xlu1 %1174  ;;  %v1281_v48 = vadd.f32 %v1279_v31, %v3249_v60 }
 0x203   : > { %v1176_v54 = vrot.slane %v1175_v52, 7  ;;  %v1298_v32 = vrot.slane %v1297_v37, 7 }
 0x205   : > { %v1177_v49 = vsel %vm1060_vm8, %v1176_v54, %v1175_v52  ;;  %v1299_v24 = vsel %vm1237_vm9, %v1298_v32, %v1297_v37 }
 0x206   : > { %v1179_v62 = vadd.f32 %v1177_v49, %v1136_v15  ;;  %v1318_v14 = vpop.permute.xlu0 %1317  ;;  %v1198_v18 = vpop.permute.xlu1 %1197 }
 0x207   : > { %v1199_v57 = vrot.slane %v1198_v18, 7  ;;  %v1319_v45 = vrot.slane %v1318_v14, 7 }
 0x209   : > { %v1200_v19 = vsel %vm1060_vm8, %v1199_v57, %v1198_v18  ;;  %v1320_v23 = vsel %vm1237_vm9, %v1319_v45, %v1318_v14  ;;  %v1301_v14 = vadd.f32 %v1299_v24, %v3253_v0 }
 0x20a   : > { %v1202_v50 = vadd.f32 %v1200_v19, %v1159_v7  ;;  %v1338_v11 = vpop.permute.xlu0 %1337  ;;  %v1218_v55 = vpop.permute.xlu1 %1217  ;;  %v1322_v52 = vadd.f32 %v1320_v23, %v1281_v48 }
 0x20b   : > { %v1219_v47 = vrot.slane %v1218_v55, 7  ;;  %v1339_v63 = vrot.slane %v1338_v11, 7 }
 0x20d   : > { %v1220_v2 = vsel %vm1060_vm8, %v1219_v47, %v1218_v55  ;;  %v1340_v33 = vsel %vm1237_vm9, %v1339_v63, %v1338_v11 }
 0x20e   : > { %v1222_v5 = vadd.f32 %v1220_v2, %v1179_v62  ;;  %v1359_v39 = vpop.permute.xlu0 %1358  ;;  %v1246_v28 = vpop.permute.xlu1 %1245  ;;  %v1342_v47 = vadd.f32 %v1340_v33, %v1301_v14 }
 0x20f   : > { %v1247_v9 = vrot.slane %v1246_v28, 7  ;;  %v1360_v46 = vrot.slane %v1359_v39, 7 }
 0x211   : > { %v1248_v8 = vsel %vm1237_vm9, %v1247_v9, %v1246_v28  ;;  %v1361_v41 = vsel %vm1237_vm9, %v1360_v46, %v1359_v39 }
 0x212   : > { %v3260_v21 = vadd.f32 %v1248_v8, %v1202_v50  ;;  %v1379_v36 = vpop.permute.xlu0 %1378  ;;  %v1266_v44 = vpop.permute.xlu1 %1265  ;;  %v1363_v60 = vadd.f32 %v1361_v41, %v1322_v52 }
 0x213   : > { %v1267_v42 = vrot.slane %v1266_v44, 7  ;;  %v1380_v34 = vrot.slane %v1379_v36, 7 }
 0x215   : > { %v1268_v56 = vsel %vm1237_vm9, %v1267_v42, %v1266_v44  ;;  %v1381_v19 = vsel %vm1237_vm9, %v1380_v34, %v1379_v36 }
 0x216   : > { %v3263_v12 = vadd.f32 %v1268_v56, %v1222_v5  ;;  %v1399_v4 = vpop.permute.xlu0 %1398  ;;  %v3265_v26 = vpop.permute.xlu1 %1286  ;;  %v1383_v9 = vadd.f32 %v1381_v19, %v1342_v47 }
 0x217   : > { %v1400_v40 = vrot.slane %v1399_v4, 7 }
 0x219   : > { %v1402_v54 = vsel %vm1401_vm10, %v1400_v40, %v1399_v4 }
 0x21a   : > { %v1420_v29 = vpop.permute.xlu0 %1419  ;;  %v3267_v3 = vpop.permute.xlu1 %1306  ;;  %v1404_v2 = vadd.f32 %v1402_v54, %v1363_v60  ;;  %v1288_v54 = vrot.slane %v3265_v26, 7 }
 0x21b   : > { %v1421_v49 = vrot.slane %v1420_v29, 7 }
 0x21c   : > { %v1289_v47 = vsel %vm1237_vm9, %v1288_v54, %v3265_v26 }
 0x21d   : > { %v1422_v11 = vsel %vm1401_vm10, %v1421_v49, %v1420_v29 }
 0x21e   : > { %v1440_v1 = vpop.permute.xlu0 %1439  ;;  %v3269_v35 = vpop.permute.xlu1 %1327 }
 0x21f   : > { %v1441_v7 = vrot.slane %v1440_v1, 7 }
 0x221   : > { %v1442_v37 = vsel %vm1401_vm10, %v1441_v7, %v1440_v1  ;;  %v1424_v1 = vadd.f32 %v1422_v11, %v1383_v9 }
 0x222   : > { %v1460_v53 = vpop.permute.xlu0 %1459  ;;  %v3271_v16 = vpop.permute.xlu1 %1347  ;;  %v1444_v0 = vadd.f32 %v1442_v37, %v1404_v2  ;;  %v1308_v2 = vrot.slane %v3267_v3, 7 }
 0x223   : > { %v1461_v50 = vrot.slane %v1460_v53, 7 }
 0x225   : > { %v1462_v36 = vsel %vm1401_vm10, %v1461_v50, %v1460_v53 }
 0x226   : > { %v1480_v25 = vpop.permute.xlu0 %1479  ;;  %v3273_v6 = vpop.permute.xlu1 %1368  ;;  %v1464_v32 = vadd.f32 %v1462_v36, %v1424_v1 }
 0x227   : > { %v1481_v62 = vrot.slane %v1480_v25, 7 }
 0x229   : > { %v1482_v5 = vsel %vm1401_vm10, %v1481_v62, %v1480_v25 }
 0x22a   : > { %v1500_v38 = vpop.permute.xlu0 %1499  ;;  %v3275_v51 = vpop.permute.xlu1 %1388  ;;  %v1484_v30 = vadd.f32 %v1482_v5, %v1444_v0 }
 0x22b   : > { %v1501_v39 = vrot.slane %v1500_v38, 7 }
 0x22d   : > { %v1502_v29 = vsel %vm1401_vm10, %v1501_v39, %v1500_v38 }
 0x22e   : > { %v1520_v13 = vpop.permute.xlu0 %1519  ;;  %v3277_v58 = vpop.permute.xlu1 %1409  ;;  %v1504_v48 = vadd.f32 %v1502_v29, %v1464_v32 }
 0x22f   : > { %v1521_v55 = vrot.slane %v1520_v13, 7  ;;  %v1411_v9 = vrot.slane %v3277_v58, 7 }
 0x231   : > { %v1522_v42 = vsel %vm1401_vm10, %v1521_v55, %v1520_v13 }
 0x232   : > { %v1540_v59 = vpop.permute.xlu0 %1539  ;;  %v3279_v17 = vpop.permute.xlu1 %1429  ;;  %v1524_v46 = vadd.f32 %v1522_v42, %v1484_v30  ;;  %v1309_v42 = vsel %vm1237_vm9, %v1308_v2, %v3267_v3 }
 0x233   : > { %v1541_v56 = vrot.slane %v1540_v59, 7  ;;  %v1431_v29 = vrot.slane %v3279_v17, 7 }
 0x235   : > { %v1542_v40 = vsel %vm1401_vm10, %v1541_v56, %v1540_v59 }
 0x236   : > { %v1567_v20 = vpop.permute.xlu0 %1566  ;;  %v3281_v27 = vpop.permute.xlu1 %1449 }
 0x237   : > { %v1568_v28 = vrot.slane %v1567_v20, 7 }
 0x239   : > { %v1570_v25 = vsel %vm1569_vm11, %v1568_v28, %v1567_v20  ;;  %v1544_v20 = vadd.f32 %v1542_v40, %v1504_v48  ;;  %v1349_v28 = vrot.slane %v3271_v16, 7  ;;  %v1432_v40 = vsel %vm1401_vm10, %v1431_v29, %v3279_v17 }
 0x23a   : > { %v1588_v22 = vpop.permute.xlu0 %1587  ;;  %v3283_v43 = vpop.permute.xlu1 %1469  ;;  %v1572_v24 = vadd.f32 %v1570_v25, %v1524_v46  ;;  %v1311_v25 = vadd.f32 %v1309_v42, %v3263_v12 }
 0x23b   : > { %v1589_v45 = vrot.slane %v1588_v22, 7  ;;  %v1350_v30 = vsel %vm1237_vm9, %v1349_v28, %v3271_v16  ;;  %v1471_v46 = vrot.slane %v3283_v43, 7 }
 0x23d   : > { %v1590_v41 = vsel %vm1569_vm11, %v1589_v45, %v1588_v22 }
 0x23e   : > { %v1609_v61 = vpop.permute.xlu0 %1608  ;;  %v3288_v15 = vpop.permute.xlu1 %1489  ;;  %v1592_v59 = vadd.f32 %v1590_v41, %v1544_v20 }
 0x23f   : > { %v1610_v4 = vrot.slane %v1609_v61, 7  ;;  %v1491_v3 = vrot.slane %v3288_v15, 7 }
 0x241   : > { %v1611_v53 = vsel %vm1569_vm11, %v1610_v4, %v1609_v61  ;;  %v1329_v61 = vrot.slane %v3269_v35, 7  ;;  %v1390_v4 = vrot.slane %v3275_v51, 7  ;;  %v1492_v12 = vsel %vm1401_vm10, %v1491_v3, %v3288_v15 }
 0x242   : > { %v1629_v18 = vpop.permute.xlu0 %1628  ;;  %v3295_v57 = vpop.permute.xlu1 %1509  ;;  %v1613_v7 = vadd.f32 %v1611_v53, %v1572_v24 }
 0x243   : > { %v1630_v13 = vrot.slane %v1629_v18, 7  ;;  %v1330_v39 = vsel %vm1237_vm9, %v1329_v61, %v3269_v35  ;;  %v1451_v35 = vrot.slane %v3281_v27, 7  ;;  %v1511_v53 = vrot.slane %v3295_v57, 7 }
 0x245   : > { %v1631_v49 = vsel %vm1569_vm11, %v1630_v13, %v1629_v18  ;;  %v1370_v18 = vrot.slane %v3273_v6, 7  ;;  %v1452_v32 = vsel %vm1401_vm10, %v1451_v35, %v3281_v27  ;;  %v1472_v27 = vsel %vm1401_vm10, %v1471_v46, %v3283_v43 }
 0x246   : > { %v1650_v8 = vpop.permute.xlu0 %1649  ;;  %v3301_v44 = vpop.permute.xlu1 %1529  ;;  %v1633_v19 = vadd.f32 %v1631_v49, %v1592_v59  ;;  %v1512_v15 = vsel %vm1401_vm10, %v1511_v53, %v3295_v57 }
 0x247   : > { %v1651_v31 = vrot.slane %v1650_v8, 7  ;;  %v1371_v56 = vsel %vm1237_vm9, %v1370_v18, %v3273_v6  ;;  %v1531_v16 = vrot.slane %v3301_v44, 7 }
 0x249   : > { %v1652_v38 = vsel %vm1569_vm11, %v1651_v31, %v1650_v8  ;;  %v1291_v8 = vadd.f32 %v1289_v47, %v3260_v21  ;;  %v1412_v21 = vsel %vm1401_vm10, %v1411_v9, %v3277_v58  ;;  %v1391_v31 = vsel %vm1237_vm9, %v1390_v4, %v3275_v51 }
 0x24a   : > { %v1670_v23 = vpop.permute.xlu0 %1669  ;;  %v3307_v63 = vpop.permute.xlu1 %1549  ;;  %v1654_v14 = vadd.f32 %v1652_v38, %v1613_v7  ;;  %v1532_v41 = vsel %vm1401_vm10, %v1531_v16, %v3301_v44 }
 0x24b   : > { %v1671_v34 = vrot.slane %v1670_v23, 7  ;;  %v1332_v1 = vadd.f32 %v1330_v39, %v1291_v8  ;;  %v1551_v38 = vrot.slane %v3307_v63, 7 }
 0x24d   : > { %v1672_v60 = vsel %vm1569_vm11, %v1671_v34, %v1670_v23  ;;  %v1373_v6 = vadd.f32 %v1371_v56, %v1332_v1  ;;  %v1352_v23 = vadd.f32 %v1350_v30, %v1311_v25  ;;  %v1552_v43 = vsel %vm1401_vm10, %v1551_v38, %v3307_v63 }
 0x24e   : > { %v1691_v52 = vpop.permute.xlu0 %1690  ;;  %v1578_v33 = vpop.permute.xlu1 %1577  ;;  %v1674_v5 = vadd.f32 %v1672_v60, %v1633_v19 }
 0x24f   : > { %v1692_v62 = vrot.slane %v1691_v52, 7  ;;  %v1414_v58 = vadd.f32 %v1412_v21, %v1373_v6  ;;  %v1579_v13 = vrot.slane %v1578_v33, 7  ;;  %v1393_v48 = vadd.f32 %v1391_v31, %v1352_v23 }
 0x251   : > { %v1693_v22 = vsel %vm1569_vm11, %v1692_v62, %v1691_v52  ;;  %v1454_v51 = vadd.f32 %v1452_v32, %v1414_v58  ;;  %v1434_v20 = vadd.f32 %v1432_v40, %v1393_v48  ;;  %v1580_v7 = vsel %vm1569_vm11, %v1579_v13, %v1578_v33 }
 0x252   : > { %v1695_v37 = vadd.f32 %v1693_v22, %v1654_v14  ;;  %v1711_v50 = vpop.permute.xlu0 %1710  ;;  %v1598_v55 = vpop.permute.xlu1 %1597 }
 0x253   : > { %v1712_v11 = vrot.slane %v1711_v50, 7  ;;  %v1494_v17 = vadd.f32 %v1492_v12, %v1454_v51  ;;  %v1599_v52 = vrot.slane %v1598_v55, 7  ;;  %v1474_v49 = vadd.f32 %v1472_v27, %v1434_v20 }
 0x254   : > { %1732 = vrot.lane.b32.xlu0 %v1695_v37, %s3486_s28 }
 0x255   : > { %v1713_v0 = vsel %vm1569_vm11, %v1712_v11, %v1711_v50  ;;  %v1534_v62 = vadd.f32 %v1532_v41, %v1494_v17  ;;  %v1514_v61 = vadd.f32 %v1512_v15, %v1474_v49  ;;  %v1600_v22 = vsel %vm1569_vm11, %v1599_v52, %v1598_v55 }
 0x256   : > { %v1715_v26 = vadd.f32 %v1713_v0, %v1674_v5  ;;  %v1619_v36 = vpop.permute.xlu1 %1618 }
 0x257   : > { %v1620_v34 = vrot.slane %v1619_v36, 7  ;;  %v1582_v60 = vadd.f32 %v1580_v7, %v1534_v62  ;;  %v1554_v37 = vadd.f32 %v1552_v43, %v1514_v61 }
 0x258   : > { %1754 = vrot.lane.b32.xlu0 %v1715_v26, %s3486_s28 }
 0x259   : > { %v1621_v44 = vsel %vm1569_vm11, %v1620_v34, %v1619_v36  ;;  %v1602_v18 = vadd.f32 %v1600_v22, %v1554_v37 }
 0x25a   : > { %v1639_v45 = vpop.permute.xlu1 %1638  ;;  %v1623_v33 = vadd.f32 %v1621_v44, %v1582_v60 }
 0x25b   : > { %v1640_v14 = vrot.slane %v1639_v45, 7 }
 0x25d   : > { %v1641_v47 = vsel %vm1569_vm11, %v1640_v14, %v1639_v45 }
 0x25e   : > { %v1660_v24 = vpop.permute.xlu1 %1659  ;;  %v1643_v39 = vadd.f32 %v1641_v47, %v1602_v18 }
 0x25f   : > { %v1661_v54 = vrot.slane %v1660_v24, 7 }
 0x261   : > { %v1662_v19 = vsel %vm1569_vm11, %v1661_v54, %v1660_v24 }
 0x262   : > { %v1680_v59 = vpop.permute.xlu1 %1679  ;;  %v1664_v11 = vadd.f32 %v1662_v19, %v1623_v33 }
 0x263   : > { %v1681_v57 = vrot.slane %v1680_v59, 7 }
 0x265   : > { %v1682_v63 = vsel %vm1569_vm11, %v1681_v57, %v1680_v59 }
 0x266   : > { %v1701_v50 = vpop.permute.xlu1 %1700  ;;  %v1684_v0 = vadd.f32 %v1682_v63, %v1643_v39 }
 0x267   : > { %v1702_v2 = vrot.slane %v1701_v50, 7 }
 0x269   : > { %v1703_v5 = vsel %vm1569_vm11, %v1702_v2, %v1701_v50 }
 0x26a   : > { %v1705_v28 = vadd.f32 %v1703_v5, %v1664_v11  ;;  %v1721_v55 = vpop.permute.xlu1 %1720 }
 0x26b   : > { %v1722_v9 = vrot.slane %v1721_v55, 7 }
 0x26c   : > { %1745 = vrot.lane.b32.xlu1 %v1705_v28, %s3486_s28 }
 0x26d   : > { %v1723_v8 = vsel %vm1569_vm11, %v1722_v9, %v1721_v55 }
 0x26e   : > { %v1725_v26 = vadd.f32 %v1723_v8, %v1684_v0 }
 0x270   : > { %1763 = vrot.lane.b32.xlu1 %v1725_v26, %s3486_s28 }
 0x2c6   : > { %v1733_v36 = vpop.permute.xlu0 %1732 }
 0x2c7   : > { %v1734_v56 = vrot.slane %v1733_v36, 1 }
 0x2c9   : > { %v1735_v4 = vsel %vm1558_vm6, %v1733_v36, %v1734_v56 }
 0x2ca   : > { %2023 = vst.msk [vmem:[%s2428_s14 + $0x4] ss:$8 sm:$0x3] %vm3374_vm12, %v1735_v4  ;;  %v1755_v35 = vpop.permute.xlu0 %1754 }
 0x2cb   : > { %v1756_v1 = vrot.slane %v1755_v35, 1 }
 0x2cd   : > { %v1757_v30 = vsel %vm1558_vm6, %v1755_v35, %v1756_v1 }
 0x2ce   : > { %2025 = vst.msk [vmem:[%s2428_s14 + $0x6] ss:$8 sm:$0x3] %vm3374_vm12, %v1757_v30 }
 0x2de   : > { %v1746_v10 = vpop.permute.xlu1 %1745 }
 0x2df   : > { %v1747_v21 = vrot.slane %v1746_v10, 1 }
 0x2e1   : > { %v1748_v29 = vsel %vm1558_vm6, %v1746_v10, %v1747_v21 }
 0x2e2   : > { %2024 = vst.msk [vmem:[%s2428_s14 + $0x5] ss:$8 sm:$0x3] %vm3374_vm12, %v1748_v29  ;;  %v1764_v3 = vpop.permute.xlu1 %1763 }
 0x2e3   : > { %v1765_v25 = vrot.slane %v1764_v3, 1 }
 0x2e5   : > { %v1766_v6 = vsel %vm1558_vm6, %v1764_v3, %v1765_v25 }
 0x2e6   : > { %2026 = vst.msk [vmem:[%s2428_s14 + $0x7] ss:$8 sm:$0x3] %vm3374_vm12, %v1766_v6 }
 0x2e7   : > { %2166 = shalt.err (!%p2163_p5)
}
 0x2e8   : > { %s2167_s8 = scalar_lea.hbm %s3395_s7, 256  ;;  %s2171_s0 = scalar_lea.hbm %s3448_s5, 512 }
 0x2e9   : > { %p2168_p10 = scmp.ne.s32.totalorder %s3395_s7, %s2167_s8  ;;  %p2172_p4 = scmp.lt.u32.totalorder %s3395_s7, %s3448_s5 }
 0x2ea   : > { %p2173_p6 = scmp.lt.u32.totalorder %s2171_s0, %s2167_s8  ;;  %p2175_p8 = scmp.lt.u32.totalorder %s2167_s8, %s3395_s7 }
 0x2eb   : > { %p2169_p2 = pnand %p2168_p10, %p3489_p11 }
 0x2ec   : > { %p2174_p9 = por %p2173_p6, %p2172_p4 }
 0x2ed   : > { %p2170_p1 = pneg %p2169_p2 }
 0x2ee   : > { %p2176_p13 = por %p2175_p8, %p2174_p9 }
 0x2f0   : > { %p2177_p7 = pnand %p2176_p13, %p2170_p1 }
 0x2f2   : > { %2180 = shalt.err (!%p2177_p7)
}
 0x2f3   : > { %2040 = dma.vmem_to_hbm [thread:$0]  (%p3489_p11), %s3397_s6, 256, %s3395_s7, %s1772_s22  }
 0x2f4 PF: > { %s1798_s4 = sand.u32 1, %s2211_s18   ;;  %p3490_p0 = scmp.ne.s32.totalorder %s3468_s25, 0 }
 0x2f5   : > { %p3491_p3 = scmp.ge.s32.totalorder %s2223_s21, 2  ;;  %s1799_s9 = scalar_lea.sflag [#allocation5], %s1798_s4 }
 0x2f7   : > { %p2051_p12 = pnand %p3491_p3, %p3490_p0 }
 0x2f9   : > { %2206 = dma.done.wait (!%p2051_p12), %s1799_s9, 256  }
 0x2fa   : > { %2208 = vsyncadd (!%p2051_p12), %s1799_s9, 4294967040  ;;  %s3492_s18 = sld [smem:[#allocation12_spill]]  ;;  %s3493_s19 = sld [smem:[#allocation13_spill]] }
 0x2fb   : > { %s3494_s20 = sld [smem:[#allocation14_spill]]  ;;  %p19_p5 = scmp.ge.s32.totalorder %s2324_s30, 4  }
 0x2fc   : > { %s3495_s21 = smov %s2324_s30 }
 0x2fd   :  { %21 = sbr.rel (!%p19_p5) target bundleno = 12 (0xc), region = 106 }
 0x304   :  { %1804 = vsyncpa [#allocation4], 1 }
 0x305   :  { %1806 = vsyncpa [#allocation4 + $0x1], 1 }
 0x306   :  { %1807 = vsyncpa [#allocation5], 1 }
 0x307   :  { %1809 = vsyncpa [#allocation5 + $0x1], 1 }
 0x308   :  { %1810 = vsyncpa [#allocation6], 1 }
 0x309   :  { %1812 = vsyncpa [#allocation6 + $0x1], 1 }

</bundles_post_ra>
